<compile_context>
chip_gen: v7x
topology: tpu7x:2x2x1
jax: 0.10.0
libtpu: 0.0.40
codegen_flags: <defaults>
</compile_context>

<pallas_src>
import functools

import numpy as np
import jax
import jax.numpy as jnp
from jax.experimental import pallas as pl
from jax.experimental.pallas import tpu as pltpu

_EPS = 1e-5


# ---------------------------------------------------------------------------
# Kernel 1: fully fused per-user chain (pilot -> refine conv -> FC stack)
# ---------------------------------------------------------------------------
def _user_kernel(hc_ref, nz_ref, xc_ref, rm_ref,
                 cw1_ref, cg1_ref, cb1_ref,
                 cw2_ref, cg2_ref, cb2_ref,
                 cw3_ref, cg3_ref, cb3_ref,
                 ga1_ref, ga2_ref, ga3_ref,
                 fw1_ref, fg1_ref, fb1_ref,
                 fw2_ref, fg2_ref, fb2_ref,
                 fw3_ref, fg3_ref, fb3_ref,
                 q_ref, *, bszv, noise_std, anneal):
    rmask = rm_ref[...]                       # (bszp, 1): 1.0 for real rows
    inv_n = 1.0 / float(bszv)

    # ---- pilot: [y_r | y_i] = [Hr | Hi] @ Xc + noise_std * n  -> (bszp, 2L)
    # Columns are in PyTorch flatten order (c*L + l).
    # TODO(synk): SubArrayPilotNet source not provided; assumes y = H @ X^T
    # with X = sqrt(P/M) * exp(j*X_theta) and externally supplied noise.
    y = (jnp.dot(hc_ref[0], xc_ref[...], preferred_element_type=jnp.float32)
         + noise_std * nz_ref[0])

    # ---- refine encoder: Conv1d(k=5,p=2,bias=False)+BN(+ReLU) x3, each as a
    # single block-Toeplitz matmul.  BN is per-channel over (batch, L): masked
    # column sums averaged per channel group via a (C*L, C*L) 1/L block-diag
    # matmul (gives the channel statistic already broadcast to its L columns).
    def conv_bn(x, w_ref, g_ref, b_ref, ga_ref, relu):
        z = jnp.dot(x, w_ref[0], preferred_element_type=jnp.float32)
        zm = z * rmask
        stats = jnp.concatenate([jnp.sum(zm, axis=0, keepdims=True),
                                 jnp.sum(zm * z, axis=0, keepdims=True)],
                                axis=0)                          # (2, C*L)
        stats = jnp.dot(stats, ga_ref[...],
                        preferred_element_type=jnp.float32) * inv_n
        mu, ez2 = stats[0:1, :], stats[1:2, :]
        var = jnp.maximum(ez2 - mu * mu, 0.0)
        z = (z - mu) * jax.lax.rsqrt(var + _EPS) * g_ref[0] + b_ref[0]
        return jnp.maximum(z, 0.0) if relu else z

    h = conv_bn(y, cw1_ref, cg1_ref, cb1_ref, ga1_ref, True)
    h = conv_bn(h, cw2_ref, cg2_ref, cb2_ref, ga2_ref, True)
    x = y + conv_bn(h, cw3_ref, cg3_ref, cb3_ref, ga3_ref, False)  # residual

    # ---- FC stack (bf16 weights, f32 accumulate / BN math).  Linear biases
    # are dropped (training-mode BN subtracts the batch mean: exact no-op).
    def fc_bn(x, w_ref, g_ref, b_ref):
        z = jnp.dot(x.astype(jnp.bfloat16), w_ref[0],
                    preferred_element_type=jnp.float32)
        zm = z * rmask
        mu = jnp.sum(zm, axis=0, keepdims=True) * inv_n
        var = jnp.maximum(jnp.sum(zm * z, axis=0, keepdims=True) * inv_n
                          - mu * mu, 0.0)
        return (z - mu) * jax.lax.rsqrt(var + _EPS) * g_ref[0] + b_ref[0]

    f = jnp.maximum(fc_bn(x, fw1_ref, fg1_ref, fb1_ref), 0.0)
    f = jnp.maximum(fc_bn(f, fw2_ref, fg2_ref, fb2_ref), 0.0)
    f = jax.nn.sigmoid(fc_bn(f, fw3_ref, fg3_ref, fb3_ref)) - 0.5
    # TODO(synk): SigmoidT autograd fn not provided; forward = sigmoid(anneal*y).
    q_ref[0] = jax.nn.sigmoid(anneal * f)


def user_net_all(Hc, nz, Xc, rmask, ga, up, *, bszv, noise_std, anneal):
    K, bszp, _ = Hc.shape
    B = up['fw3'].shape[2]

    def pu(a):   # per-user operand (leading K axis)
        return pl.BlockSpec((1,) + a.shape[1:], lambda k: (k, 0, 0))

    def sh(a):   # shared operand (resident across grid steps)
        return pl.BlockSpec(a.shape, lambda k: (0, 0))

    convs = [up['cw1'], up['cg1'], up['cb1'],
             up['cw2'], up['cg2'], up['cb2'],
             up['cw3'], up['cg3'], up['cb3']]
    fcs = [up['fw1'], up['fg1'], up['fb1'],
           up['fw2'], up['fg2'], up['fb2'],
           up['fw3'], up['fg3'], up['fb3']]
    operands = [Hc, nz, Xc, rmask] + convs + list(ga) + fcs
    in_specs = ([pu(Hc), pu(nz), sh(Xc), sh(rmask)]
                + [pu(a) for a in convs]
                + [sh(a) for a in ga]
                + [pu(a) for a in fcs])

    kernel = functools.partial(_user_kernel, bszv=bszv,
                               noise_std=float(noise_std), anneal=float(anneal))
    return pl.pallas_call(
        kernel,
        out_shape=jax.ShapeDtypeStruct((K, bszp, B), jnp.float32),
        grid=(K,),
        in_specs=in_specs,
        out_specs=pl.BlockSpec((1, bszp, B), lambda k: (k, 0, 0)),
        compiler_params=pltpu.CompilerParams(
            dimension_semantics=("parallel",)),
    )(*operands)


# ---------------------------------------------------------------------------
# Kernel 2: fused decoder FC stack + (fc_theta | fc_d) heads + cos/sin +
#           hybrid-beamformer merge, all in one launch (bf16 weights).
# ---------------------------------------------------------------------------
def _decoder_merge_kernel(q_ref, rm_ref, w1_ref, g1_ref, b1_ref,
                          w2_ref, g2_ref, b2_ref, w3_ref, g3_ref, b3_ref,
                          wh_ref, bh_ref, maskT_ref, o_ref,
                          *, bszv, K, M, sqrtP):
    rmask = rm_ref[...]
    inv_n = 1.0 / float(bszv)

    def bn(z, g, b):
        zm = z * rmask
        mu = jnp.sum(zm, axis=0, keepdims=True) * inv_n
        var = jnp.maximum(jnp.sum(zm * z, axis=0, keepdims=True) * inv_n
                          - mu * mu, 0.0)
        return (z - mu) * jax.lax.rsqrt(var + _EPS) * g + b

    def mm(x, w_ref):
        return jnp.dot(x.astype(jnp.bfloat16), w_ref[...],
                       preferred_element_type=jnp.float32)

    # fc1: contract each user's feedback slab with its row block of W1 and
    # sum — identical to concat(q_k, axis=1) @ W1, with no feedback relayout.
    z1 = jnp.dot(q_ref[0].astype(jnp.bfloat16), w1_ref[0],
                 preferred_element_type=jnp.float32)
    for k in range(1, K):
        z1 = z1 + jnp.dot(q_ref[k].astype(jnp.bfloat16), w1_ref[k],
                          preferred_element_type=jnp.float32)
    f = jnp.maximum(bn(z1, g1_ref[...], b1_ref[...]), 0.0)
    f = jnp.maximum(bn(mm(f, w2_ref), g2_ref[...], b2_ref[...]), 0.0)
    f = jnp.maximum(bn(mm(f, w3_ref), g3_ref[...], b3_ref[...]), 0.0)

    # Heads + merge epilogue (pure VPU).
    # TODO(synk): SubArrayHybridBeamformingNet / merge_hybrid_beamformer not
    # provided; assumed A = exp(j*theta)*mask (analog), D from dflat (digital),
    # V = A @ D with Frobenius power normalization C = sqrt(P)/||V||_F.
    heads = mm(f, wh_ref) + bh_ref[...]          # (bszp, M + 2*K*K)
    theta = heads[:, :M]
    d = heads[:, M:]
    ct, st = jnp.cos(theta), jnp.sin(theta)
    KK = K * K
    ar = [ct * maskT_ref[j:j + 1, :] for j in range(K)]   # A^T[b, j, :]
    ai = [st * maskT_ref[j:j + 1, :] for j in range(K)]
    outs_r, outs_i, sq = [], [], None
    for k in range(K):
        pr = jnp.zeros_like(ct)
        pi = jnp.zeros_like(ct)
        for j in range(K):
            dr = d[:, j * K + k:j * K + k + 1]
            di = d[:, KK + j * K + k:KK + j * K + k + 1]
            pr = pr + dr * ar[j] - di * ai[j]
            pi = pi + dr * ai[j] + di * ar[j]
        outs_r.append(pr)
        outs_i.append(pi)
        s = pr * pr + pi * pi
        sq = s if sq is None else sq + s
    nrm = jnp.sum(sq, axis=1, keepdims=True)
    scale = sqrtP * jax.lax.rsqrt(nrm + 1e-12)
    o_ref[...] = jnp.concatenate(outs_r + outs_i, axis=1) * scale


def decoder_merge(bp, q_all, rmask, maskT, *, bszv, K, M, P):
    bszp = q_all.shape[1]
    kernel = functools.partial(_decoder_merge_kernel, bszv=bszv, K=K, M=M,
                               sqrtP=float(np.sqrt(P)))
    return pl.pallas_call(
        kernel,
        out_shape=jax.ShapeDtypeStruct((bszp, 2 * K * M), jnp.float32),
        compiler_params=pltpu.CompilerParams(
            vmem_limit_bytes=32 * 1024 * 1024),
    )(q_all, rmask, bp['w1'], bp['g1'], bp['b1'], bp['w2'], bp['g2'], bp['b2'],
      bp['w3'], bp['g3'], bp['b3'], bp['wh'], bp['bh'], maskT)


# ---------------------------------------------------------------------------
# Parameter construction (PyTorch-default-style init, packed layouts)
# ---------------------------------------------------------------------------
def _uniform(key, shape, bound):
    return jax.random.uniform(key, shape, jnp.float32, -float(bound), float(bound))


def _conv_block_matrix(w, L):
    # Conv1d(k=5, pad=2) as a block-Toeplitz matrix:
    #   out[b, co*L+lo] = sum_{ci,li} x[b, ci*L+li] * Wb[ci*L+li, co*L+lo]
    co, ci, _ = w.shape
    wnp = np.asarray(w)
    wb = np.zeros((ci * L, co * L), np.float32)
    for c_o in range(co):
        for c_i in range(ci):
            for lo in range(L):
                for li in range(max(0, lo - 2), min(L, lo + 3)):
                    wb[c_i * L + li, c_o * L + lo] = wnp[c_o, c_i, li - lo + 2]
    return jnp.asarray(wb)


def _group_avg_matrix(C, L):
    # (C*L, C*L) block-diagonal 1/L averaging matrix (per-channel mean).
    g = np.kron(np.eye(C, dtype=np.float32),
                np.full((L, L), 1.0 / L, np.float32))
    return jnp.asarray(g)


def init_params(key, M, L, K, B):
    keys = iter(jax.random.split(key, 6 * K + 8))
    conv_dims = [(8, 2), (16, 8), (2, 16)]          # (Cout, Cin) per conv layer
    names = ['cw1', 'cg1', 'cb1', 'cw2', 'cg2', 'cb2', 'cw3', 'cg3', 'cb3',
             'fw1', 'fg1', 'fb1', 'fw2', 'fg2', 'fb2', 'fw3', 'fg3', 'fb3']
    users = {n: [] for n in names}
    for _ in range(K):
        for i, (co, ci) in enumerate(conv_dims, start=1):
            w = _uniform(next(keys), (co, ci, 5), 1.0 / np.sqrt(ci * 5))
            users[f'cw{i}'].append(_conv_block_matrix(w, L))
            users[f'cg{i}'].append(jnp.ones((1, co * L), jnp.float32))
            users[f'cb{i}'].append(jnp.zeros((1, co * L), jnp.float32))
        for fi, fo, wn, gn, bn_ in [(2 * L, 1024, 'fw1', 'fg1', 'fb1'),
                                    (1024, 512, 'fw2', 'fg2', 'fb2'),
                                    (512, B, 'fw3', 'fg3', 'fb3')]:
            w = _uniform(next(keys), (fi, fo), 1.0 / np.sqrt(fi))
            users[wn].append(w.astype(jnp.bfloat16))
            users[gn].append(jnp.ones((1, fo), jnp.float32))
            users[bn_].append(jnp.zeros((1, fo), jnp.float32))
    users = {k_: jnp.stack(v) for k_, v in users.items()}

    KK = K * K
    bs = {
        'w1': _uniform(next(keys), (K * B, 2048),
                       1.0 / np.sqrt(K * B)).reshape(K, B, 2048).astype(jnp.bfloat16),
        'g1': jnp.ones((1, 2048), jnp.float32),
        'b1': jnp.zeros((1, 2048), jnp.float32),
        'w2': _uniform(next(keys), (2048, 1024),
                       1.0 / np.sqrt(2048)).astype(jnp.bfloat16),
        'g2': jnp.ones((1, 1024), jnp.float32),
        'b2': jnp.zeros((1, 1024), jnp.float32),
        'w3': _uniform(next(keys), (1024, 1024),
                       1.0 / np.sqrt(1024)).astype(jnp.bfloat16),
        'g3': jnp.ones((1, 1024), jnp.float32),
        'b3': jnp.zeros((1, 1024), jnp.float32),
    }
    # TODO(synk): SubArrayHybridBeamformingNet source not provided; assumed
    # heads: analog phases (1024 -> M) and digital beamformer (1024 -> 2*K*K).
    w_t = _uniform(next(keys), (1024, M), 1.0 / np.sqrt(1024))
    b_t = _uniform(next(keys), (1, M), 1.0 / np.sqrt(1024))
    w_d = _uniform(next(keys), (1024, 2 * KK), 1.0 / np.sqrt(1024))
    b_d = _uniform(next(keys), (1, 2 * KK), 1.0 / np.sqrt(1024))
    bs['wh'] = jnp.concatenate([w_t, w_d], axis=1).astype(jnp.bfloat16)
    bs['bh'] = jnp.concatenate([b_t, b_d], axis=1)
    return {'users': users, 'bs': bs}


def make_x_theta(M, L):
    n = np.arange(M)
    dft = np.exp(-2j * np.pi * np.outer(n, n) / M)
    step = int(np.floor(M / L))
    X = np.angle(dft[::step, :][:L, :])
    return jnp.asarray(X, jnp.float32)


# ---------------------------------------------------------------------------
# Module forward
# ---------------------------------------------------------------------------
def subarray_efb_refine_net_forward(params, X_theta, H_real, H_imag,
                                    noise_std, anneal_factor, P, noise, mask):
    bsz, M, K = H_real.shape
    L = X_theta.shape[0]

    # Zero-pad the batch to the 8-row f32 sublane tile; all BatchNorm stats in
    # the kernels are masked to the first `bsz` rows, so the padding rows never
    # influence the numerics (and no whole-batch duplication is needed).
    bszp = max(8, -(-bsz // 8) * 8)
    pad = bszp - bsz
    Hr = jnp.pad(H_real, ((0, pad), (0, 0), (0, 0)))
    Hi = jnp.pad(H_imag, ((0, pad), (0, 0), (0, 0)))
    nz = jnp.pad(noise, ((0, 0), (0, pad), (0, 0)))          # (K, bszp, 2L)
    rmask = (jnp.arange(bszp) < bsz).astype(jnp.float32).reshape(bszp, 1)

    # Per-user complex channel packed as [Hr | Hi]  -> (K, bszp, 2M).
    Hc = jnp.transpose(jnp.concatenate([Hr, Hi], axis=1), (2, 0, 1))

    # Pilot matrix packed so that  [y_r | y_i] = Hc @ Xc  (columns = (c, l)).
    s = float(np.sqrt(P / M))
    ct = jnp.transpose(jnp.cos(X_theta)) * s                 # (M, L)
    st = jnp.transpose(jnp.sin(X_theta)) * s
    Xc = jnp.concatenate([jnp.concatenate([ct, st], axis=1),
                          jnp.concatenate([-st, ct], axis=1)], axis=0)

    ga = (_group_avg_matrix(8, L), _group_avg_matrix(16, L),
          _group_avg_matrix(2, L))

    # One fused Pallas call for all K users (parallel user grid axis).
    q_all = user_net_all(Hc, nz, Xc, rmask, ga, params['users'],
                         bszv=bsz, noise_std=noise_std, anneal=anneal_factor)
    # TODO(synk): self.anneal_factor *= anneal_rate state update is training
    # bookkeeping that does not affect this forward pass; skipped.

    # Fused decoder + heads + cos/sin + hybrid-beamformer merge.
    vt = decoder_merge(params['bs'], q_all, rmask, jnp.transpose(mask),
                       bszv=bsz, K=K, M=M, P=P)              # (bszp, 2*K*M)
    KM = K * M
    V_real = jnp.transpose(vt[:, :KM].reshape(bszp, K, M), (0, 2, 1))[:bsz]
    V_imag = jnp.transpose(vt[:, KM:].reshape(bszp, K, M), (0, 2, 1))[:bsz]
    return V_real, V_imag


# ---------------------------------------------------------------------------
if __name__ == "__main__":
    M, L, P, K, B = 16, 8, 1.0, 2, 8
    anneal_init = 1.0
    batch = 4

    key = jax.random.PRNGKey(0)
    kp, kh1, kh2, kn = jax.random.split(key, 4)

    params = init_params(kp, M, L, K, B)
    X_theta = make_x_theta(M, L)

    # sub-array mask: antenna m connected to RF chain m // (M // K)
    mask_np = (np.arange(M)[:, None] // (M // K) == np.arange(K)[None, :])
    mask = jnp.asarray(mask_np, jnp.float32)

    H_real = jax.random.normal(kh1, (batch, M, K), jnp.float32)
    H_imag = jax.random.normal(kh2, (batch, M, K), jnp.float32)
    # TODO(synk): SubArrayPilotNet source not provided; pilot noise is supplied
    # externally as noise_std * n (same convention as the prior version).
    noise = jax.random.normal(kn, (K, batch, 2 * L), jnp.float32)
    noise_std = 0.1

    V_real, V_imag = subarray_efb_refine_net_forward(
        params, X_theta, H_real, H_imag, noise_std, anneal_init, P, noise, mask)
    jax.block_until_ready((V_real, V_imag))
    assert V_real.shape == (batch, M, K) and V_imag.shape == (batch, M, K)
    assert bool(jnp.all(jnp.isfinite(V_real))) and bool(jnp.all(jnp.isfinite(V_imag)))
    print("KERNEL_OK")
</pallas_src>

<mosaic_0001>
module attributes {stable_mosaic.version = 11 : i64} {
  func.func @_user_kernel(%arg0: i32, %arg1: memref<1x8x32xf32, #tpu.memory_space<vmem>>, %arg2: memref<1x8x16xf32, #tpu.memory_space<vmem>>, %arg3: memref<32x16xf32, #tpu.memory_space<vmem>>, %arg4: memref<8x1xf32, #tpu.memory_space<vmem>>, %arg5: memref<1x16x64xf32, #tpu.memory_space<vmem>>, %arg6: memref<1x1x64xf32, #tpu.memory_space<vmem>>, %arg7: memref<1x1x64xf32, #tpu.memory_space<vmem>>, %arg8: memref<1x64x128xf32, #tpu.memory_space<vmem>>, %arg9: memref<1x1x128xf32, #tpu.memory_space<vmem>>, %arg10: memref<1x1x128xf32, #tpu.memory_space<vmem>>, %arg11: memref<1x128x16xf32, #tpu.memory_space<vmem>>, %arg12: memref<1x1x16xf32, #tpu.memory_space<vmem>>, %arg13: memref<1x1x16xf32, #tpu.memory_space<vmem>>, %arg14: memref<64x64xf32, #tpu.memory_space<vmem>>, %arg15: memref<128x128xf32, #tpu.memory_space<vmem>>, %arg16: memref<16x16xf32, #tpu.memory_space<vmem>>, %arg17: memref<1x16x1024xbf16, #tpu.memory_space<vmem>>, %arg18: memref<1x1x1024xf32, #tpu.memory_space<vmem>>, %arg19: memref<1x1x1024xf32, #tpu.memory_space<vmem>>, %arg20: memref<1x1024x512xbf16, #tpu.memory_space<vmem>>, %arg21: memref<1x1x512xf32, #tpu.memory_space<vmem>>, %arg22: memref<1x1x512xf32, #tpu.memory_space<vmem>>, %arg23: memref<1x512x8xbf16, #tpu.memory_space<vmem>>, %arg24: memref<1x1x8xf32, #tpu.memory_space<vmem>>, %arg25: memref<1x1x8xf32, #tpu.memory_space<vmem>>, %arg26: memref<1x8x8xf32, #tpu.memory_space<vmem>>) attributes {dimension_semantics = [#tpu.dimension_semantics<parallel>], iteration_bounds = array<i64: 2>, scalar_prefetch = 0 : i64, scratch_operands = 0 : i64, tpu.core_type = #tpu.core_type<tc>, window_params = [{transform_indices = @transform_0, window_bounds = array<i64: 1, 8, 32>}, {transform_indices = @transform_1, window_bounds = array<i64: 1, 8, 16>}, {pipeline_mode = #tpu.pipeline_mode<synchronous>, transform_indices = @transform_2, window_bounds = array<i64: 32, 16>}, {pipeline_mode = #tpu.pipeline_mode<synchronous>, transform_indices = @transform_3, window_bounds = array<i64: 8, 1>}, {transform_indices = @transform_4, window_bounds = array<i64: 1, 16, 64>}, {transform_indices = @transform_5, window_bounds = array<i64: 1, 1, 64>}, {transform_indices = @transform_6, window_bounds = array<i64: 1, 1, 64>}, {transform_indices = @transform_7, window_bounds = array<i64: 1, 64, 128>}, {transform_indices = @transform_8, window_bounds = array<i64: 1, 1, 128>}, {transform_indices = @transform_9, window_bounds = array<i64: 1, 1, 128>}, {transform_indices = @transform_10, window_bounds = array<i64: 1, 128, 16>}, {transform_indices = @transform_11, window_bounds = array<i64: 1, 1, 16>}, {transform_indices = @transform_12, window_bounds = array<i64: 1, 1, 16>}, {pipeline_mode = #tpu.pipeline_mode<synchronous>, transform_indices = @transform_13, window_bounds = array<i64: 64, 64>}, {pipeline_mode = #tpu.pipeline_mode<synchronous>, transform_indices = @transform_14, window_bounds = array<i64: 128, 128>}, {pipeline_mode = #tpu.pipeline_mode<synchronous>, transform_indices = @transform_15, window_bounds = array<i64: 16, 16>}, {transform_indices = @transform_16, window_bounds = array<i64: 1, 16, 1024>}, {transform_indices = @transform_17, window_bounds = array<i64: 1, 1, 1024>}, {transform_indices = @transform_18, window_bounds = array<i64: 1, 1, 1024>}, {transform_indices = @transform_19, window_bounds = array<i64: 1, 1024, 512>}, {transform_indices = @transform_20, window_bounds = array<i64: 1, 1, 512>}, {transform_indices = @transform_21, window_bounds = array<i64: 1, 1, 512>}, {transform_indices = @transform_22, window_bounds = array<i64: 1, 512, 8>}, {transform_indices = @transform_23, window_bounds = array<i64: 1, 1, 8>}, {transform_indices = @transform_24, window_bounds = array<i64: 1, 1, 8>}, {transform_indices = @transform_25, window_bounds = array<i64: 1, 8, 8>}]} {
    %c0 = arith.constant 0 : index
    %c0_0 = arith.constant 0 : index
    %0 = vector.load %arg4[%c0, %c0_0] : memref<8x1xf32, #tpu.memory_space<vmem>>, vector<8x1xf32>
    %c0_1 = arith.constant 0 : index
    %c0_2 = arith.constant 0 : index
    %c0_3 = arith.constant 0 : index
    %1 = vector.load %arg1[%c0_1, %c0_2, %c0_3] : memref<1x8x32xf32, #tpu.memory_space<vmem>>, vector<1x8x32xf32>
    %2 = vector.shape_cast %1 : vector<1x8x32xf32> to vector<8x32xf32>
    %c0_4 = arith.constant 0 : index
    %c0_5 = arith.constant 0 : index
    %3 = vector.load %arg3[%c0_4, %c0_5] : memref<32x16xf32, #tpu.memory_space<vmem>>, vector<32x16xf32>
    %cst = arith.constant dense<0.000000e+00> : vector<8x16xf32>
    %4 = tpu.matmul %2, %3, %cst {dimension_numbers = #tpu.dot_dimension_numbers<[1], [0], [0], [1], [0, 0, 1, 1], [], []>} : vector<8x32xf32>, vector<32x16xf32>, vector<8x16xf32> -> vector<8x16xf32>
    %c0_6 = arith.constant 0 : index
    %c0_7 = arith.constant 0 : index
    %c0_8 = arith.constant 0 : index
    %5 = vector.load %arg2[%c0_6, %c0_7, %c0_8] : memref<1x8x16xf32, #tpu.memory_space<vmem>>, vector<1x8x16xf32>
    %6 = vector.shape_cast %5 : vector<1x8x16xf32> to vector<8x16xf32>
    %cst_9 = arith.constant 1.000000e-01 : f32
    %7 = vector.broadcast %cst_9 : f32 to vector<8x16xf32>
    %8 = arith.mulf %7, %6 : vector<8x16xf32>
    %9 = arith.addf %4, %8 : vector<8x16xf32>
    %c0_10 = arith.constant 0 : index
    %c0_11 = arith.constant 0 : index
    %c0_12 = arith.constant 0 : index
    %10 = vector.load %arg5[%c0_10, %c0_11, %c0_12] : memref<1x16x64xf32, #tpu.memory_space<vmem>>, vector<1x16x64xf32>
    %11 = vector.shape_cast %10 : vector<1x16x64xf32> to vector<16x64xf32>
    %cst_13 = arith.constant dense<0.000000e+00> : vector<8x64xf32>
    %12 = tpu.matmul %9, %11, %cst_13 {dimension_numbers = #tpu.dot_dimension_numbers<[1], [0], [0], [1], [0, 0, 1, 1], [], []>} : vector<8x16xf32>, vector<16x64xf32>, vector<8x64xf32> -> vector<8x64xf32>
    %13 = vector.broadcast %0 : vector<8x1xf32> to vector<8x64xf32>
    %14 = arith.mulf %12, %13 : vector<8x64xf32>
    %cst_14 = arith.constant dense<0.000000e+00> : vector<64xf32>
    %15 = vector.multi_reduction <add>, %14, %cst_14 [0] : vector<8x64xf32> to vector<64xf32>
    %16 = vector.shape_cast %15 : vector<64xf32> to vector<1x64xf32>
    %17 = arith.mulf %14, %12 : vector<8x64xf32>
    %cst_15 = arith.constant dense<0.000000e+00> : vector<64xf32>
    %18 = vector.multi_reduction <add>, %17, %cst_15 [0] : vector<8x64xf32> to vector<64xf32>
    %19 = vector.shape_cast %18 : vector<64xf32> to vector<1x64xf32>
    %20 = tpu.concatenate %16, %19 in 0 : vector<1x64xf32>, vector<1x64xf32> -> vector<2x64xf32>
    %c0_16 = arith.constant 0 : index
    %c0_17 = arith.constant 0 : index
    %21 = vector.load %arg14[%c0_16, %c0_17] : memref<64x64xf32, #tpu.memory_space<vmem>>, vector<64x64xf32>
    %cst_18 = arith.constant dense<0.000000e+00> : vector<2x64xf32>
    %22 = tpu.matmul %20, %21, %cst_18 {dimension_numbers = #tpu.dot_dimension_numbers<[1], [0], [0], [1], [0, 0, 1, 1], [], []>} : vector<2x64xf32>, vector<64x64xf32>, vector<2x64xf32> -> vector<2x64xf32>
    %cst_19 = arith.constant 2.500000e-01 : f32
    %23 = vector.broadcast %cst_19 : f32 to vector<2x64xf32>
    %24 = arith.mulf %22, %23 : vector<2x64xf32>
    %25 = vector.extract_strided_slice %24 {offsets = [0, 0], sizes = [1, 64], strides = [1, 1]} : vector<2x64xf32> to vector<1x64xf32>
    %26 = vector.extract_strided_slice %24 {offsets = [1, 0], sizes = [1, 64], strides = [1, 1]} : vector<2x64xf32> to vector<1x64xf32>
    %27 = arith.mulf %25, %25 : vector<1x64xf32>
    %28 = arith.subf %26, %27 : vector<1x64xf32>
    %cst_20 = arith.constant 0.000000e+00 : f32
    %29 = vector.broadcast %cst_20 : f32 to vector<1x64xf32>
    %30 = arith.maximumf %28, %29 : vector<1x64xf32>
    %31 = vector.broadcast %25 : vector<1x64xf32> to vector<8x64xf32>
    %32 = arith.subf %12, %31 : vector<8x64xf32>
    %cst_21 = arith.constant 9.99999974E-6 : f32
    %33 = vector.broadcast %cst_21 : f32 to vector<1x64xf32>
    %34 = arith.addf %30, %33 : vector<1x64xf32>
    %35 = math.rsqrt %34 : vector<1x64xf32>
    %36 = vector.broadcast %35 : vector<1x64xf32> to vector<8x64xf32>
    %37 = arith.mulf %32, %36 : vector<8x64xf32>
    %c0_22 = arith.constant 0 : index
    %c0_23 = arith.constant 0 : index
    %c0_24 = arith.constant 0 : index
    %38 = vector.load %arg6[%c0_22, %c0_23, %c0_24] : memref<1x1x64xf32, #tpu.memory_space<vmem>>, vector<1x1x64xf32>
    %39 = vector.shape_cast %38 : vector<1x1x64xf32> to vector<1x64xf32>
    %40 = vector.broadcast %39 : vector<1x64xf32> to vector<8x64xf32>
    %41 = arith.mulf %37, %40 : vector<8x64xf32>
    %c0_25 = arith.constant 0 : index
    %c0_26 = arith.constant 0 : index
    %c0_27 = arith.constant 0 : index
    %42 = vector.load %arg7[%c0_25, %c0_26, %c0_27] : memref<1x1x64xf32, #tpu.memory_space<vmem>>, vector<1x1x64xf32>
    %43 = vector.shape_cast %42 : vector<1x1x64xf32> to vector<1x64xf32>
    %44 = vector.broadcast %43 : vector<1x64xf32> to vector<8x64xf32>
    %45 = arith.addf %41, %44 : vector<8x64xf32>
    %cst_28 = arith.constant 0.000000e+00 : f32
    %46 = vector.broadcast %cst_28 : f32 to vector<8x64xf32>
    %47 = arith.maximumf %45, %46 : vector<8x64xf32>
    %c0_29 = arith.constant 0 : index
    %c0_30 = arith.constant 0 : index
    %c0_31 = arith.constant 0 : index
    %48 = vector.load %arg8[%c0_29, %c0_30, %c0_31] : memref<1x64x128xf32, #tpu.memory_space<vmem>>, vector<1x64x128xf32>
    %49 = vector.shape_cast %48 : vector<1x64x128xf32> to vector<64x128xf32>
    %cst_32 = arith.constant dense<0.000000e+00> : vector<8x128xf32>
    %50 = tpu.matmul %47, %49, %cst_32 {dimension_numbers = #tpu.dot_dimension_numbers<[1], [0], [0], [1], [0, 0, 1, 1], [], []>} : vector<8x64xf32>, vector<64x128xf32>, vector<8x128xf32> -> vector<8x128xf32>
    %51 = vector.broadcast %0 : vector<8x1xf32> to vector<8x128xf32>
    %52 = arith.mulf %50, %51 : vector<8x128xf32>
    %cst_33 = arith.constant dense<0.000000e+00> : vector<128xf32>
    %53 = vector.multi_reduction <add>, %52, %cst_33 [0] : vector<8x128xf32> to vector<128xf32>
    %54 = vector.shape_cast %53 : vector<128xf32> to vector<1x128xf32>
    %55 = arith.mulf %52, %50 : vector<8x128xf32>
    %cst_34 = arith.constant dense<0.000000e+00> : vector<128xf32>
    %56 = vector.multi_reduction <add>, %55, %cst_34 [0] : vector<8x128xf32> to vector<128xf32>
    %57 = vector.shape_cast %56 : vector<128xf32> to vector<1x128xf32>
    %58 = tpu.concatenate %54, %57 in 0 : vector<1x128xf32>, vector<1x128xf32> -> vector<2x128xf32>
    %c0_35 = arith.constant 0 : index
    %c0_36 = arith.constant 0 : index
    %59 = vector.load %arg15[%c0_35, %c0_36] : memref<128x128xf32, #tpu.memory_space<vmem>>, vector<128x128xf32>
    %cst_37 = arith.constant dense<0.000000e+00> : vector<2x128xf32>
    %60 = tpu.matmul %58, %59, %cst_37 {dimension_numbers = #tpu.dot_dimension_numbers<[1], [0], [0], [1], [0, 0, 1, 1], [], []>} : vector<2x128xf32>, vector<128x128xf32>, vector<2x128xf32> -> vector<2x128xf32>
    %cst_38 = arith.constant 2.500000e-01 : f32
    %61 = vector.broadcast %cst_38 : f32 to vector<2x128xf32>
    %62 = arith.mulf %60, %61 : vector<2x128xf32>
    %63 = vector.extract_strided_slice %62 {offsets = [0, 0], sizes = [1, 128], strides = [1, 1]} : vector<2x128xf32> to vector<1x128xf32>
    %64 = vector.extract_strided_slice %62 {offsets = [1, 0], sizes = [1, 128], strides = [1, 1]} : vector<2x128xf32> to vector<1x128xf32>
    %65 = arith.mulf %63, %63 : vector<1x128xf32>
    %66 = arith.subf %64, %65 : vector<1x128xf32>
    %cst_39 = arith.constant 0.000000e+00 : f32
    %67 = vector.broadcast %cst_39 : f32 to vector<1x128xf32>
    %68 = arith.maximumf %66, %67 : vector<1x128xf32>
    %69 = vector.broadcast %63 : vector<1x128xf32> to vector<8x128xf32>
    %70 = arith.subf %50, %69 : vector<8x128xf32>
    %cst_40 = arith.constant 9.99999974E-6 : f32
    %71 = vector.broadcast %cst_40 : f32 to vector<1x128xf32>
    %72 = arith.addf %68, %71 : vector<1x128xf32>
    %73 = math.rsqrt %72 : vector<1x128xf32>
    %74 = vector.broadcast %73 : vector<1x128xf32> to vector<8x128xf32>
    %75 = arith.mulf %70, %74 : vector<8x128xf32>
    %c0_41 = arith.constant 0 : index
    %c0_42 = arith.constant 0 : index
    %c0_43 = arith.constant 0 : index
    %76 = vector.load %arg9[%c0_41, %c0_42, %c0_43] : memref<1x1x128xf32, #tpu.memory_space<vmem>>, vector<1x1x128xf32>
    %77 = vector.shape_cast %76 : vector<1x1x128xf32> to vector<1x128xf32>
    %78 = vector.broadcast %77 : vector<1x128xf32> to vector<8x128xf32>
    %79 = arith.mulf %75, %78 : vector<8x128xf32>
    %c0_44 = arith.constant 0 : index
    %c0_45 = arith.constant 0 : index
    %c0_46 = arith.constant 0 : index
    %80 = vector.load %arg10[%c0_44, %c0_45, %c0_46] : memref<1x1x128xf32, #tpu.memory_space<vmem>>, vector<1x1x128xf32>
    %81 = vector.shape_cast %80 : vector<1x1x128xf32> to vector<1x128xf32>
    %82 = vector.broadcast %81 : vector<1x128xf32> to vector<8x128xf32>
    %83 = arith.addf %79, %82 : vector<8x128xf32>
    %cst_47 = arith.constant 0.000000e+00 : f32
    %84 = vector.broadcast %cst_47 : f32 to vector<8x128xf32>
    %85 = arith.maximumf %83, %84 : vector<8x128xf32>
    %c0_48 = arith.constant 0 : index
    %c0_49 = arith.constant 0 : index
    %c0_50 = arith.constant 0 : index
    %86 = vector.load %arg11[%c0_48, %c0_49, %c0_50] : memref<1x128x16xf32, #tpu.memory_space<vmem>>, vector<1x128x16xf32>
    %87 = vector.shape_cast %86 : vector<1x128x16xf32> to vector<128x16xf32>
    %cst_51 = arith.constant dense<0.000000e+00> : vector<8x16xf32>
    %88 = tpu.matmul %85, %87, %cst_51 {dimension_numbers = #tpu.dot_dimension_numbers<[1], [0], [0], [1], [0, 0, 1, 1], [], []>} : vector<8x128xf32>, vector<128x16xf32>, vector<8x16xf32> -> vector<8x16xf32>
    %89 = vector.broadcast %0 : vector<8x1xf32> to vector<8x16xf32>
    %90 = arith.mulf %88, %89 : vector<8x16xf32>
    %cst_52 = arith.constant dense<0.000000e+00> : vector<16xf32>
    %91 = vector.multi_reduction <add>, %90, %cst_52 [0] : vector<8x16xf32> to vector<16xf32>
    %92 = vector.shape_cast %91 : vector<16xf32> to vector<1x16xf32>
    %93 = arith.mulf %90, %88 : vector<8x16xf32>
    %cst_53 = arith.constant dense<0.000000e+00> : vector<16xf32>
    %94 = vector.multi_reduction <add>, %93, %cst_53 [0] : vector<8x16xf32> to vector<16xf32>
    %95 = vector.shape_cast %94 : vector<16xf32> to vector<1x16xf32>
    %96 = tpu.concatenate %92, %95 in 0 : vector<1x16xf32>, vector<1x16xf32> -> vector<2x16xf32>
    %c0_54 = arith.constant 0 : index
    %c0_55 = arith.constant 0 : index
    %97 = vector.load %arg16[%c0_54, %c0_55] : memref<16x16xf32, #tpu.memory_space<vmem>>, vector<16x16xf32>
    %cst_56 = arith.constant dense<0.000000e+00> : vector<2x16xf32>
    %98 = tpu.matmul %96, %97, %cst_56 {dimension_numbers = #tpu.dot_dimension_numbers<[1], [0], [0], [1], [0, 0, 1, 1], [], []>} : vector<2x16xf32>, vector<16x16xf32>, vector<2x16xf32> -> vector<2x16xf32>
    %cst_57 = arith.constant 2.500000e-01 : f32
    %99 = vector.broadcast %cst_57 : f32 to vector<2x16xf32>
    %100 = arith.mulf %98, %99 : vector<2x16xf32>
    %101 = vector.extract_strided_slice %100 {offsets = [0, 0], sizes = [1, 16], strides = [1, 1]} : vector<2x16xf32> to vector<1x16xf32>
    %102 = vector.extract_strided_slice %100 {offsets = [1, 0], sizes = [1, 16], strides = [1, 1]} : vector<2x16xf32> to vector<1x16xf32>
    %103 = arith.mulf %101, %101 : vector<1x16xf32>
    %104 = arith.subf %102, %103 : vector<1x16xf32>
    %cst_58 = arith.constant 0.000000e+00 : f32
    %105 = vector.broadcast %cst_58 : f32 to vector<1x16xf32>
    %106 = arith.maximumf %104, %105 : vector<1x16xf32>
    %107 = vector.broadcast %101 : vector<1x16xf32> to vector<8x16xf32>
    %108 = arith.subf %88, %107 : vector<8x16xf32>
    %cst_59 = arith.constant 9.99999974E-6 : f32
    %109 = vector.broadcast %cst_59 : f32 to vector<1x16xf32>
    %110 = arith.addf %106, %109 : vector<1x16xf32>
    %111 = math.rsqrt %110 : vector<1x16xf32>
    %112 = vector.broadcast %111 : vector<1x16xf32> to vector<8x16xf32>
    %113 = arith.mulf %108, %112 : vector<8x16xf32>
    %c0_60 = arith.constant 0 : index
    %c0_61 = arith.constant 0 : index
    %c0_62 = arith.constant 0 : index
    %114 = vector.load %arg12[%c0_60, %c0_61, %c0_62] : memref<1x1x16xf32, #tpu.memory_space<vmem>>, vector<1x1x16xf32>
    %115 = vector.shape_cast %114 : vector<1x1x16xf32> to vector<1x16xf32>
    %116 = vector.broadcast %115 : vector<1x16xf32> to vector<8x16xf32>
    %117 = arith.mulf %113, %116 : vector<8x16xf32>
    %c0_63 = arith.constant 0 : index
    %c0_64 = arith.constant 0 : index
    %c0_65 = arith.constant 0 : index
    %118 = vector.load %arg13[%c0_63, %c0_64, %c0_65] : memref<1x1x16xf32, #tpu.memory_space<vmem>>, vector<1x1x16xf32>
    %119 = vector.shape_cast %118 : vector<1x1x16xf32> to vector<1x16xf32>
    %120 = vector.broadcast %119 : vector<1x16xf32> to vector<8x16xf32>
    %121 = arith.addf %117, %120 : vector<8x16xf32>
    %122 = arith.addf %9, %121 : vector<8x16xf32>
    %123 = arith.truncf %122 : vector<8x16xf32> to vector<8x16xbf16>
    %c0_66 = arith.constant 0 : index
    %c0_67 = arith.constant 0 : index
    %c0_68 = arith.constant 0 : index
    %124 = vector.load %arg17[%c0_66, %c0_67, %c0_68] : memref<1x16x1024xbf16, #tpu.memory_space<vmem>>, vector<1x16x1024xbf16>
    %125 = vector.shape_cast %124 : vector<1x16x1024xbf16> to vector<16x1024xbf16>
    %cst_69 = arith.constant dense<0.000000e+00> : vector<8x1024xf32>
    %126 = tpu.matmul %123, %125, %cst_69 {dimension_numbers = #tpu.dot_dimension_numbers<[1], [0], [0], [1], [0, 0, 1, 1], [], []>} : vector<8x16xbf16>, vector<16x1024xbf16>, vector<8x1024xf32> -> vector<8x1024xf32>
    %127 = vector.broadcast %0 : vector<8x1xf32> to vector<8x1024xf32>
    %128 = arith.mulf %126, %127 : vector<8x1024xf32>
    %cst_70 = arith.constant dense<0.000000e+00> : vector<1024xf32>
    %129 = vector.multi_reduction <add>, %128, %cst_70 [0] : vector<8x1024xf32> to vector<1024xf32>
    %130 = vector.shape_cast %129 : vector<1024xf32> to vector<1x1024xf32>
    %cst_71 = arith.constant 2.500000e-01 : f32
    %131 = vector.broadcast %cst_71 : f32 to vector<1x1024xf32>
    %132 = arith.mulf %130, %131 : vector<1x1024xf32>
    %133 = arith.mulf %128, %126 : vector<8x1024xf32>
    %cst_72 = arith.constant dense<0.000000e+00> : vector<1024xf32>
    %134 = vector.multi_reduction <add>, %133, %cst_72 [0] : vector<8x1024xf32> to vector<1024xf32>
    %135 = vector.shape_cast %134 : vector<1024xf32> to vector<1x1024xf32>
    %cst_73 = arith.constant 2.500000e-01 : f32
    %136 = vector.broadcast %cst_73 : f32 to vector<1x1024xf32>
    %137 = arith.mulf %135, %136 : vector<1x1024xf32>
    %138 = arith.mulf %132, %132 : vector<1x1024xf32>
    %139 = arith.subf %137, %138 : vector<1x1024xf32>
    %cst_74 = arith.constant 0.000000e+00 : f32
    %140 = vector.broadcast %cst_74 : f32 to vector<1x1024xf32>
    %141 = arith.maximumf %139, %140 : vector<1x1024xf32>
    %142 = vector.broadcast %132 : vector<1x1024xf32> to vector<8x1024xf32>
    %143 = arith.subf %126, %142 : vector<8x1024xf32>
    %cst_75 = arith.constant 9.99999974E-6 : f32
    %144 = vector.broadcast %cst_75 : f32 to vector<1x1024xf32>
    %145 = arith.addf %141, %144 : vector<1x1024xf32>
    %146 = math.rsqrt %145 : vector<1x1024xf32>
    %147 = vector.broadcast %146 : vector<1x1024xf32> to vector<8x1024xf32>
    %148 = arith.mulf %143, %147 : vector<8x1024xf32>
    %c0_76 = arith.constant 0 : index
    %c0_77 = arith.constant 0 : index
    %c0_78 = arith.constant 0 : index
    %149 = vector.load %arg18[%c0_76, %c0_77, %c0_78] : memref<1x1x1024xf32, #tpu.memory_space<vmem>>, vector<1x1x1024xf32>
    %150 = vector.shape_cast %149 : vector<1x1x1024xf32> to vector<1x1024xf32>
    %151 = vector.broadcast %150 : vector<1x1024xf32> to vector<8x1024xf32>
    %152 = arith.mulf %148, %151 : vector<8x1024xf32>
    %c0_79 = arith.constant 0 : index
    %c0_80 = arith.constant 0 : index
    %c0_81 = arith.constant 0 : index
    %153 = vector.load %arg19[%c0_79, %c0_80, %c0_81] : memref<1x1x1024xf32, #tpu.memory_space<vmem>>, vector<1x1x1024xf32>
    %154 = vector.shape_cast %153 : vector<1x1x1024xf32> to vector<1x1024xf32>
    %155 = vector.broadcast %154 : vector<1x1024xf32> to vector<8x1024xf32>
    %156 = arith.addf %152, %155 : vector<8x1024xf32>
    %cst_82 = arith.constant 0.000000e+00 : f32
    %157 = vector.broadcast %cst_82 : f32 to vector<8x1024xf32>
    %158 = arith.maximumf %156, %157 : vector<8x1024xf32>
    %159 = arith.truncf %158 : vector<8x1024xf32> to vector<8x1024xbf16>
    %c0_83 = arith.constant 0 : index
    %c0_84 = arith.constant 0 : index
    %c0_85 = arith.constant 0 : index
    %160 = vector.load %arg20[%c0_83, %c0_84, %c0_85] : memref<1x1024x512xbf16, #tpu.memory_space<vmem>>, vector<1x1024x512xbf16>
    %161 = vector.shape_cast %160 : vector<1x1024x512xbf16> to vector<1024x512xbf16>
    %cst_86 = arith.constant dense<0.000000e+00> : vector<8x512xf32>
    %162 = tpu.matmul %159, %161, %cst_86 {dimension_numbers = #tpu.dot_dimension_numbers<[1], [0], [0], [1], [0, 0, 1, 1], [], []>} : vector<8x1024xbf16>, vector<1024x512xbf16>, vector<8x512xf32> -> vector<8x512xf32>
    %163 = vector.broadcast %0 : vector<8x1xf32> to vector<8x512xf32>
    %164 = arith.mulf %162, %163 : vector<8x512xf32>
    %cst_87 = arith.constant dense<0.000000e+00> : vector<512xf32>
    %165 = vector.multi_reduction <add>, %164, %cst_87 [0] : vector<8x512xf32> to vector<512xf32>
    %166 = vector.shape_cast %165 : vector<512xf32> to vector<1x512xf32>
    %cst_88 = arith.constant 2.500000e-01 : f32
    %167 = vector.broadcast %cst_88 : f32 to vector<1x512xf32>
    %168 = arith.mulf %166, %167 : vector<1x512xf32>
    %169 = arith.mulf %164, %162 : vector<8x512xf32>
    %cst_89 = arith.constant dense<0.000000e+00> : vector<512xf32>
    %170 = vector.multi_reduction <add>, %169, %cst_89 [0] : vector<8x512xf32> to vector<512xf32>
    %171 = vector.shape_cast %170 : vector<512xf32> to vector<1x512xf32>
    %cst_90 = arith.constant 2.500000e-01 : f32
    %172 = vector.broadcast %cst_90 : f32 to vector<1x512xf32>
    %173 = arith.mulf %171, %172 : vector<1x512xf32>
    %174 = arith.mulf %168, %168 : vector<1x512xf32>
    %175 = arith.subf %173, %174 : vector<1x512xf32>
    %cst_91 = arith.constant 0.000000e+00 : f32
    %176 = vector.broadcast %cst_91 : f32 to vector<1x512xf32>
    %177 = arith.maximumf %175, %176 : vector<1x512xf32>
    %178 = vector.broadcast %168 : vector<1x512xf32> to vector<8x512xf32>
    %179 = arith.subf %162, %178 : vector<8x512xf32>
    %cst_92 = arith.constant 9.99999974E-6 : f32
    %180 = vector.broadcast %cst_92 : f32 to vector<1x512xf32>
    %181 = arith.addf %177, %180 : vector<1x512xf32>
    %182 = math.rsqrt %181 : vector<1x512xf32>
    %183 = vector.broadcast %182 : vector<1x512xf32> to vector<8x512xf32>
    %184 = arith.mulf %179, %183 : vector<8x512xf32>
    %c0_93 = arith.constant 0 : index
    %c0_94 = arith.constant 0 : index
    %c0_95 = arith.constant 0 : index
    %185 = vector.load %arg21[%c0_93, %c0_94, %c0_95] : memref<1x1x512xf32, #tpu.memory_space<vmem>>, vector<1x1x512xf32>
    %186 = vector.shape_cast %185 : vector<1x1x512xf32> to vector<1x512xf32>
    %187 = vector.broadcast %186 : vector<1x512xf32> to vector<8x512xf32>
    %188 = arith.mulf %184, %187 : vector<8x512xf32>
    %c0_96 = arith.constant 0 : index
    %c0_97 = arith.constant 0 : index
    %c0_98 = arith.constant 0 : index
    %189 = vector.load %arg22[%c0_96, %c0_97, %c0_98] : memref<1x1x512xf32, #tpu.memory_space<vmem>>, vector<1x1x512xf32>
    %190 = vector.shape_cast %189 : vector<1x1x512xf32> to vector<1x512xf32>
    %191 = vector.broadcast %190 : vector<1x512xf32> to vector<8x512xf32>
    %192 = arith.addf %188, %191 : vector<8x512xf32>
    %cst_99 = arith.constant 0.000000e+00 : f32
    %193 = vector.broadcast %cst_99 : f32 to vector<8x512xf32>
    %194 = arith.maximumf %192, %193 : vector<8x512xf32>
    %195 = arith.truncf %194 : vector<8x512xf32> to vector<8x512xbf16>
    %c0_100 = arith.constant 0 : index
    %c0_101 = arith.constant 0 : index
    %c0_102 = arith.constant 0 : index
    %196 = vector.load %arg23[%c0_100, %c0_101, %c0_102] : memref<1x512x8xbf16, #tpu.memory_space<vmem>>, vector<1x512x8xbf16>
    %197 = vector.shape_cast %196 : vector<1x512x8xbf16> to vector<512x8xbf16>
    %cst_103 = arith.constant dense<0.000000e+00> : vector<8x8xf32>
    %198 = tpu.matmul %195, %197, %cst_103 {dimension_numbers = #tpu.dot_dimension_numbers<[1], [0], [0], [1], [0, 0, 1, 1], [], []>} : vector<8x512xbf16>, vector<512x8xbf16>, vector<8x8xf32> -> vector<8x8xf32>
    %199 = vector.broadcast %0 : vector<8x1xf32> to vector<8x8xf32>
    %200 = arith.mulf %198, %199 : vector<8x8xf32>
    %cst_104 = arith.constant dense<0.000000e+00> : vector<8xf32>
    %201 = vector.multi_reduction <add>, %200, %cst_104 [0] : vector<8x8xf32> to vector<8xf32>
    %202 = vector.shape_cast %201 : vector<8xf32> to vector<1x8xf32>
    %cst_105 = arith.constant 2.500000e-01 : f32
    %203 = vector.broadcast %cst_105 : f32 to vector<1x8xf32>
    %204 = arith.mulf %202, %203 : vector<1x8xf32>
    %205 = arith.mulf %200, %198 : vector<8x8xf32>
    %cst_106 = arith.constant dense<0.000000e+00> : vector<8xf32>
    %206 = vector.multi_reduction <add>, %205, %cst_106 [0] : vector<8x8xf32> to vector<8xf32>
    %207 = vector.shape_cast %206 : vector<8xf32> to vector<1x8xf32>
    %cst_107 = arith.constant 2.500000e-01 : f32
    %208 = vector.broadcast %cst_107 : f32 to vector<1x8xf32>
    %209 = arith.mulf %207, %208 : vector<1x8xf32>
    %210 = arith.mulf %204, %204 : vector<1x8xf32>
    %211 = arith.subf %209, %210 : vector<1x8xf32>
    %cst_108 = arith.constant 0.000000e+00 : f32
    %212 = vector.broadcast %cst_108 : f32 to vector<1x8xf32>
    %213 = arith.maximumf %211, %212 : vector<1x8xf32>
    %214 = vector.broadcast %204 : vector<1x8xf32> to vector<8x8xf32>
    %215 = arith.subf %198, %214 : vector<8x8xf32>
    %cst_109 = arith.constant 9.99999974E-6 : f32
    %216 = vector.broadcast %cst_109 : f32 to vector<1x8xf32>
    %217 = arith.addf %213, %216 : vector<1x8xf32>
    %218 = math.rsqrt %217 : vector<1x8xf32>
    %219 = vector.broadcast %218 : vector<1x8xf32> to vector<8x8xf32>
    %220 = arith.mulf %215, %219 : vector<8x8xf32>
    %c0_110 = arith.constant 0 : index
    %c0_111 = arith.constant 0 : index
    %c0_112 = arith.constant 0 : index
    %221 = vector.load %arg24[%c0_110, %c0_111, %c0_112] : memref<1x1x8xf32, #tpu.memory_space<vmem>>, vector<1x1x8xf32>
    %222 = vector.shape_cast %221 : vector<1x1x8xf32> to vector<1x8xf32>
    %223 = vector.broadcast %222 : vector<1x8xf32> to vector<8x8xf32>
    %224 = arith.mulf %220, %223 : vector<8x8xf32>
    %c0_113 = arith.constant 0 : index
    %c0_114 = arith.constant 0 : index
    %c0_115 = arith.constant 0 : index
    %225 = vector.load %arg25[%c0_113, %c0_114, %c0_115] : memref<1x1x8xf32, #tpu.memory_space<vmem>>, vector<1x1x8xf32>
    %226 = vector.shape_cast %225 : vector<1x1x8xf32> to vector<1x8xf32>
    %227 = vector.broadcast %226 : vector<1x8xf32> to vector<8x8xf32>
    %228 = arith.addf %224, %227 : vector<8x8xf32>
    %229 = arith.negf %228 : vector<8x8xf32>
    %230 = math.exp %229 : vector<8x8xf32>
    %cst_116 = arith.constant 1.000000e+00 : f32
    %231 = vector.broadcast %cst_116 : f32 to vector<8x8xf32>
    %232 = arith.addf %231, %230 : vector<8x8xf32>
    %233 = arith.divf %231, %232 : vector<8x8xf32>
    %cst_117 = arith.constant 5.000000e-01 : f32
    %234 = vector.broadcast %cst_117 : f32 to vector<8x8xf32>
    %235 = arith.subf %233, %234 : vector<8x8xf32>
    %cst_118 = arith.constant 1.000000e+00 : f32
    %236 = vector.broadcast %cst_118 : f32 to vector<8x8xf32>
    %237 = arith.mulf %236, %235 : vector<8x8xf32>
    %238 = arith.negf %237 : vector<8x8xf32>
    %239 = math.exp %238 : vector<8x8xf32>
    %cst_119 = arith.constant 1.000000e+00 : f32
    %240 = vector.broadcast %cst_119 : f32 to vector<8x8xf32>
    %241 = arith.addf %240, %239 : vector<8x8xf32>
    %242 = arith.divf %240, %241 : vector<8x8xf32>
    %c0_120 = arith.constant 0 : index
    %c0_121 = arith.constant 0 : index
    %c0_122 = arith.constant 0 : index
    %243 = vector.load %arg26[%c0_120, %c0_121, %c0_122] : memref<1x8x8xf32, #tpu.memory_space<vmem>>, vector<1x8x8xf32>
    %244 = vector.shape_cast %243 : vector<1x8x8xf32> to vector<8x8xf32>
    %245 = vector.shape_cast %242 : vector<8x8xf32> to vector<1x8x8xf32>
    tpu.vector_store %arg26[%c0_120, %c0_121, %c0_122], %245 {strides = array<i32>} : memref<1x8x8xf32, #tpu.memory_space<vmem>>, vector<1x8x8xf32>,
    return
  }
  func.func @transform_0(%arg0: i32) -> (i32, i32, i32) {
    %c0_i32 = arith.constant 0 : i32
    %c0_i32_0 = arith.constant 0 : i32
    %c0_i32_1 = arith.constant 0 : i32
    return %arg0, %c0_i32, %c0_i32_0 : i32, i32, i32
  }
  func.func @transform_1(%arg0: i32) -> (i32, i32, i32) {
    %c0_i32 = arith.constant 0 : i32
    %c0_i32_0 = arith.constant 0 : i32
    %c0_i32_1 = arith.constant 0 : i32
    return %arg0, %c0_i32, %c0_i32_0 : i32, i32, i32
  }
  func.func @transform_2(%arg0: i32) -> (i32, i32) {
    %c0_i32 = arith.constant 0 : i32
    %c0_i32_0 = arith.constant 0 : i32
    %c0_i32_1 = arith.constant 0 : i32
    return %c0_i32, %c0_i32_0 : i32, i32
  }
  func.func @transform_3(%arg0: i32) -> (i32, i32) {
    %c0_i32 = arith.constant 0 : i32
    %c0_i32_0 = arith.constant 0 : i32
    %c0_i32_1 = arith.constant 0 : i32
    return %c0_i32, %c0_i32_0 : i32, i32
  }
  func.func @transform_4(%arg0: i32) -> (i32, i32, i32) {
    %c0_i32 = arith.constant 0 : i32
    %c0_i32_0 = arith.constant 0 : i32
    %c0_i32_1 = arith.constant 0 : i32
    return %arg0, %c0_i32, %c0_i32_0 : i32, i32, i32
  }
  func.func @transform_5(%arg0: i32) -> (i32, i32, i32) {
    %c0_i32 = arith.constant 0 : i32
    %c0_i32_0 = arith.constant 0 : i32
    %c0_i32_1 = arith.constant 0 : i32
    return %arg0, %c0_i32, %c0_i32_0 : i32, i32, i32
  }
  func.func @transform_6(%arg0: i32) -> (i32, i32, i32) {
    %c0_i32 = arith.constant 0 : i32
    %c0_i32_0 = arith.constant 0 : i32
    %c0_i32_1 = arith.constant 0 : i32
    return %arg0, %c0_i32, %c0_i32_0 : i32, i32, i32
  }
  func.func @transform_7(%arg0: i32) -> (i32, i32, i32) {
    %c0_i32 = arith.constant 0 : i32
    %c0_i32_0 = arith.constant 0 : i32
    %c0_i32_1 = arith.constant 0 : i32
    return %arg0, %c0_i32, %c0_i32_0 : i32, i32, i32
  }
  func.func @transform_8(%arg0: i32) -> (i32, i32, i32) {
    %c0_i32 = arith.constant 0 : i32
    %c0_i32_0 = arith.constant 0 : i32
    %c0_i32_1 = arith.constant 0 : i32
    return %arg0, %c0_i32, %c0_i32_0 : i32, i32, i32
  }
  func.func @transform_9(%arg0: i32) -> (i32, i32, i32) {
    %c0_i32 = arith.constant 0 : i32
    %c0_i32_0 = arith.constant 0 : i32
    %c0_i32_1 = arith.constant 0 : i32
    return %arg0, %c0_i32, %c0_i32_0 : i32, i32, i32
  }
  func.func @transform_10(%arg0: i32) -> (i32, i32, i32) {
    %c0_i32 = arith.constant 0 : i32
    %c0_i32_0 = arith.constant 0 : i32
    %c0_i32_1 = arith.constant 0 : i32
    return %arg0, %c0_i32, %c0_i32_0 : i32, i32, i32
  }
  func.func @transform_11(%arg0: i32) -> (i32, i32, i32) {
    %c0_i32 = arith.constant 0 : i32
    %c0_i32_0 = arith.constant 0 : i32
    %c0_i32_1 = arith.constant 0 : i32
    return %arg0, %c0_i32, %c0_i32_0 : i32, i32, i32
  }
  func.func @transform_12(%arg0: i32) -> (i32, i32, i32) {
    %c0_i32 = arith.constant 0 : i32
    %c0_i32_0 = arith.constant 0 : i32
    %c0_i32_1 = arith.constant 0 : i32
    return %arg0, %c0_i32, %c0_i32_0 : i32, i32, i32
  }
  func.func @transform_13(%arg0: i32) -> (i32, i32) {
    %c0_i32 = arith.constant 0 : i32
    %c0_i32_0 = arith.constant 0 : i32
    %c0_i32_1 = arith.constant 0 : i32
    return %c0_i32, %c0_i32_0 : i32, i32
  }
  func.func @transform_14(%arg0: i32) -> (i32, i32) {
    %c0_i32 = arith.constant 0 : i32
    %c0_i32_0 = arith.constant 0 : i32
    %c0_i32_1 = arith.constant 0 : i32
    return %c0_i32, %c0_i32_0 : i32, i32
  }
  func.func @transform_15(%arg0: i32) -> (i32, i32) {
    %c0_i32 = arith.constant 0 : i32
    %c0_i32_0 = arith.constant 0 : i32
    %c0_i32_1 = arith.constant 0 : i32
    return %c0_i32, %c0_i32_0 : i32, i32
  }
  func.func @transform_16(%arg0: i32) -> (i32, i32, i32) {
    %c0_i32 = arith.constant 0 : i32
    %c0_i32_0 = arith.constant 0 : i32
    %c0_i32_1 = arith.constant 0 : i32
    return %arg0, %c0_i32, %c0_i32_0 : i32, i32, i32
  }
  func.func @transform_17(%arg0: i32) -> (i32, i32, i32) {
    %c0_i32 = arith.constant 0 : i32
    %c0_i32_0 = arith.constant 0 : i32
    %c0_i32_1 = arith.constant 0 : i32
    return %arg0, %c0_i32, %c0_i32_0 : i32, i32, i32
  }
  func.func @transform_18(%arg0: i32) -> (i32, i32, i32) {
    %c0_i32 = arith.constant 0 : i32
    %c0_i32_0 = arith.constant 0 : i32
    %c0_i32_1 = arith.constant 0 : i32
    return %arg0, %c0_i32, %c0_i32_0 : i32, i32, i32
  }
  func.func @transform_19(%arg0: i32) -> (i32, i32, i32) {
    %c0_i32 = arith.constant 0 : i32
    %c0_i32_0 = arith.constant 0 : i32
    %c0_i32_1 = arith.constant 0 : i32
    return %arg0, %c0_i32, %c0_i32_0 : i32, i32, i32
  }
  func.func @transform_20(%arg0: i32) -> (i32, i32, i32) {
    %c0_i32 = arith.constant 0 : i32
    %c0_i32_0 = arith.constant 0 : i32
    %c0_i32_1 = arith.constant 0 : i32
    return %arg0, %c0_i32, %c0_i32_0 : i32, i32, i32
  }
  func.func @transform_21(%arg0: i32) -> (i32, i32, i32) {
    %c0_i32 = arith.constant 0 : i32
    %c0_i32_0 = arith.constant 0 : i32
    %c0_i32_1 = arith.constant 0 : i32
    return %arg0, %c0_i32, %c0_i32_0 : i32, i32, i32
  }
  func.func @transform_22(%arg0: i32) -> (i32, i32, i32) {
    %c0_i32 = arith.constant 0 : i32
    %c0_i32_0 = arith.constant 0 : i32
    %c0_i32_1 = arith.constant 0 : i32
    return %arg0, %c0_i32, %c0_i32_0 : i32, i32, i32
  }
  func.func @transform_23(%arg0: i32) -> (i32, i32, i32) {
    %c0_i32 = arith.constant 0 : i32
    %c0_i32_0 = arith.constant 0 : i32
    %c0_i32_1 = arith.constant 0 : i32
    return %arg0, %c0_i32, %c0_i32_0 : i32, i32, i32
  }
  func.func @transform_24(%arg0: i32) -> (i32, i32, i32) {
    %c0_i32 = arith.constant 0 : i32
    %c0_i32_0 = arith.constant 0 : i32
    %c0_i32_1 = arith.constant 0 : i32
    return %arg0, %c0_i32, %c0_i32_0 : i32, i32, i32
  }
  func.func @transform_25(%arg0: i32) -> (i32, i32, i32) {
    %c0_i32 = arith.constant 0 : i32
    %c0_i32_0 = arith.constant 0 : i32
    %c0_i32_1 = arith.constant 0 : i32
    return %arg0, %c0_i32, %c0_i32_0 : i32, i32, i32
  }
}

</mosaic_0001>

<bundles_post_ra>
// kernel: tpu_custom_call.1
= control target key start
LH: loop header
LB: loop body
LE: loop exit
PB: predicated region body
PF: predicated region fallthrough
CT: control target
= control target key end

     0   :  { %s9278_s0 = inlined_call_operand.hbm [shape: f32[2,8,32], index: 0, kind: input, shape index: {}]   ;;  %s9279_s1 = inlined_call_operand.hbm [shape: f32[2,8,16], index: 1, kind: input, shape index: {}]   ;;  %s9280_s2 = inlined_call_operand.vmem [shape: f32[32,16], index: 2, kind: input, shape index: {}]   ;;  %s9281_s3 = inlined_call_operand.vmem [shape: f32[8,1], index: 3, kind: input, shape index: {}]   ;;  %s9282_s4 = inlined_call_operand.hbm [shape: f32[2,16,64], index: 4, kind: input, shape index: {}]   ;;  %s9283_s5 = inlined_call_operand.hbm [shape: f32[2,1,64], index: 5, kind: input, shape index: {}]   ;;  %s9284_s6 = inlined_call_operand.hbm [shape: f32[2,1,64], index: 6, kind: input, shape index: {}]   ;;  %s9285_s7 = inlined_call_operand.hbm [shape: f32[2,64,128], index: 7, kind: input, shape index: {}]   ;;  %s9286_s8 = inlined_call_operand.hbm [shape: f32[2,1,128], index: 8, kind: input, shape index: {}]   ;;  %s9287_s9 = inlined_call_operand.hbm [shape: f32[2,1,128], index: 9, kind: input, shape index: {}]   ;;  %s9288_s10 = inlined_call_operand.vmem [shape: f32[2,128,16], index: 10, kind: input, shape index: {}]   ;;  %s9289_s11 = inlined_call_operand.hbm [shape: f32[2,1,16], index: 11, kind: input, shape index: {}]   ;;  %s9290_s12 = inlined_call_operand.hbm [shape: f32[2,1,16], index: 12, kind: input, shape index: {}]   ;;  %s9291_s13 = inlined_call_operand.hbm [shape: f32[64,64], index: 13, kind: input, shape index: {}]   ;;  %s9292_s14 = inlined_call_operand.hbm [shape: f32[128,128], index: 14, kind: input, shape index: {}]   ;;  %s9293_s15 = inlined_call_operand.hbm [shape: f32[16,16], index: 15, kind: input, shape index: {}]   ;;  %s9294_s16 = inlined_call_operand.hbm [shape: bf16[2,16,1024], index: 16, kind: input, shape index: {}]   ;;  %s9295_s17 = inlined_call_operand.hbm [shape: f32[2,1,1024], index: 17, kind: input, shape index: {}]   ;;  %s9296_s18 = inlined_call_operand.hbm [shape: f32[2,1,1024], index: 18, kind: input, shape index: {}]   ;;  %s9297_s19 = inlined_call_operand.hbm [shape: bf16[2,1024,512], index: 19, kind: input, shape index: {}]   ;;  %s9298_s20 = inlined_call_operand.hbm [shape: f32[2,1,512], index: 20, kind: input, shape index: {}]   ;;  %s9299_s21 = inlined_call_operand.hbm [shape: f32[2,1,512], index: 21, kind: input, shape index: {}]   ;;  %s9300_s22 = inlined_call_operand.vmem [shape: bf16[2,512,8], index: 22, kind: input, shape index: {}]   ;;  %s9301_s23 = inlined_call_operand.hbm [shape: f32[2,1,8], index: 23, kind: input, shape index: {}]   ;;  %s9302_s24 = inlined_call_operand.hbm [shape: f32[2,1,8], index: 24, kind: input, shape index: {}]   ;;  %s9303_s25 = inlined_call_operand.hbm [shape: f32[2,8,8], index: 25, kind: output, shape index: {}]  }
   0x1   :  { %9351 = sst [smem:[#allocation59_spill]] %s9278_s0 }
   0x2   :  { %9352 = sst [smem:[#allocation60_spill]] %s9279_s1 }
   0x3   :  { %9353 = sst [smem:[#allocation61_spill]] %s9280_s2 }
   0x4   :  { %9354 = sst [smem:[#allocation62_spill]] %s9281_s3 }
   0x5   :  { %9355 = sst [smem:[#allocation63_spill]] %s9282_s4 }
   0x6   :  { %9356 = sst [smem:[#allocation64_spill]] %s9283_s5 }
   0x7   :  { %9357 = sst [smem:[#allocation65_spill]] %s9284_s6 }
   0x8   :  { %9358 = sst [smem:[#allocation66_spill]] %s9285_s7 }
   0x9   :  { %9359 = sst [smem:[#allocation67_spill]] %s9286_s8 }
   0xa   :  { %9360 = sst [smem:[#allocation68_spill]] %s9287_s9 }
   0xb   :  { %9361 = sst [smem:[#allocation69_spill]] %s9288_s10 }
   0xc   :  { %9362 = sst [smem:[#allocation70_spill]] %s9291_s13 }
   0xd   :  { %9363 = sst [smem:[#allocation71_spill]] %s9292_s14 }
   0xe   :  { %9364 = sst [smem:[#allocation72_spill]] %s9293_s15 }
   0xf   :  { %9365 = sst [smem:[#allocation73_spill]] %s9294_s16 }
  0x10   :  { %9366 = sst [smem:[#allocation74_spill]] %s9296_s18 }
  0x11   :  { %9367 = sst [smem:[#allocation75_spill]] %s9298_s20 }
  0x12   :  { %9368 = sst [smem:[#allocation76_spill]] %s9300_s22 }
  0x13   :  { %9369 = sst [smem:[#allocation77_spill]] %s9303_s25 }
  0x14   :  { %30 = vsyncpa [#allocation3], 0 }
  0x15   :  { %32 = vsyncpa [#allocation3 + $0x1], 0 }
  0x16   :  { %33 = vsyncpa [#allocation6], 0 }
  0x17   :  { %35 = vsyncpa [#allocation6 + $0x1], 0 }
  0x18   :  { %36 = vsyncpa [#allocation9], 0 }
  0x19   :  { %38 = vsyncpa [#allocation9 + $0x1], 0 }
  0x1a   :  { %39 = vsyncpa [#allocation12], 0 }
  0x1b   :  { %41 = vsyncpa [#allocation12 + $0x1], 0 }
  0x1c   :  { %42 = vsyncpa [#allocation15], 0 }
  0x1d   :  { %44 = vsyncpa [#allocation15 + $0x1], 0 }
  0x1e   :  { %45 = vsyncpa [#allocation18], 0 }
  0x1f   :  { %47 = vsyncpa [#allocation18 + $0x1], 0 }
  0x20   :  { %48 = vsyncpa [#allocation21], 0 }
  0x21   :  { %49 = vsyncpa [#allocation24], 0 }
  0x22   :  { %51 = vsyncpa [#allocation24 + $0x1], 0 }
  0x23   :  { %52 = vsyncpa [#allocation27], 0 }
  0x24   :  { %54 = vsyncpa [#allocation27 + $0x1], 0 }
  0x25   :  { %55 = vsyncpa [#allocation30], 0 }
  0x26   :  { %57 = vsyncpa [#allocation30 + $0x1], 0 }
  0x27   :  { %58 = vsyncpa [#allocation33], 0 }
  0x28   :  { %60 = vsyncpa [#allocation33 + $0x1], 0 }
  0x29   :  { %61 = vsyncpa [#allocation4], 0 }
  0x2a   :  { %63 = vsyncpa [#allocation4 + $0x1], 0  ;;  %s7773_s29 = smov 0   ;;  %s7775_s2 = smov 0  }
  0x2b   :  { %s7777_s6 = smov 0   ;;  %s7779_s30 = smov 0  }
  0x2c LB: > { %9370 = sst [smem:[#allocation49_spill]] %s7595_s29  ;;  %s7794_s7 = sadd.s32 4294967295, %s7607_s30   ;;  %s7607_s30 = sphi %s7779_s30, %s9449_s30   ;;  %s7603_s6 = sphi %s7777_s6, %s9452_s6   ;;  %s7599_s2 = sphi %s7775_s2, %s9451_s2   ;;  %s7595_s29 = sphi %s7773_s29, %s9450_s29  }
  0x2d   : > { %9371 = sst [smem:[#allocation50_spill]] %s7599_s2  ;;  %s5595_s3 = sadd.s32 4294967294, %s7607_s30  }
  0x2e   : > { %9372 = sst [smem:[#allocation51_spill]] %s7603_s6  ;;  %s7798_s26 = sadd.s32 1, %s7607_s30  }
  0x2f   : > { %9373 = sst [smem:[#allocation52_spill]] %s7794_s7  ;;  %s76_s1 = sadd.s32 1, %s7603_s6 }
  0x30   : > { %9374 = sst [smem:[#allocation53_spill]] %s7798_s26  ;;  %s73_s8 = ssub.s32 %s7607_s30, %s7798_s26 }
  0x31   : > { %p83_p0 = scmp.ne.s32.totalorder %s7603_s6, %s7599_s2  ;;  %p74_p1 = scmp.eq.s32.totalorder %s73_s8, 0 }
  0x32   : > { %p84_p2 = scmp.eq.s32.totalorder %s7607_s30, 0  ;;  %p89_p3 = scmp.ne.s32.totalorder %s7599_s2, %s7595_s29 }
  0x33   : > { %p9320_p4 = scmp.eq.s32.totalorder %s7794_s7, 0  ;;  %p712_p7 = scmp.eq.s32.totalorder %s7794_s7, 1 }
  0x34   : > { %s7810_s27 = scalar_select %p74_p1, %s7603_s6, %s76_s1  }
  0x35   : > { %p7812_p5 = por %p84_p2, %p83_p0  ;;  %p7818_p6 = por %p9320_p4, %p89_p3 }
  0x36   : > { %9375 = sst [smem:[#allocation54_spill]] %s7810_s27  ;;  %p718_p8 = scmp.eq.s32.totalorder %s5595_s3, 1 }
  0x37   : > { %s9376_s4 = scalar_select %p7812_p5, 1, 0 }
  0x38   : > { %s9377_s28 = scalar_select %p7818_p6, 1, 0 }
  0x39   : > { %p5596_p9 = scmp.ge.s32.totalorder %s7607_s30, 1  ;;  %p725_p10 = scmp.lt.s32.totalorder %s7607_s30, 3 }
  0x3a   : > { %9378 = sst [smem:[#allocation55_spill]] %s9377_s28  ;;  %p7825_p11 = por %p712_p7, %p83_p0 }
  0x3b   : > { %p7829_p12 = por %p718_p8, %p89_p3  ;;  %p7833_p13 = pnand %p5596_p9, %p725_p10 }
  0x3c   : > { %s9379_s9 = scalar_select %p7825_p11, 1, 0 }
  0x3d   : > { %s9381_s5 = scalar_select %p7829_p12, 1, 0 }
  0x3e   : > { %9380 = sst [smem:[#allocation56_spill]] %s9379_s9  ;;  %p6384_p1 = pneg %p7833_p13 }
  0x3f   : > { %9382 = sst [smem:[#allocation57_spill]] %s9381_s5  ;;  %s7609_s1 = smov [#allocation20]  }
  0x40   : > { %s9383_s0 = scalar_select %p7833_p13, 1, 0 }
  0x41   : > { %s756_s8 = sshll.u32 %s7609_s1, 4  ;;  %p7841_p2 = pnand %p6384_p1, %p9320_p4  ;;  %s757_s8 = int_to_ptr.vmem [resolvable:$true] %s756_s8 }
  0x42   : > { %9384 = sst [smem:[#allocation58_spill]] %s9383_s0  ;;  %s7610_s27 = smov [#allocation19]  }
  0x43   : > { %s743_s26 = sshll.u32 %s7610_s27, 4  ;;  %s9386_s14 = sld [smem:[#allocation71_spill]]  ;;  %s7845_s26 = int_to_ptr.vmem [resolvable:$true] %s743_s26 }
  0x44   : > { %p7855_p3 = pneg %p7841_p2 }
  0x49   : > { %s6909_s25 = scalar_lea.hbm %s9386_s14, 2048 }
  0x4a   : > { %p6910_p0 = scmp.ne.s32.totalorder %s9386_s14, %s6909_s25  ;;  %p6916_p9 = scmp.lt.u32.totalorder %s6909_s25, %s9386_s14 }
  0x4c   : > { %p6912_p7 = pnand %p7855_p3, %p6910_p0 }
  0x4e   : > { %p6913_p8 = pneg %p6912_p7 }
  0x50   : > { %p6918_p10 = pnand %p6916_p9, %p6913_p8 }
  0x52   : > { %6921 = shalt.err (!%p6918_p10)
}
  0x53   : > { %s6922_s29 = scalar_lea.vmem %s757_s8, 2048  ;;  %p6930_p11 = scmp.lt.s32.totalorder %s757_s8, %s757_s8 }
  0x54   : > { %p6923_p1 = scmp.ne.s32.totalorder %s757_s8, %s6922_s29  ;;  %p6931_p6 = scmp.lt.s32.totalorder %s6922_s29, %s6922_s29 }
  0x56   : > { %p6925_p4 = pnand %p6923_p1, %p7855_p3  ;;  %p6932_p13 = por %p6931_p6, %p6930_p11 }
  0x58   : > { %p6926_p12 = pneg %p6925_p4 }
  0x5a   : > { %p6933_p5 = pnand %p6932_p13, %p6926_p12 }
  0x5c   : > { %6936 = shalt.err (!%p6933_p5)
}
  0x5d   : > { %s7611_s22 = smov 128   ;;  %s7612_s9 = smov 8  }
  0x5e   : > { %6390 = dma.hbm_to_vmem [thread:$0]  (!%p7841_p2), %s9386_s14, 2048, %s757_s8, [#allocation21], %s7611_s22, %s7611_s22, %s7612_s9  }
  0x5f   : > { %s9388_s13 = sld [smem:[#allocation70_spill]] }
  0x65   : > { %s6937_s7 = scalar_lea.hbm %s9388_s13, 1024 }
  0x66   : > { %p6938_p4 = scmp.ne.s32.totalorder %s9388_s13, %s6937_s7  ;;  %p6944_p11 = scmp.lt.u32.totalorder %s6937_s7, %s9388_s13 }
  0x68   : > { %p6940_p5 = pnand %p6938_p4, %p7855_p3 }
  0x6a   : > { %p6941_p6 = pneg %p6940_p5 }
  0x6c   : > { %p6946_p12 = pnand %p6944_p11, %p6941_p6 }
  0x6e   : > { %6949 = shalt.err (!%p6946_p12)
}
  0x6f   : > { %s6950_s8 = scalar_lea.vmem %s7845_s26, 1024  ;;  %p6958_p8 = scmp.lt.s32.totalorder %s7845_s26, %s7845_s26 }
  0x70   : > { %p6951_p13 = scmp.ne.s32.totalorder %s7845_s26, %s6950_s8  ;;  %p6959_p9 = scmp.lt.s32.totalorder %s6950_s8, %s6950_s8 }
  0x72   : > { %p6953_p0 = pnand %p6951_p13, %p7855_p3  ;;  %p6960_p10 = por %p6959_p9, %p6958_p8 }
  0x74   : > { %p6954_p7 = pneg %p6953_p0 }
  0x76   : > { %p6961_p1 = pnand %p6960_p10, %p6954_p7 }
  0x78   : > { %6964 = shalt.err (!%p6961_p1)
}
  0x79   : > { %6387 = dma.hbm_to_vmem [thread:$0]  (!%p7841_p2), %s9388_s13, 1024, %s7845_s26, [#allocation18], %s7611_s22, %s7611_s22, %s7612_s9  }
  0x7a   : > { %s7613_s28 = smov [#allocation22]   ;;  %s9389_s15 = sld [smem:[#allocation72_spill]] }
  0x7b   : > { %s769_s0 = sshll.u32 %s7613_s28, 4  ;;  %s770_s0 = int_to_ptr.vmem [resolvable:$true] %s769_s0 }
  0x80   : > { %s6965_s5 = scalar_lea.hbm %s9389_s15, 256 }
  0x81   : > { %p6966_p4 = scmp.ne.s32.totalorder %s9389_s15, %s6965_s5  ;;  %p6972_p11 = scmp.lt.u32.totalorder %s6965_s5, %s9389_s15 }
  0x83   : > { %p6968_p5 = pnand %p6966_p4, %p7855_p3 }
  0x85   : > { %p6969_p6 = pneg %p6968_p5 }
  0x87   : > { %p6974_p12 = pnand %p6972_p11, %p6969_p6 }
  0x89   : > { %6977 = shalt.err (!%p6974_p12)
}
  0x8a   : > { %s6978_s26 = scalar_lea.vmem %s770_s0, 256  ;;  %p6986_p8 = scmp.lt.s32.totalorder %s770_s0, %s770_s0 }
  0x8b   : > { %p6979_p13 = scmp.ne.s32.totalorder %s770_s0, %s6978_s26  ;;  %p6987_p9 = scmp.lt.s32.totalorder %s6978_s26, %s6978_s26 }
  0x8d   : > { %p6981_p0 = pnand %p6979_p13, %p7855_p3  ;;  %p6988_p10 = por %p6987_p9, %p6986_p8 }
  0x8f   : > { %p6982_p7 = pneg %p6981_p0 }
  0x91   : > { %p6989_p1 = pnand %p6988_p10, %p6982_p7 }
  0x93   : > { %6992 = shalt.err (!%p6989_p1)
}
  0x94   : > { %6393 = dma.hbm_to_vmem [thread:$0]  (!%p7841_p2), %s9389_s15, 256, %s770_s0, [#allocation21], %s7611_s22, %s7611_s22, %s7612_s9  }
  0x95   : > { %p9331_p4 = scmp.ge.s32.totalorder %s7607_s30, 2 }
  0x96   : > { %s7925_s1 = sand.u32 (!%p9331_p4), 1, %s7603_s6   ;;  %s7928_s3 = sshll.u32 (!%p9331_p4), %s7607_s30, 7 }
  0x97   : > { %779 = sbr.rel (%p9331_p4) target bundleno = 633 (0x279), region = 36  ;;  %s7931_s7 = sshll.u32 (!%p9331_p4), %s7925_s1, 3 }
  0x98   : > { %s7934_s28 = sand.u32 (!%p9331_p4), 1, %s7607_s30   ;;  %s9390_s0 = sld [smem:[#allocation60_spill]] (!%p9331_p4) }
  0x99   : > { %s805_s25 = scalar_lea.vmem (!%p9331_p4), [#allocation5], %s7931_s7  ;;  %p9391_p3 = scmp.ne.s32.totalorder (!%p9331_p4), %s9376_s4, 0 }
  0x9a   : > { %s812_s5 = sshll.u32 (!%p9331_p4), %s805_s25, 4  ;;  %s813_s5 = int_to_ptr.vmem [resolvable:$true] %s812_s5 }
  0x9e   : > { %s7940_s10 = scalar_lea.hbm %s9390_s0, %s7928_s3  ;;  %s6997_s14 = scalar_lea.hbm %s9390_s0, 256 }
  0x9f   : > { %s6993_s29 = scalar_lea.hbm %s7940_s10, 128  ;;  %p6998_p11 = scmp.lt.u32.totalorder %s7940_s10, %s9390_s0 }
  0xa0   : > { %p6994_p2 = scmp.ne.s32.totalorder %s7940_s10, %s6993_s29  ;;  %p6999_p12 = scmp.lt.u32.totalorder %s6997_s14, %s6993_s29 }
  0xa1   : > { %p7001_p0 = scmp.lt.u32.totalorder %s6993_s29, %s7940_s10 }
  0xa2   : > { %p6995_p5 = pnand %p6994_p2, %p9391_p3  ;;  %p7000_p13 = por %p6999_p12, %p6998_p11 }
  0xa4   : > { %p6996_p6 = pneg %p6995_p5  ;;  %p7002_p7 = por %p7001_p0, %p7000_p13 }
  0xa6   : > { %p7003_p8 = pnand %p7002_p7, %p6996_p6 }
  0xa8   : > { %7006 = shalt.err (!%p7003_p8)
}
  0xa9   : > { %s7007_s9 = scalar_lea.vmem %s813_s5, 128  ;;  %s7614_s25 = smov [#allocation5]  }
  0xaa   : > { %p7008_p9 = scmp.ne.s32.totalorder %s813_s5, %s7007_s9  ;;  %s7011_s27 = sshll.u32 %s7614_s25, 4  ;;  %s7012_s27 = int_to_ptr.vmem [resolvable:$false] %s7011_s27 }
  0xab   : > { %s7013_s8 = scalar_lea.vmem %s7012_s27, 256  ;;  %p7014_p2 = scmp.lt.s32.totalorder %s813_s5, %s7012_s27 }
  0xac   : > { %p7009_p10 = pnand %p7008_p9, %p9391_p3  ;;  %p7015_p5 = scmp.lt.s32.totalorder %s7013_s8, %s7007_s9 }
  0xae   : > { %p7010_p1 = pneg %p7009_p10  ;;  %p7016_p4 = por %p7015_p5, %p7014_p2 }
  0xb0   : > { %p7017_p11 = pnand %p7016_p4, %p7010_p1 }
  0xb2   : > { %7020 = shalt.err (!%p7017_p11)
}
  0xb3   : > { %s9392_s29 = scalar_lea.sflag [#allocation6], %s7934_s28  ;;  %s7964_s26 = sshll.u32 %s7607_s30, 4 }
  0xb4   : > { %6341 = dma.hbm_to_vmem [thread:$0]  (%p9391_p3), %s7940_s10, 128, %s813_s5, %s9392_s29  }
  0xb5   : > { %s9393_s27 = sld [smem:[#allocation64_spill]]  ;;  %s843_s9 = scalar_lea.vmem [#allocation8], %s7925_s1 }
  0xb6   : > { %s850_s25 = sshll.u32 %s843_s9, 4  ;;  %s851_s25 = int_to_ptr.vmem [resolvable:$true] %s850_s25 }
  0xbb   : > { %s7970_s22 = scalar_lea.hbm %s9393_s27, %s7964_s26  ;;  %s7025_s29 = scalar_lea.hbm %s9393_s27, 32 }
  0xbc   : > { %s7021_s0 = scalar_lea.hbm %s7970_s22, 16  ;;  %p7026_p13 = scmp.lt.u32.totalorder %s7970_s22, %s9393_s27 }
  0xbd   : > { %p7022_p4 = scmp.ne.s32.totalorder %s7970_s22, %s7021_s0  ;;  %p7027_p0 = scmp.lt.u32.totalorder %s7025_s29, %s7021_s0 }
  0xbe   : > { %p7029_p8 = scmp.lt.u32.totalorder %s7021_s0, %s7970_s22 }
  0xbf   : > { %p7023_p6 = pnand %p7022_p4, %p9391_p3  ;;  %p7028_p7 = por %p7027_p0, %p7026_p13 }
  0xc1   : > { %p7024_p12 = pneg %p7023_p6  ;;  %p7030_p9 = por %p7029_p8, %p7028_p7 }
  0xc3   : > { %p7031_p10 = pnand %p7030_p9, %p7024_p12 }
  0xc5   : > { %7034 = shalt.err (!%p7031_p10)
}
  0xc6   : > { %s7035_s9 = scalar_lea.vmem %s851_s25, 16  ;;  %s7615_s8 = smov [#allocation8]  }
  0xc7   : > { %p7036_p1 = scmp.ne.s32.totalorder %s851_s25, %s7035_s9  ;;  %s7039_s13 = sshll.u32 %s7615_s8, 4  ;;  %s7040_s13 = int_to_ptr.vmem [resolvable:$false] %s7039_s13 }
  0xc8   : > { %s7041_s10 = scalar_lea.vmem %s7040_s13, 32  ;;  %p7042_p11 = scmp.lt.s32.totalorder %s851_s25, %s7040_s13 }
  0xc9   : > { %p7037_p2 = pnand %p7036_p1, %p9391_p3  ;;  %p7043_p4 = scmp.lt.s32.totalorder %s7041_s10, %s7035_s9 }
  0xcb   : > { %p7038_p5 = pneg %p7037_p2  ;;  %p7044_p6 = por %p7043_p4, %p7042_p11 }
  0xcd   : > { %p7045_p0 = pnand %p7044_p6, %p7038_p5 }
  0xcf   : > { %7048 = shalt.err (!%p7045_p0)
}
  0xd0   : > { %s9394_s0 = scalar_lea.sflag [#allocation9], %s7934_s28  ;;  %s9334_s8 = sshll.u32 %s7925_s1, 6 }
  0xd1   : > { %6343 = dma.hbm_to_vmem [thread:$0]  (%p9391_p3), %s7970_s22, 16, %s851_s25, %s9394_s0  }
  0xd2   : > { %s9335_s5 = sshll.u32 %s7607_s30, 10  ;;  %s9395_s14 = sld [smem:[#allocation66_spill]] }
  0xd3   : > { %s878_s9 = scalar_lea.vmem [#allocation11], %s9334_s8  ;;  %s9338_s15 = scalar_lea.sflag [#allocation12], %s7934_s28 }
  0xd4   : > { %s885_s10 = sshll.u32 %s878_s9, 4  ;;  %s8004_s10 = int_to_ptr.vmem [resolvable:$true] %s885_s10 }
  0xd8   : > { %s8000_s2 = scalar_lea.hbm %s9395_s14, %s9335_s5  ;;  %s7053_s0 = scalar_lea.hbm %s9395_s14, 2048 }
  0xd9   : > { %s7049_s27 = scalar_lea.hbm %s8000_s2, 1024  ;;  %p7054_p8 = scmp.lt.u32.totalorder %s8000_s2, %s9395_s14 }
  0xda   : > { %p7050_p12 = scmp.ne.s32.totalorder %s8000_s2, %s7049_s27  ;;  %p7055_p9 = scmp.lt.u32.totalorder %s7053_s0, %s7049_s27 }
  0xdb   : > { %p7057_p1 = scmp.lt.u32.totalorder %s7049_s27, %s8000_s2 }
  0xdc   : > { %p7051_p13 = pnand %p7050_p12, %p9391_p3  ;;  %p7056_p10 = por %p7055_p9, %p7054_p8 }
  0xde   : > { %p7052_p7 = pneg %p7051_p13  ;;  %p7058_p2 = por %p7057_p1, %p7056_p10 }
  0xe0   : > { %p7059_p5 = pnand %p7058_p2, %p7052_p7 }
  0xe2   : > { %7062 = shalt.err (!%p7059_p5)
}
  0xe3   : > { %s7063_s9 = scalar_lea.vmem %s8004_s10, 1024  ;;  %s7616_s22 = smov [#allocation11]  }
  0xe4   : > { %p7064_p11 = scmp.ne.s32.totalorder %s8004_s10, %s7063_s9  ;;  %s7067_s25 = sshll.u32 %s7616_s22, 4  ;;  %s7068_s25 = int_to_ptr.vmem [resolvable:$false] %s7067_s25 }
  0xe5   : > { %s7069_s13 = scalar_lea.vmem %s7068_s25, 2048  ;;  %p7070_p0 = scmp.lt.s32.totalorder %s8004_s10, %s7068_s25 }
  0xe6   : > { %p7065_p4 = pnand %p7064_p11, %p9391_p3  ;;  %p7071_p12 = scmp.lt.s32.totalorder %s7069_s13, %s7063_s9 }
  0xe8   : > { %p7066_p6 = pneg %p7065_p4  ;;  %p7072_p13 = por %p7071_p12, %p7070_p0 }
  0xea   : > { %p7073_p8 = pnand %p7072_p13, %p7066_p6 }
  0xec   : > { %7076 = shalt.err (!%p7073_p8)
}
  0xed   : > { %s9339_s27 = smov 128   ;;  %s9341_s0 = smov 8  }
  0xee   : > { %6345 = dma.hbm_to_vmem [thread:$0]  (%p9391_p3), %s8000_s2, 1024, %s8004_s10, %s9338_s15, %s9339_s27, %s9339_s27, %s9341_s0  }
  0xef   : > { %s9396_s22 = sld [smem:[#allocation68_spill]]  ;;  %s915_s13 = scalar_lea.vmem [#allocation14], %s7925_s1 }
  0xf0   : > { %s922_s8 = sshll.u32 %s915_s13, 4  ;;  %s9340_s5 = scalar_lea.sflag [#allocation15], %s7934_s28  ;;  %s923_s8 = int_to_ptr.vmem [resolvable:$true] %s922_s8 }
  0xf5   : > { %s8037_s25 = scalar_lea.hbm %s9396_s22, %s7964_s26  ;;  %s7081_s10 = scalar_lea.hbm %s9396_s22, 32 }
  0xf6   : > { %s7077_s14 = scalar_lea.hbm %s8037_s25, 16  ;;  %p7082_p1 = scmp.lt.u32.totalorder %s8037_s25, %s9396_s22 }
  0xf7   : > { %p7078_p7 = scmp.ne.s32.totalorder %s8037_s25, %s7077_s14  ;;  %p7083_p2 = scmp.lt.u32.totalorder %s7081_s10, %s7077_s14 }
  0xf8   : > { %p7085_p11 = scmp.lt.u32.totalorder %s7077_s14, %s8037_s25 }
  0xf9   : > { %p7079_p9 = pnand %p7078_p7, %p9391_p3  ;;  %p7084_p5 = por %p7083_p2, %p7082_p1 }
  0xfb   : > { %p7080_p10 = pneg %p7079_p9  ;;  %p7086_p4 = por %p7085_p11, %p7084_p5 }
  0xfd   : > { %p7087_p6 = pnand %p7086_p4, %p7080_p10 }
  0xff   : > { %7090 = shalt.err (!%p7087_p6)
}
 0x100   : > { %s7091_s13 = scalar_lea.vmem %s923_s8, 16  ;;  %s7619_s15 = smov [#allocation14]  }
 0x101   : > { %p7092_p0 = scmp.ne.s32.totalorder %s923_s8, %s7091_s13  ;;  %s7095_s27 = sshll.u32 %s7619_s15, 4  ;;  %s7096_s27 = int_to_ptr.vmem [resolvable:$false] %s7095_s27 }
 0x102   : > { %s7097_s6 = scalar_lea.vmem %s7096_s27, 32  ;;  %p7098_p8 = scmp.lt.s32.totalorder %s923_s8, %s7096_s27 }
 0x103   : > { %p7093_p12 = pnand %p7092_p0, %p9391_p3  ;;  %p7099_p7 = scmp.lt.s32.totalorder %s7097_s6, %s7091_s13 }
 0x105   : > { %p7094_p13 = pneg %p7093_p12  ;;  %p7100_p9 = por %p7099_p7, %p7098_p8 }
 0x107   : > { %p7101_p1 = pnand %p7100_p9, %p7094_p13 }
 0x109   : > { %7104 = shalt.err (!%p7101_p1)
}
 0x10a   : > { %6347 = dma.hbm_to_vmem [thread:$0]  (%p9391_p3), %s8037_s25, 16, %s923_s8, %s9340_s5  }
 0x10b   : > { %s9397_s14 = sshll.u32 %s7607_s30, 10  ;;  %s9398_s16 = sld [smem:[#allocation73_spill]] }
 0x10c   : > { %s9399_s27 = sshll.u32 %s7925_s1, 6  ;;  %s9347_s13 = scalar_lea.sflag [#allocation24], %s7934_s28 }
 0x10d   : > { %s975_s29 = scalar_lea.vmem [#allocation23], %s9399_s27 }
 0x10e   : > { %s982_s9 = sshll.u32 %s975_s29, 4  ;;  %s8069_s9 = int_to_ptr.vmem [resolvable:$true] %s982_s9 }
 0x111   : > { %s8065_s10 = scalar_lea.hbm %s9398_s16, %s9397_s14  ;;  %s7109_s14 = scalar_lea.hbm %s9398_s16, 2048 }
 0x112   : > { %s7105_s6 = scalar_lea.hbm %s8065_s10, 1024  ;;  %p7110_p11 = scmp.lt.u32.totalorder %s8065_s10, %s9398_s16 }
 0x113   : > { %p7106_p10 = scmp.ne.s32.totalorder %s8065_s10, %s7105_s6  ;;  %p7111_p4 = scmp.lt.u32.totalorder %s7109_s14, %s7105_s6 }
 0x114   : > { %p7113_p0 = scmp.lt.u32.totalorder %s7105_s6, %s8065_s10 }
 0x115   : > { %p7107_p2 = pnand %p7106_p10, %p9391_p3  ;;  %p7112_p6 = por %p7111_p4, %p7110_p11 }
 0x117   : > { %p7108_p5 = pneg %p7107_p2  ;;  %p7114_p12 = por %p7113_p0, %p7112_p6 }
 0x119   : > { %p7115_p13 = pnand %p7114_p12, %p7108_p5 }
 0x11b   : > { %7118 = shalt.err (!%p7115_p13)
}
 0x11c   : > { %s7119_s27 = scalar_lea.vmem %s8069_s9, 1024  ;;  %s7620_s29 = smov [#allocation23]  }
 0x11d   : > { %p7120_p8 = scmp.ne.s32.totalorder %s8069_s9, %s7119_s27  ;;  %s7123_s8 = sshll.u32 %s7620_s29, 4  ;;  %s7124_s8 = int_to_ptr.vmem [resolvable:$false] %s7123_s8 }
 0x11e   : > { %s7125_s25 = scalar_lea.vmem %s7124_s8, 2048  ;;  %p7126_p1 = scmp.lt.s32.totalorder %s8069_s9, %s7124_s8 }
 0x11f   : > { %p7121_p7 = pnand %p7120_p8, %p9391_p3  ;;  %p7127_p10 = scmp.lt.s32.totalorder %s7125_s25, %s7119_s27 }
 0x121   : > { %p7122_p9 = pneg %p7121_p7  ;;  %p7128_p2 = por %p7127_p10, %p7126_p1 }
 0x123   : > { %p7129_p11 = pnand %p7128_p2, %p7122_p9 }
 0x125   : > { %7132 = shalt.err (!%p7129_p11)
}
 0x126   : > { %s7621_s6 = smov 512   ;;  %s7622_s14 = smov 32  }
 0x127   : > { %6350 = dma.hbm_to_vmem [thread:$0]  (%p9391_p3), %s8065_s10, 1024, %s8069_s9, %s9347_s13, %s7621_s6, %s7621_s6, %s7622_s14  }
 0x128   : > { %s9400_s18 = sld [smem:[#allocation74_spill]]  ;;  %s1015_s29 = scalar_lea.vmem [#allocation26], %s7931_s7 }
 0x129   : > { %s1023_s8 = sshll.u32 %s1015_s29, 4  ;;  %s9344_s25 = scalar_lea.sflag [#allocation27], %s7934_s28  ;;  %s1024_s8 = int_to_ptr.vmem [resolvable:$true] %s1023_s8 }
 0x12e   : > { %s8099_s27 = scalar_lea.hbm %s9400_s18, %s7928_s3  ;;  %s7137_s9 = scalar_lea.hbm %s9400_s18, 256 }
 0x12f   : > { %s7133_s5 = scalar_lea.hbm %s8099_s27, 128  ;;  %p7138_p0 = scmp.lt.u32.totalorder %s8099_s27, %s9400_s18 }
 0x130   : > { %p7134_p5 = scmp.ne.s32.totalorder %s8099_s27, %s7133_s5  ;;  %p7139_p12 = scmp.lt.u32.totalorder %s7137_s9, %s7133_s5 }
 0x131   : > { %p7141_p8 = scmp.lt.u32.totalorder %s7133_s5, %s8099_s27 }
 0x132   : > { %p7135_p4 = pnand %p7134_p5, %p9391_p3  ;;  %p7140_p13 = por %p7139_p12, %p7138_p0 }
 0x134   : > { %p7136_p6 = pneg %p7135_p4  ;;  %p7142_p7 = por %p7141_p8, %p7140_p13 }
 0x136   : > { %p7143_p9 = pnand %p7142_p7, %p7136_p6 }
 0x138   : > { %7146 = shalt.err (!%p7143_p9)
}
 0x139   : > { %s7147_s2 = scalar_lea.vmem %s1024_s8, 128  ;;  %s7623_s15 = smov [#allocation26]  }
 0x13a   : > { %p7148_p1 = scmp.ne.s32.totalorder %s1024_s8, %s7147_s2  ;;  %s7151_s29 = sshll.u32 %s7623_s15, 4  ;;  %s7152_s29 = int_to_ptr.vmem [resolvable:$false] %s7151_s29 }
 0x13b   : > { %s7153_s0 = scalar_lea.vmem %s7152_s29, 256  ;;  %p7154_p11 = scmp.lt.s32.totalorder %s1024_s8, %s7152_s29 }
 0x13c   : > { %p7149_p10 = pnand %p7148_p1, %p9391_p3  ;;  %p7155_p5 = scmp.lt.s32.totalorder %s7153_s0, %s7147_s2 }
 0x13e   : > { %p7150_p2 = pneg %p7149_p10  ;;  %p7156_p4 = por %p7155_p5, %p7154_p11 }
 0x140   : > { %p7157_p0 = pnand %p7156_p4, %p7150_p2 }
 0x142   : > { %7160 = shalt.err (!%p7157_p0)
}
 0x143   : > { %6352 = dma.hbm_to_vmem [thread:$0]  (%p9391_p3), %s8099_s27, 128, %s1024_s8, %s9344_s25  }
 0x144   : > { %s9343_s5 = sshll.u32 %s7925_s1, 2  ;;  %s9342_s10 = sshll.u32 %s7607_s30, 6 }
 0x145   : > { %s9401_s20 = sld [smem:[#allocation75_spill]]  ;;  %s1055_s2 = scalar_lea.vmem [#allocation29], %s9343_s5 }
 0x146   : > { %s1063_s15 = sshll.u32 %s1055_s2, 4  ;;  %s9345_s29 = scalar_lea.sflag [#allocation30], %s7934_s28  ;;  %s1064_s15 = int_to_ptr.vmem [resolvable:$true] %s1063_s15 }
 0x14b   : > { %s8129_s14 = scalar_lea.hbm %s9401_s20, %s9342_s10  ;;  %s7165_s9 = scalar_lea.hbm %s9401_s20, 128 }
 0x14c   : > { %s7161_s0 = scalar_lea.hbm %s8129_s14, 64  ;;  %p7166_p8 = scmp.lt.u32.totalorder %s8129_s14, %s9401_s20 }
 0x14d   : > { %p7162_p6 = scmp.ne.s32.totalorder %s8129_s14, %s7161_s0  ;;  %p7167_p7 = scmp.lt.u32.totalorder %s7165_s9, %s7161_s0 }
 0x14e   : > { %p7169_p1 = scmp.lt.u32.totalorder %s7161_s0, %s8129_s14 }
 0x14f   : > { %p7163_p12 = pnand %p7162_p6, %p9391_p3  ;;  %p7168_p9 = por %p7167_p7, %p7166_p8 }
 0x151   : > { %p7164_p13 = pneg %p7163_p12  ;;  %p7170_p10 = por %p7169_p1, %p7168_p9 }
 0x153   : > { %p7171_p2 = pnand %p7170_p10, %p7164_p13 }
 0x155   : > { %7174 = shalt.err (!%p7171_p2)
}
 0x156   : > { %s7175_s2 = scalar_lea.vmem %s1064_s15, 64  ;;  %s7624_s5 = smov [#allocation29]  }
 0x157   : > { %p7176_p11 = scmp.ne.s32.totalorder %s1064_s15, %s7175_s2  ;;  %s7179_s25 = sshll.u32 %s7624_s5, 4  ;;  %s7180_s25 = int_to_ptr.vmem [resolvable:$false] %s7179_s25 }
 0x158   : > { %s7181_s27 = scalar_lea.vmem %s7180_s25, 128  ;;  %p7182_p0 = scmp.lt.s32.totalorder %s1064_s15, %s7180_s25 }
 0x159   : > { %p7177_p5 = pnand %p7176_p11, %p9391_p3  ;;  %p7183_p6 = scmp.lt.s32.totalorder %s7181_s27, %s7175_s2 }
 0x15b   : > { %p7178_p4 = pneg %p7177_p5  ;;  %p7184_p12 = por %p7183_p6, %p7182_p0 }
 0x15d   : > { %p7185_p7 = pnand %p7184_p12, %p7178_p4 }
 0x15f   : > { %7188 = shalt.err (!%p7185_p7)
}
 0x160   : > { %6354 = dma.hbm_to_vmem [thread:$0]  (%p9391_p3), %s8129_s14, 64, %s1064_s15, %s9345_s29  }
 0x161   : > { %s8157_s5 = scalar_lea.hbm %s9301_s23, %s7964_s26  ;;  %s1100_s25 = scalar_lea.vmem [#allocation32], %s7925_s1 }
 0x162   : > { %s1107_s8 = sshll.u32 %s1100_s25, 4  ;;  %s9346_s9 = scalar_lea.sflag [#allocation33], %s7934_s28  ;;  %s1108_s8 = int_to_ptr.vmem [resolvable:$true] %s1107_s8 }
 0x163   : > { %s7189_s6 = scalar_lea.hbm %s8157_s5, 16  ;;  %s7193_s15 = scalar_lea.hbm %s9301_s23, 32 }
 0x164   : > { %p7190_p13 = scmp.ne.s32.totalorder %s8157_s5, %s7189_s6  ;;  %p7194_p1 = scmp.lt.u32.totalorder %s8157_s5, %s9301_s23 }
 0x165   : > { %p7195_p10 = scmp.lt.u32.totalorder %s7193_s15, %s7189_s6  ;;  %p7197_p11 = scmp.lt.u32.totalorder %s7189_s6, %s8157_s5 }
 0x166   : > { %p7191_p8 = pnand %p7190_p13, %p9391_p3 }
 0x167   : > { %p7196_p2 = por %p7195_p10, %p7194_p1 }
 0x168   : > { %p7192_p9 = pneg %p7191_p8 }
 0x169   : > { %p7198_p5 = por %p7197_p11, %p7196_p2 }
 0x16b   : > { %p7199_p4 = pnand %p7198_p5, %p7192_p9 }
 0x16d   : > { %7202 = shalt.err (!%p7199_p4)
}
 0x16e   : > { %s7203_s0 = scalar_lea.vmem %s1108_s8, 16  ;;  %s7625_s25 = smov [#allocation32]  }
 0x16f   : > { %p7204_p0 = scmp.ne.s32.totalorder %s1108_s8, %s7203_s0  ;;  %s7207_s29 = sshll.u32 %s7625_s25, 4  ;;  %s7208_s29 = int_to_ptr.vmem [resolvable:$false] %s7207_s29 }
 0x170   : > { %s7209_s2 = scalar_lea.vmem %s7208_s29, 32  ;;  %p7210_p7 = scmp.lt.s32.totalorder %s1108_s8, %s7208_s29 }
 0x171   : > { %p7205_p6 = pnand %p7204_p0, %p9391_p3  ;;  %p7211_p13 = scmp.lt.s32.totalorder %s7209_s2, %s7203_s0 }
 0x173   : > { %p7206_p12 = pneg %p7205_p6  ;;  %p7212_p8 = por %p7211_p13, %p7210_p7 }
 0x175   : > { %p7213_p1 = pnand %p7212_p8, %p7206_p12 }
 0x177   : > { %7216 = shalt.err (!%p7213_p1)
}
 0x178   : > { %6356 = dma.hbm_to_vmem [thread:$0]  (%p9391_p3), %s8157_s5, 16, %s1108_s8, %s9346_s9  }
 0x179   : > { %s9402_s15 = sld [smem:[#allocation59_spill]]  ;;  %s787_s29 = scalar_lea.vmem [#allocation2], %s7931_s7 }
 0x17a   : > { %s794_s10 = sshll.u32 %s787_s29, 4  ;;  %s784_s25 = scalar_lea.sflag [#allocation3], %s7925_s1  ;;  %s795_s10 = int_to_ptr.vmem [resolvable:$true] %s794_s10 }
 0x17f   : > { %s8184_s27 = scalar_lea.hbm %s9402_s15, %s7928_s3  ;;  %s7221_s6 = scalar_lea.hbm %s9402_s15, 256 }
 0x180   : > { %s7217_s2 = scalar_lea.hbm %s8184_s27, 128  ;;  %p7222_p11 = scmp.lt.u32.totalorder %s8184_s27, %s9402_s15 }
 0x181   : > { %p7218_p9 = scmp.ne.s32.totalorder %s8184_s27, %s7217_s2  ;;  %p7223_p5 = scmp.lt.u32.totalorder %s7221_s6, %s7217_s2 }
 0x182   : > { %p7225_p0 = scmp.lt.u32.totalorder %s7217_s2, %s8184_s27 }
 0x183   : > { %p7219_p10 = pnand %p7218_p9, %p9391_p3  ;;  %p7224_p4 = por %p7223_p5, %p7222_p11 }
 0x185   : > { %p7220_p2 = pneg %p7219_p10  ;;  %p7226_p6 = por %p7225_p0, %p7224_p4 }
 0x187   : > { %p7227_p12 = pnand %p7226_p6, %p7220_p2 }
 0x189   : > { %7230 = shalt.err (!%p7227_p12)
}
 0x18a   : > { %s7231_s29 = scalar_lea.vmem %s795_s10, 128  ;;  %s7626_s13 = smov [#allocation2]  }
 0x18b   : > { %p7232_p7 = scmp.ne.s32.totalorder %s795_s10, %s7231_s29  ;;  %s7235_s0 = sshll.u32 %s7626_s13, 4  ;;  %s7236_s0 = int_to_ptr.vmem [resolvable:$false] %s7235_s0 }
 0x18c   : > { %s7237_s5 = scalar_lea.vmem %s7236_s0, 256  ;;  %p7238_p1 = scmp.lt.s32.totalorder %s795_s10, %s7236_s0 }
 0x18d   : > { %p7233_p13 = pnand %p7232_p7, %p9391_p3  ;;  %p7239_p9 = scmp.lt.s32.totalorder %s7237_s5, %s7231_s29 }
 0x18f   : > { %p7234_p8 = pneg %p7233_p13  ;;  %p7240_p10 = por %p7239_p9, %p7238_p1 }
 0x191   : > { %p7241_p5 = pnand %p7240_p10, %p7234_p8 }
 0x193   : > { %7244 = shalt.err (!%p7241_p5)
}
 0x194   : > { %6340 = dma.hbm_to_vmem [thread:$0]  (%p9391_p3), %s8184_s27, 128, %s795_s10, %s784_s25  }
 0x195   : > { %s5976_s9 = sshll.u32 %s7607_s30, 8  ;;  %s9403_s2 = sshll.u32 %s7925_s1, 4 }
 0x196   : > { %s823_s8 = scalar_lea.vmem [#allocation7], %s9403_s2  ;;  %s9404_s15 = sld [smem:[#allocation63_spill]] }
 0x197   : > { %s830_s6 = sshll.u32 %s823_s8, 4  ;;  %s8214_s6 = int_to_ptr.vmem [resolvable:$true] %s830_s6 }
 0x19c   : > { %s8212_s16 = scalar_lea.hbm %s9404_s15, %s5976_s9  ;;  %s7249_s25 = scalar_lea.hbm %s9404_s15, 512 }
 0x19d   : > { %s7245_s0 = scalar_lea.hbm %s8212_s16, 256  ;;  %p7250_p0 = scmp.lt.u32.totalorder %s8212_s16, %s9404_s15 }
 0x19e   : > { %p7246_p2 = scmp.ne.s32.totalorder %s8212_s16, %s7245_s0  ;;  %p7251_p6 = scmp.lt.u32.totalorder %s7249_s25, %s7245_s0 }
 0x19f   : > { %p7253_p7 = scmp.lt.u32.totalorder %s7245_s0, %s8212_s16 }
 0x1a0   : > { %p7247_p11 = pnand %p7246_p2, %p9391_p3  ;;  %p7252_p12 = por %p7251_p6, %p7250_p0 }
 0x1a2   : > { %p7248_p4 = pneg %p7247_p11  ;;  %p7254_p13 = por %p7253_p7, %p7252_p12 }
 0x1a4   : > { %p7255_p8 = pnand %p7254_p13, %p7248_p4 }
 0x1a6   : > { %7258 = shalt.err (!%p7255_p8)
}
 0x1a7   : > { %s7259_s9 = scalar_lea.vmem %s8214_s6, 256  ;;  %s7627_s2 = smov [#allocation7]  }
 0x1a8   : > { %p7260_p1 = scmp.ne.s32.totalorder %s8214_s6, %s7259_s9  ;;  %s7263_s8 = sshll.u32 %s7627_s2, 4  ;;  %s7264_s8 = int_to_ptr.vmem [resolvable:$false] %s7263_s8 }
 0x1a9   : > { %s7265_s14 = scalar_lea.vmem %s7264_s8, 512  ;;  %p7266_p5 = scmp.lt.s32.totalorder %s8214_s6, %s7264_s8 }
 0x1aa   : > { %p7261_p9 = pnand %p7260_p1, %p9391_p3  ;;  %p7267_p2 = scmp.lt.s32.totalorder %s7265_s14, %s7259_s9 }
 0x1ac   : > { %p7262_p10 = pneg %p7261_p9  ;;  %p7268_p11 = por %p7267_p2, %p7266_p5 }
 0x1ae   : > { %p7269_p0 = pnand %p7268_p11, %p7262_p10 }
 0x1b0   : > { %7272 = shalt.err (!%p7269_p0)
}
 0x1b1   : > { %s9405_s13 = smov 8   ;;  %s9406_s0 = smov 128  }
 0x1b2   : > { %s9407_s27 = scalar_lea.sflag [#allocation6], %s7934_s28  ;;  %s9408_s29 = sld [smem:[#allocation65_spill]] }
 0x1b3   : > { %6342 = dma.hbm_to_vmem [thread:$0]  (%p9391_p3), %s8212_s16, 256, %s8214_s6, %s9407_s27, %s9406_s0, %s9406_s0, %s9405_s13  }
 0x1b4   : > { %s860_s2 = scalar_lea.vmem [#allocation10], %s7925_s1  ;;  %s9410_s18 = sld [smem:[#allocation67_spill]] }
 0x1b5   : > { %s867_s8 = sshll.u32 %s860_s2, 4  ;;  %s868_s8 = int_to_ptr.vmem [resolvable:$true] %s867_s8 }
 0x1b8   : > { %s9409_s5 = smov %s9408_s29  ;;  %s8246_s9 = scalar_lea.hbm %s9408_s29, %s7964_s26 }
 0x1b9   : > { %s7273_s22 = scalar_lea.hbm %s8246_s9, 16  ;;  %s7277_s13 = scalar_lea.hbm %s9409_s5, 32 }
 0x1ba   : > { %s8253_s20 = scalar_lea.hbm %s9410_s18, %s7964_s26  ;;  %p7274_p4 = scmp.ne.s32.totalorder %s8246_s9, %s7273_s22 }
 0x1bb   : > { %p7278_p7 = scmp.lt.u32.totalorder %s8246_s9, %s9409_s5  ;;  %p7279_p13 = scmp.lt.u32.totalorder %s7277_s13, %s7273_s22 }
 0x1bc   : > { %p7275_p6 = pnand %p7274_p4, %p9391_p3  ;;  %p7281_p1 = scmp.lt.u32.totalorder %s7273_s22, %s8246_s9 }
 0x1bd   : > { %p7280_p8 = por %p7279_p13, %p7278_p7 }
 0x1be   : > { %p7276_p12 = pneg %p7275_p6 }
 0x1bf   : > { %p7282_p9 = por %p7281_p1, %p7280_p8 }
 0x1c1   : > { %p7283_p10 = pnand %p7282_p9, %p7276_p12 }
 0x1c3   : > { %7286 = shalt.err (!%p7283_p10)
}
 0x1c4   : > { %s7287_s15 = scalar_lea.vmem %s868_s8, 16  ;;  %s7628_s10 = smov [#allocation10]  }
 0x1c5   : > { %p7288_p5 = scmp.ne.s32.totalorder %s868_s8, %s7287_s15  ;;  %s7291_s25 = sshll.u32 %s7628_s10, 4  ;;  %s7292_s25 = int_to_ptr.vmem [resolvable:$false] %s7291_s25 }
 0x1c6   : > { %s7293_s29 = scalar_lea.vmem %s7292_s25, 32  ;;  %p7294_p0 = scmp.lt.s32.totalorder %s868_s8, %s7292_s25 }
 0x1c7   : > { %p7289_p2 = pnand %p7288_p5, %p9391_p3  ;;  %p7295_p4 = scmp.lt.s32.totalorder %s7293_s29, %s7287_s15 }
 0x1c9   : > { %p7290_p11 = pneg %p7289_p2  ;;  %p7296_p6 = por %p7295_p4, %p7294_p0 }
 0x1cb   : > { %p7297_p7 = pnand %p7296_p6, %p7290_p11 }
 0x1cd   : > { %7300 = shalt.err (!%p7297_p7)
}
 0x1ce   : > { %s9411_s22 = scalar_lea.sflag [#allocation9], %s7934_s28  ;;  %s898_s2 = scalar_lea.vmem [#allocation13], %s7925_s1 }
 0x1cf   : > { %6344 = dma.hbm_to_vmem [thread:$0]  (%p9391_p3), %s8246_s9, 16, %s868_s8, %s9411_s22  }
 0x1d0   : > { %s905_s14 = sshll.u32 %s898_s2, 4  ;;  %s8279_s13 = scalar_lea.hbm %s9289_s11, %s7964_s26  ;;  %s906_s14 = int_to_ptr.vmem [resolvable:$true] %s905_s14 }
 0x1d1   : > { %s7301_s0 = scalar_lea.hbm %s8253_s20, 16  ;;  %s7305_s10 = scalar_lea.hbm %s9410_s18, 32 }
 0x1d2   : > { %p7302_p12 = scmp.ne.s32.totalorder %s8253_s20, %s7301_s0  ;;  %p7306_p1 = scmp.lt.u32.totalorder %s8253_s20, %s9410_s18 }
 0x1d3   : > { %p7307_p9 = scmp.lt.u32.totalorder %s7305_s10, %s7301_s0  ;;  %p7309_p5 = scmp.lt.u32.totalorder %s7301_s0, %s8253_s20 }
 0x1d4   : > { %p7303_p13 = pnand %p7302_p12, %p9391_p3 }
 0x1d5   : > { %p7308_p10 = por %p7307_p9, %p7306_p1 }
 0x1d6   : > { %p7304_p8 = pneg %p7303_p13 }
 0x1d7   : > { %p7310_p2 = por %p7309_p5, %p7308_p10 }
 0x1d9   : > { %p7311_p11 = pnand %p7310_p2, %p7304_p8 }
 0x1db   : > { %7314 = shalt.err (!%p7311_p11)
}
 0x1dc   : > { %s7315_s9 = scalar_lea.vmem %s906_s14, 16  ;;  %s7629_s8 = smov [#allocation13]  }
 0x1dd   : > { %p7316_p0 = scmp.ne.s32.totalorder %s906_s14, %s7315_s9  ;;  %s7319_s22 = sshll.u32 %s7629_s8, 4  ;;  %s7320_s22 = int_to_ptr.vmem [resolvable:$false] %s7319_s22 }
 0x1de   : > { %s7321_s2 = scalar_lea.vmem %s7320_s22, 32  ;;  %p7322_p7 = scmp.lt.s32.totalorder %s906_s14, %s7320_s22 }
 0x1df   : > { %p7317_p4 = pnand %p7316_p0, %p9391_p3  ;;  %p7323_p12 = scmp.lt.s32.totalorder %s7321_s2, %s7315_s9 }
 0x1e1   : > { %p7318_p6 = pneg %p7317_p4  ;;  %p7324_p13 = por %p7323_p12, %p7322_p7 }
 0x1e3   : > { %p7325_p1 = pnand %p7324_p13, %p7318_p6 }
 0x1e5   : > { %7328 = shalt.err (!%p7325_p1)
}
 0x1e6   : > { %s9412_s16 = scalar_lea.sflag [#allocation12], %s7934_s28  ;;  %s940_s6 = scalar_lea.vmem [#allocation16], %s7925_s1 }
 0x1e7   : > { %6346 = dma.hbm_to_vmem [thread:$0]  (%p9391_p3), %s8253_s20, 16, %s906_s14, %s9412_s16  }
 0x1e8   : > { %s947_s0 = sshll.u32 %s940_s6, 4  ;;  %s7329_s27 = scalar_lea.hbm %s8279_s13, 16  ;;  %s948_s0 = int_to_ptr.vmem [resolvable:$true] %s947_s0 }
 0x1e9   : > { %p7330_p8 = scmp.ne.s32.totalorder %s8279_s13, %s7329_s27  ;;  %s7333_s25 = scalar_lea.hbm %s9289_s11, 32 }
 0x1ea   : > { %p7334_p5 = scmp.lt.u32.totalorder %s8279_s13, %s9289_s11  ;;  %p7335_p2 = scmp.lt.u32.totalorder %s7333_s25, %s7329_s27 }
 0x1eb   : > { %p7331_p9 = pnand %p7330_p8, %p9391_p3  ;;  %p7337_p0 = scmp.lt.u32.totalorder %s7329_s27, %s8279_s13 }
 0x1ec   : > { %p7336_p11 = por %p7335_p2, %p7334_p5 }
 0x1ed   : > { %p7332_p10 = pneg %p7331_p9 }
 0x1ee   : > { %p7338_p4 = por %p7337_p0, %p7336_p11 }
 0x1f0   : > { %p7339_p6 = pnand %p7338_p4, %p7332_p10 }
 0x1f2   : > { %7342 = shalt.err (!%p7339_p6)
}
 0x1f3   : > { %s7343_s20 = scalar_lea.vmem %s948_s0, 16  ;;  %s7630_s14 = smov [#allocation16]  }
 0x1f4   : > { %p7344_p7 = scmp.ne.s32.totalorder %s948_s0, %s7343_s20  ;;  %s7347_s8 = sshll.u32 %s7630_s14, 4  ;;  %s7348_s8 = int_to_ptr.vmem [resolvable:$false] %s7347_s8 }
 0x1f5   : > { %s7349_s22 = scalar_lea.vmem %s7348_s8, 32  ;;  %p7350_p1 = scmp.lt.s32.totalorder %s948_s0, %s7348_s8 }
 0x1f6   : > { %p7345_p12 = pnand %p7344_p7, %p9391_p3  ;;  %p7351_p8 = scmp.lt.s32.totalorder %s7349_s22, %s7343_s20 }
 0x1f8   : > { %p7346_p13 = pneg %p7345_p12  ;;  %p7352_p9 = por %p7351_p8, %p7350_p1 }
 0x1fa   : > { %p7353_p2 = pnand %p7352_p9, %p7346_p13 }
 0x1fc   : > { %7356 = shalt.err (!%p7353_p2)
}
 0x1fd   : > { %s9413_s2 = scalar_lea.sflag [#allocation15], %s7934_s28  ;;  %s8324_s27 = scalar_lea.hbm %s9290_s12, %s7964_s26 }
 0x1fe   : > { %6348 = dma.hbm_to_vmem [thread:$0]  (%p9391_p3), %s8279_s13, 16, %s948_s0, %s9413_s2  }
 0x1ff   : > { %s957_s15 = scalar_lea.vmem [#allocation17], %s7925_s1  ;;  %s955_s25 = scalar_lea.sflag [#allocation18], %s7934_s28 }
 0x200   : > { %s964_s10 = sshll.u32 %s957_s15, 4  ;;  %s7357_s29 = scalar_lea.hbm %s8324_s27, 16  ;;  %s965_s10 = int_to_ptr.vmem [resolvable:$true] %s964_s10 }
 0x201   : > { %p7358_p10 = scmp.ne.s32.totalorder %s8324_s27, %s7357_s29  ;;  %s7361_s0 = scalar_lea.hbm %s9290_s12, 32 }
 0x202   : > { %p7362_p0 = scmp.lt.u32.totalorder %s8324_s27, %s9290_s12  ;;  %p7363_p4 = scmp.lt.u32.totalorder %s7361_s0, %s7357_s29 }
 0x203   : > { %p7359_p5 = pnand %p7358_p10, %p9391_p3  ;;  %p7365_p7 = scmp.lt.u32.totalorder %s7357_s29, %s8324_s27 }
 0x204   : > { %p7364_p6 = por %p7363_p4, %p7362_p0 }
 0x205   : > { %p7360_p11 = pneg %p7359_p5 }
 0x206   : > { %p7366_p12 = por %p7365_p7, %p7364_p6 }
 0x208   : > { %p7367_p13 = pnand %p7366_p12, %p7360_p11 }
 0x20a   : > { %7370 = shalt.err (!%p7367_p13)
}
 0x20b   : > { %s7371_s8 = scalar_lea.vmem %s965_s10, 16  ;;  %s7631_s22 = smov [#allocation17]  }
 0x20c   : > { %p7372_p1 = scmp.ne.s32.totalorder %s965_s10, %s7371_s8  ;;  %s7375_s2 = sshll.u32 %s7631_s22, 4  ;;  %s7376_s2 = int_to_ptr.vmem [resolvable:$false] %s7375_s2 }
 0x20d   : > { %s7377_s16 = scalar_lea.vmem %s7376_s2, 32  ;;  %p7378_p2 = scmp.lt.s32.totalorder %s965_s10, %s7376_s2 }
 0x20e   : > { %p7373_p8 = pnand %p7372_p1, %p9391_p3  ;;  %p7379_p10 = scmp.lt.s32.totalorder %s7377_s16, %s7371_s8 }
 0x210   : > { %p7374_p9 = pneg %p7373_p8  ;;  %p7380_p5 = por %p7379_p10, %p7378_p2 }
 0x212   : > { %p7381_p0 = pnand %p7380_p5, %p7374_p9 }
 0x214   : > { %7384 = shalt.err (!%p7381_p0)
}
 0x215   : > { %6349 = dma.hbm_to_vmem [thread:$0]  (%p9391_p3), %s8324_s27, 16, %s965_s10, %s955_s25  }
 0x216   : > { %s8349_s29 = scalar_lea.hbm %s9295_s17, %s7928_s3  ;;  %s996_s9 = scalar_lea.vmem [#allocation25], %s7931_s7 }
 0x217   : > { %s1004_s13 = sshll.u32 %s996_s9, 4  ;;  %s5626_s0 = sshll.u32 %s7925_s1, 11  ;;  %s1005_s13 = int_to_ptr.vmem [resolvable:$true] %s1004_s13 }
 0x218   : > { %s7385_s20 = scalar_lea.hbm %s8349_s29, 128  ;;  %s7389_s10 = scalar_lea.hbm %s9295_s17, 256 }
 0x219   : > { %p7386_p11 = scmp.ne.s32.totalorder %s8349_s29, %s7385_s20  ;;  %p7390_p7 = scmp.lt.u32.totalorder %s8349_s29, %s9295_s17 }
 0x21a   : > { %p7391_p12 = scmp.lt.u32.totalorder %s7389_s10, %s7385_s20  ;;  %p7393_p1 = scmp.lt.u32.totalorder %s7385_s20, %s8349_s29 }
 0x21b   : > { %p7387_p4 = pnand %p7386_p11, %p9391_p3 }
 0x21c   : > { %p7392_p13 = por %p7391_p12, %p7390_p7 }
 0x21d   : > { %p7388_p6 = pneg %p7387_p4 }
 0x21e   : > { %p7394_p8 = por %p7393_p1, %p7392_p13 }
 0x220   : > { %p7395_p9 = pnand %p7394_p8, %p7388_p6 }
 0x222   : > { %7398 = shalt.err (!%p7395_p9)
}
 0x223   : > { %s7399_s7 = scalar_lea.vmem %s1005_s13, 128  ;;  %s7632_s8 = smov [#allocation25]  }
 0x224   : > { %p7400_p2 = scmp.ne.s32.totalorder %s1005_s13, %s7399_s7  ;;  %s7403_s22 = sshll.u32 %s7632_s8, 4  ;;  %s7404_s22 = int_to_ptr.vmem [resolvable:$false] %s7403_s22 }
 0x225   : > { %s7405_s2 = scalar_lea.vmem %s7404_s22, 256  ;;  %p7406_p0 = scmp.lt.s32.totalorder %s1005_s13, %s7404_s22 }
 0x226   : > { %p7401_p10 = pnand %p7400_p2, %p9391_p3  ;;  %p7407_p11 = scmp.lt.s32.totalorder %s7405_s2, %s7399_s7 }
 0x228   : > { %p7402_p5 = pneg %p7401_p10  ;;  %p7408_p4 = por %p7407_p11, %p7406_p0 }
 0x22a   : > { %p7409_p7 = pnand %p7408_p4, %p7402_p5 }
 0x22c   : > { %7412 = shalt.err (!%p7409_p7)
}
 0x22d   : > { %s9414_s16 = scalar_lea.sflag [#allocation24], %s7934_s28  ;;  %s5981_s6 = sshll.u32 %s7607_s30, 15 }
 0x22e   : > { %6351 = dma.hbm_to_vmem [thread:$0]  (%p9391_p3), %s8349_s29, 128, %s1005_s13, %s9414_s16  }
 0x22f   : > { %s8376_s20 = scalar_lea.hbm %s9297_s19, %s5981_s6  ;;  %s1034_s14 = scalar_lea.vmem [#allocation28], %s5626_s0 }
 0x230   : > { %s1041_s27 = sshll.u32 %s1034_s14, 4  ;;  %s7413_s10 = scalar_lea.hbm %s8376_s20, 32768  ;;  %s8380_s27 = int_to_ptr.vmem [resolvable:$true] %s1041_s27 }
 0x231   : > { %p7414_p6 = scmp.ne.s32.totalorder %s8376_s20, %s7413_s10  ;;  %s7417_s25 = scalar_lea.hbm %s9297_s19, 65536 }
 0x232   : > { %p7418_p1 = scmp.lt.u32.totalorder %s8376_s20, %s9297_s19  ;;  %p7419_p8 = scmp.lt.u32.totalorder %s7417_s25, %s7413_s10 }
 0x233   : > { %p7415_p12 = pnand %p7414_p6, %p9391_p3  ;;  %p7421_p2 = scmp.lt.u32.totalorder %s7413_s10, %s8376_s20 }
 0x234   : > { %p7420_p9 = por %p7419_p8, %p7418_p1 }
 0x235   : > { %p7416_p13 = pneg %p7415_p12 }
 0x236   : > { %p7422_p10 = por %p7421_p2, %p7420_p9 }
 0x238   : > { %p7423_p5 = pnand %p7422_p10, %p7416_p13 }
 0x23a   : > { %7426 = shalt.err (!%p7423_p5)
}
 0x23b   : > { %s7427_s0 = scalar_lea.vmem %s8380_s27, 32768  ;;  %s7633_s8 = smov [#allocation28]  }
 0x23c   : > { %p7428_p0 = scmp.ne.s32.totalorder %s8380_s27, %s7427_s0  ;;  %s7431_s22 = sshll.u32 %s7633_s8, 4  ;;  %s7432_s22 = int_to_ptr.vmem [resolvable:$false] %s7431_s22 }
 0x23d   : > { %s7433_s2 = scalar_lea.vmem %s7432_s22, 65536  ;;  %p7434_p7 = scmp.lt.s32.totalorder %s8380_s27, %s7432_s22 }
 0x23e   : > { %p7429_p11 = pnand %p7428_p0, %p9391_p3  ;;  %p7435_p6 = scmp.lt.s32.totalorder %s7433_s2, %s7427_s0 }
 0x240   : > { %p7430_p4 = pneg %p7429_p11  ;;  %p7436_p12 = por %p7435_p6, %p7434_p7 }
 0x242   : > { %p7437_p1 = pnand %p7436_p12, %p7430_p4 }
 0x244   : > { %7440 = shalt.err (!%p7437_p1)
}
 0x245   : > { %s7634_s16 = smov 256   ;;  %s7635_s6 = smov 16  }
 0x246   : > { %s9415_s15 = scalar_lea.sflag [#allocation27], %s7934_s28  ;;  %s9416_s9 = sshll.u32 %s7607_s30, 6 }
 0x247   : > { %6353 = dma.hbm_to_vmem [thread:$0]  (%p9391_p3), %s8376_s20, 32768, %s8380_s27, %s9415_s15, %s7634_s16, %s7634_s16, %s7635_s6  }
 0x248   : > { %s8410_s29 = scalar_lea.hbm %s9299_s21, %s9416_s9  ;;  %s9417_s13 = sshll.u32 %s7925_s1, 2 }
 0x249   : > { %s1074_s25 = scalar_lea.vmem [#allocation31], %s9417_s13  ;;  %s7441_s7 = scalar_lea.hbm %s8410_s29, 64 }
 0x24a   : > { %s1082_s3 = sshll.u32 %s1074_s25, 4  ;;  %p7442_p13 = scmp.ne.s32.totalorder %s8410_s29, %s7441_s7  ;;  %s1083_s3 = int_to_ptr.vmem [resolvable:$true] %s1082_s3 }
 0x24b   : > { %s7445_s0 = scalar_lea.hbm %s9299_s21, 128  ;;  %p7446_p2 = scmp.lt.u32.totalorder %s8410_s29, %s9299_s21 }
 0x24c   : > { %p7443_p8 = pnand %p7442_p13, %p9391_p3  ;;  %p7447_p10 = scmp.lt.u32.totalorder %s7445_s0, %s7441_s7 }
 0x24d   : > { %p7449_p0 = scmp.lt.u32.totalorder %s7441_s7, %s8410_s29 }
 0x24e   : > { %p7444_p9 = pneg %p7443_p8  ;;  %p7448_p5 = por %p7447_p10, %p7446_p2 }
 0x250   : > { %p7450_p11 = por %p7449_p0, %p7448_p5 }
 0x252   : > { %p7451_p4 = pnand %p7450_p11, %p7444_p9 }
 0x254   : > { %7454 = shalt.err (!%p7451_p4)
}
 0x255   : > { %s7455_s2 = scalar_lea.vmem %s1083_s3, 64  ;;  %s7636_s16 = smov [#allocation31]  }
 0x256   : > { %p7456_p7 = scmp.ne.s32.totalorder %s1083_s3, %s7455_s2  ;;  %s7459_s6 = sshll.u32 %s7636_s16, 4  ;;  %s7460_s6 = int_to_ptr.vmem [resolvable:$false] %s7459_s6 }
 0x257   : > { %s7461_s15 = scalar_lea.vmem %s7460_s6, 128  ;;  %p7462_p1 = scmp.lt.s32.totalorder %s1083_s3, %s7460_s6 }
 0x258   : > { %p7457_p6 = pnand %p7456_p7, %p9391_p3  ;;  %p7463_p13 = scmp.lt.s32.totalorder %s7461_s15, %s7455_s2 }
 0x25a   : > { %p7458_p12 = pneg %p7457_p6  ;;  %p7464_p8 = por %p7463_p13, %p7462_p1 }
 0x25c   : > { %p7465_p2 = pnand %p7464_p8, %p7458_p12 }
 0x25e   : > { %7468 = shalt.err (!%p7465_p2)
}
 0x25f   : > { %s9418_s9 = scalar_lea.sflag [#allocation30], %s7934_s28  ;;  %s8437_s13 = scalar_lea.hbm %s9302_s24, %s7964_s26 }
 0x260   : > { %6355 = dma.hbm_to_vmem [thread:$0]  (%p9391_p3), %s8410_s29, 64, %s1083_s3, %s9418_s9  }
 0x261   : > { %s1117_s25 = scalar_lea.vmem [#allocation34], %s7925_s1  ;;  %s7469_s20 = scalar_lea.hbm %s8437_s13, 16 }
 0x262   : > { %s1124_s7 = sshll.u32 %s1117_s25, 4  ;;  %p7470_p9 = scmp.ne.s32.totalorder %s8437_s13, %s7469_s20  ;;  %s1125_s7 = int_to_ptr.vmem [resolvable:$true] %s1124_s7 }
 0x263   : > { %s7473_s29 = scalar_lea.hbm %s9302_s24, 32  ;;  %p7474_p0 = scmp.lt.u32.totalorder %s8437_s13, %s9302_s24 }
 0x264   : > { %p7471_p10 = pnand %p7470_p9, %p9391_p3  ;;  %p7475_p11 = scmp.lt.u32.totalorder %s7473_s29, %s7469_s20 }
 0x265   : > { %p7477_p7 = scmp.lt.u32.totalorder %s7469_s20, %s8437_s13 }
 0x266   : > { %p7472_p5 = pneg %p7471_p10  ;;  %p7476_p4 = por %p7475_p11, %p7474_p0 }
 0x268   : > { %p7478_p6 = por %p7477_p7, %p7476_p4 }
 0x26a   : > { %p7479_p12 = pnand %p7478_p6, %p7472_p5 }
 0x26c   : > { %7482 = shalt.err (!%p7479_p12)
}
 0x26d   : > { %s7483_s1 = scalar_lea.vmem %s1125_s7, 16  ;;  %s7637_s26 = smov [#allocation34]  }
 0x26e   : > { %p7484_p1 = scmp.ne.s32.totalorder %s1125_s7, %s7483_s1  ;;  %s7487_s22 = sshll.u32 %s7637_s26, 4  ;;  %s7488_s22 = int_to_ptr.vmem [resolvable:$false] %s7487_s22 }
 0x26f   : > { %s7489_s2 = scalar_lea.vmem %s7488_s22, 32  ;;  %p7490_p2 = scmp.lt.s32.totalorder %s1125_s7, %s7488_s22 }
 0x270   : > { %p7485_p13 = pnand %p7484_p1, %p9391_p3  ;;  %p7491_p9 = scmp.lt.s32.totalorder %s7489_s2, %s7483_s1 }
 0x272   : > { %p7486_p8 = pneg %p7485_p13  ;;  %p7492_p10 = por %p7491_p9, %p7490_p2 }
 0x274   : > { %p7493_p0 = pnand %p7492_p10, %p7486_p8 }
 0x276   : > { %7496 = shalt.err (!%p7493_p0)
}
 0x277   : > { %s9419_s16 = scalar_lea.sflag [#allocation33], %s7934_s28 }
 0x278   : > { %6357 = dma.hbm_to_vmem [thread:$0]  (%p9391_p3), %s8437_s13, 16, %s1125_s7, %s9419_s16  }
 0x279 PF: > { %s9420_s6 = sld [smem:[#allocation58_spill]] }
 0x27f   : > { %p9421_p5 = scmp.ne.s32.totalorder %s9420_s6, 0 }
 0x280   : > { %s9422_s15 = sld [smem:[#allocation50_spill]] (!%p9421_p5)  ;;  %s9423_s9 = sld [smem:[#allocation55_spill]] (!%p9421_p5) }
 0x281   : > { %1133 = sbr.rel (%p9421_p5) target bundleno = 3383 (0xd37), region = 120 }
 0x286   : > { %s8462_s14 = sand.u32 (!%p9421_p5), 1, %s9422_s15   ;;  %p9424_p11 = scmp.ne.s32.totalorder (!%p9421_p5), %s9423_s9, 0 }
 0x287   : > { %s8465_s10 = sshll.u32 (!%p9421_p5), %s8462_s14, 3  ;;  %s1136_s25 = scalar_lea.sflag (!%p9421_p5), [#allocation3], %s8462_s14 }
 0x288   : > { %s1139_s20 = scalar_lea.vmem [#allocation2], %s8465_s10 }
 0x289   : > { %7542 = dma.done.wait (%p9424_p11), %s1136_s25, 128  }
 0x28a   : > { %7544 = vsyncadd (%p9424_p11), %s1136_s25, 4294967168  ;;  %s9425_s4 = sld [smem:[#allocation52_spill]]  ;;  %s1148_s7 = scalar_lea.vmem [#allocation5], %s8465_s10 }
 0x290   : > { %s8474_s28 = sand.u32 1, %s9425_s4  }
 0x291   : > { %s1145_s13 = scalar_lea.sflag [#allocation6], %s8474_s28 }
 0x292   : > { %7546 = dma.done.wait (%p9424_p11), %s1145_s13, 384  }
 0x293   : > { %7548 = vsyncadd (%p9424_p11), %s1145_s13, 4294966912  ;;  %s5640_s27 = sshll.u32 %s8462_s14, 4  ;;  %s1163_s29 = scalar_lea.sflag [#allocation9], %s8474_s28 }
 0x294   : > { %s8483_s0 = scalar_lea.vmem [#allocation7], %s5640_s27  ;;  %s1165_s3 = scalar_lea.vmem [#allocation8], %s8462_s14 }
 0x295   : > { %7550 = dma.done.wait (%p9424_p11), %s1163_s29, 32  }
 0x296   : > { %7552 = vsyncadd (%p9424_p11), %s1163_s29, 4294967264  ;;  %s5641_s8 = sshll.u32 %s8462_s14, 6  ;;  %s1179_s26 = scalar_lea.sflag [#allocation12], %s8474_s28 }
 0x297   : > { %s8494_s22 = scalar_lea.vmem [#allocation11], %s5641_s8 }
 0x298   : > { %7554 = dma.done.wait (%p9424_p11), %s1179_s26, 1040  }
 0x299   : > { %7556 = vsyncadd (%p9424_p11), %s1179_s26, 4294966256  ;;  %s1196_s16 = scalar_lea.sflag [#allocation15], %s8474_s28 }
 0x29a   : > { %7558 = dma.done.wait (%p9424_p11), %s1196_s16, 32  }
 0x29b   : > { %7560 = vsyncadd (%p9424_p11), %s1196_s16, 4294967264  ;;  %s1212_s25 = scalar_lea.sflag [#allocation18], %s8474_s28 }
 0x29c   : > { %7562 = dma.done.wait (%p9424_p11), %s1212_s25, 16  }
 0x29d   : > { %7564 = vsyncadd (%p9424_p11), %s1212_s25, 4294967280  ;;  %p9426_p3 = scmp.eq.s32.totalorder %s9425_s4, 0 }
 0x29f   : > { %7566 = dma.done.wait (%p9426_p3), [#allocation18], 1024   ;;  %p9427_p4 = pmov %p9426_p3 }
 0x2a0   : > { %p9428_p7 = pmov %p9426_p3 }
 0x2a1   : > { %7568 = vsyncadd (%p9427_p4), [#allocation18], 4294966272 }
 0x2a2   : > { %7570 = dma.done.wait (%p9428_p7), [#allocation21], 2304   ;;  %p9429_p6 = pmov %p9426_p3 }
 0x2a3   : > { %s1232_s27 = scalar_lea.sflag [#allocation24], %s8474_s28  ;;  %s8523_s29 = scalar_lea.vmem [#allocation23], %s5641_s8 }
 0x2a4   : > { %7572 = vsyncadd (%p9429_p6), [#allocation21], 4294964992 }
 0x2a5   : > { %7574 = dma.done.wait (%p9424_p11), %s1232_s27, 1152  }
 0x2a6   : > { %7576 = vsyncadd (%p9424_p11), %s1232_s27, 4294966144  ;;  %s1250_s16 = scalar_lea.sflag [#allocation27], %s8474_s28 }
 0x2a7   : > { %7578 = dma.done.wait (%p9424_p11), %s1250_s16, 32896  }
 0x2a8   : > { %7580 = vsyncadd (%p9424_p11), %s1250_s16, 4294934400  ;;  %s5648_s8 = sshll.u32 %s8462_s14, 11  ;;  %s5649_s13 = sshll.u32 %s8462_s14, 2 }
 0x2a9   : > { %s8538_s15 = scalar_lea.vmem [#allocation28], %s5648_s8  ;;  %s1268_s27 = scalar_lea.sflag [#allocation30], %s8474_s28 }
 0x2aa   : > { %s8541_s6 = scalar_lea.vmem [#allocation29], %s5649_s13 }
 0x2ab   : > { %7582 = dma.done.wait (%p9424_p11), %s1268_s27, 128  }
 0x2ac   : > { %7584 = vsyncadd (%p9424_p11), %s1268_s27, 4294967168  ;;  %s8547_s16 = scalar_lea.vmem [#allocation31], %s5649_s13  ;;  %s1286_s25 = scalar_lea.sflag [#allocation33], %s8474_s28 }
 0x2ad   : > { %7586 = dma.done.wait (%p9424_p11), %s1286_s25, 32  }
 0x2ae   : > { %7588 = vsyncadd (%p9424_p11), %s1286_s25, 4294967264  ;;  %v7638_v0 = vmov 0.0|0.0   ;;  %vm7639_vm0 = vmmov 0   ;;  %v7640_v1 = vmov 0.0   ;;  %s9430_s8 = sld [smem:[#allocation61_spill]]  ;;  %v1462_v8 = vld [vmem:[%s1139_s20] sm:$0xff] }
 0x2af   : > { %6226 = vmatprep.subr.bf16.mxu0 %v7638_v0  ;;  %6101 = vmatprep.mubr.msk.f32.mxu0 %vm7639_vm0, %v7640_v1  ;;  %vm1469_vm1 = vcmask 261120   ;;  %v1543_v9 = vld [vmem:[%s8483_s0] sm:$0xff]  ;;  %v1544_v10 = vld [vmem:[%s8483_s0 + $0x8] sm:$0xff]  ;;  %s9431_s26 = sld [smem:[#allocation62_spill]]  ;;  %v7641_v13 = vmov 0   ;;  %vm1545_vm2 = vcmask 130048  }
 0x2b0   : > { %6232 = vmatprep.subr.bf16.mxu1 %v7638_v0  ;;  %6108 = vmatprep.mubr.msk.f32.mxu1 %vm7639_vm0, %v7640_v1  ;;  %v6233_v11 = vpack.c.bf16 %v1544_v10, %v1543_v9  ;;  %v1467_v14 = vld [vmem:[%s1148_s7] sm:$0xff]  ;;  %v1646_v23 = vld [vmem:[#allocation19 + $0x18] sm:$0xff]  ;;  %vm1625_vm3 = vcmask 523264   ;;  %vm1641_vm4 = vcmask 1040384   ;;  %s9432_s20 = scalar_lea.vmem [#allocation10], %s8462_s14  ;;  %p1450_p12 = scmp.lt.s32.totalorder %s9425_s4, 1 }
 0x2b1   : > { %6452 = vset.pattern.permute.xlu0 %v7641_v13  ;;  %v1468_v15 = vmul.f32 0.1, %v1467_v14  ;;  %v1643_v19 = vld [vmem:[#allocation19] sm:$0xff]  ;;  %v1644_v20 = vld [vmem:[#allocation19 + $0x8] sm:$0xff]  ;;  %v1645_v21 = vld [vmem:[#allocation19 + $0x10] sm:$0xff]  ;;  %v1731_v14 = vlaneseq  ;;  %s9433_s28 = sld [smem:[#allocation69_spill]] }
 0x2b2   : > { %6234 = vmatpush3.bf16.msra.mxu1 %v6233_v11  ;;  %v6236_v22 = vpack.c.bf16 %v1644_v20, %v1643_v19  ;;  %v6239_v24 = vpack.c.bf16 %v1646_v23, %v1645_v21  ;;  %v1647_v25 = vld [vmem:[#allocation19 + $0x20] sm:$0xff]  ;;  %v1648_v26 = vld [vmem:[#allocation19 + $0x28] sm:$0xff]  ;;  %v1649_v28 = vld [vmem:[#allocation19 + $0x30] sm:$0xff]  ;;  %s8659_s7 = scalar_select %p1450_p12, %s9425_s4, 1  ;;  %vm5061_vm5 = vcmask 64512  }
 0x2b3   : > { %6235 = vmatprep.subr.bf16.mxu1 %v7638_v0  ;;  %v6242_v27 = vpack.c.bf16 %v1648_v26, %v1647_v25  ;;  %v1650_v29 = vld [vmem:[#allocation19 + $0x38] sm:$0xff]  ;;  %v1761_v52 = vld [vmem:[%s8494_s22 + $0x8] sm:$0xff]  ;;  %v1762_v54 = vld [vmem:[%s8494_s22 + $0x10] sm:$0xff]  ;;  %s9434_s1 = sld [smem:[#allocation76_spill]]  ;;  %s9443_s27 = sld [smem:[#allocation77_spill]] }
 0x2b4   : > { %v1463_v2 = vld [vmem:[%s9430_s8] sm:$0xff]  ;;  %v1464_v3 = vld [vmem:[%s9430_s8 + $0x8] sm:$0xff]  ;;  %v1465_v4 = vld [vmem:[%s9430_s8 + $0x10] sm:$0xff]  ;;  %v6245_v30 = vpack.c.bf16 %v1650_v29, %v1649_v28  ;;  %s5984_s0 = sshll.u32 %s8659_s7, 7  ;;  %s5985_s9 = sshll.u32 %s8659_s7, 8 }
 0x2b5   : > { %v6227_v5 = vpack.c.bf16 %v1464_v3, %v1463_v2  ;;  %v1466_v6 = vld [vmem:[%s9430_s8 + $0x18] sm:$0xff]  ;;  %v1461_v12 = vld [vmem:[%s9431_s26] sm:$0xff]  ;;  %v1765_v58 = vld [vmem:[%s8494_s22 + $0x28] sm:$0xff]  ;;  %s9435_s26 = scalar_lea.vmem [#allocation13], %s8462_s14  ;;  %s9438_s7 = scalar_lea.vmem [#allocation17], %s8462_s14 }
 0x2b6   : > { %v6230_v7 = vpack.c.bf16 %v1466_v6, %v1465_v4  ;;  %1621 = vperm.xlu0 %6452, %v1461_v12   ;;  %v1760_v51 = vld [vmem:[%s8494_s22] sm:$0xff]  ;;  %v1763_v55 = vld [vmem:[%s8494_s22 + $0x18] sm:$0xff]  ;;  %v1766_v60 = vld [vmem:[%s8494_s22 + $0x30] sm:$0xff] }
 0x2b7   : > { %6228 = vmatpush3.bf16.msra.mxu0 %v6227_v5  ;;  %v6248_v53 = vpack.c.bf16 %v1761_v52, %v1760_v51  ;;  %v6251_v56 = vpack.c.bf16 %v1763_v55, %v1762_v54  ;;  %v1764_v57 = vld [vmem:[%s8494_s22 + $0x20] sm:$0xff]  ;;  %v1767_v61 = vld [vmem:[%s8494_s22 + $0x38] sm:$0xff]  ;;  %v1856_v63 = vld [vmem:[#allocation20] sm:$0xff]  ;;  %s8665_s13 = scalar_lea.vmem %s9433_s28, %s5984_s0  ;;  %s9439_s0 = scalar_lea.vmem [#allocation25], %s8465_s10 }
 0x2b8   : > { %6229 = vmatprep.subr.bf16.mxu0 %v7638_v0  ;;  %v6254_v59 = vpack.c.bf16 %v1765_v58, %v1764_v57  ;;  %v6257_v62 = vpack.c.bf16 %v1767_v61, %v1766_v60  ;;  %v1857_v2 = vld [vmem:[#allocation20 + $0x8] sm:$0xff]  ;;  %v1858_v3 = vld [vmem:[#allocation20 + $0x10] sm:$0xff]  ;;  %v1859_v5 = vld [vmem:[#allocation20 + $0x18] sm:$0xff]  ;;  %s5973_s22 = sshll.u32 %s9425_s4, 7  ;;  %s1449_s28 = scalar_lea.vmem [#allocation35], %s8465_s10 }
 0x2b9   : > { %v6260_v4 = vpack.c.bf16 %v1857_v2, %v1856_v63  ;;  %v6263_v6 = vpack.c.bf16 %v1859_v5, %v1858_v3  ;;  %v1862_v10 = vld [vmem:[#allocation20 + $0x30] sm:$0xff]  ;;  %v1863_v11 = vld [vmem:[#allocation20 + $0x38] sm:$0xff]  ;;  %s8693_s2 = scalar_lea.vmem %s9434_s1, %s5985_s9  ;;  %s9233_s1 = scalar_lea.hbm %s9443_s27, %s5973_s22 }
 0x2ba   : > { %v6269_v12 = vpack.c.bf16 %v1863_v11, %v1862_v10  ;;  %v1978_v5 = vld [vmem:[%s8665_s13] sm:$0xff]  ;;  %v1983_v11 = vld [vmem:[%s8665_s13 + $0x28] sm:$0xff] }
 0x2bb   : > { %6231 = vmatpush3.bf16.msra.mxu0 %v6230_v7  ;;  %v1860_v7 = vld [vmem:[#allocation20 + $0x20] sm:$0xff]  ;;  %v1982_v10 = vld [vmem:[%s8665_s13 + $0x20] sm:$0xff] }
 0x2bc   : > { %6247 = vmatprep.subr.bf16.mxu0 %v7638_v0 }
 0x2be   : > { %6102 = vmatmul.mubr.msk.f32.vlgmr.msra.gmra.mrb[0].mxu0 %vm1469_vm1, %v1462_v8  ;;  %v1861_v8 = vld [vmem:[#allocation20 + $0x28] sm:$0xff] }
 0x2bf   : > { %6146 = vmatprep.mubr.msk.f32.mxu0 %vm7639_vm0, %v7640_v1  ;;  %6249 = vmatpush3.bf16.msra.mxu0 %v6248_v53  ;;  %v6266_v9 = vpack.c.bf16 %v1861_v8, %v1860_v7  ;;  %v1980_v7 = vld [vmem:[%s8665_s13 + $0x10] sm:$0xff]  ;;  %v1981_v8 = vld [vmem:[%s8665_s13 + $0x18] sm:$0xff] }
 0x2c0   : > { %6250 = vmatprep.subr.bf16.mxu0 %v7638_v0 }
 0x2c3   : > { %6252 = vmatpush3.bf16.msra.mxu0 %v6251_v56 }
 0x2c4   : > { %6253 = vmatprep.subr.bf16.mxu0 %v7638_v0 }
 0x2c7   : > { %6255 = vmatpush3.bf16.msra.mxu0 %v6254_v59 }
 0x2c8   : > { %6256 = vmatprep.subr.bf16.mxu0 %v7638_v0 }
 0x2cb   : > { %6258 = vmatpush3.bf16.msra.mxu0 %v6257_v62 }
 0x2cc   : > { %6283 = vmatprep.subr.bf16.mxu0 %v7638_v0 }
 0x335   : > { %v8598_v31 = vpop.permute.xlu0 %1621 }
 0x391   : > { %v1539_v16 = vpop.f32.mrb[0].mxu0 }
 0x392   : > { %v8588_v17 = vadd.f32 %v1539_v16, %v1468_v15  ;;  %v6103_v18 = vpop.f32.mrb[1].mxu0  ;;  %v8627_v15 = vshrl.u32 %v1731_v14, 7  ;;  %v1984_v14 = vld [vmem:[%s8665_s13 + $0x30] sm:$0xff] }
 0x394   : > { %6109 = vmatmul.mubr.msk.f32.vlgmr.msra.gmra.mrb[0].mxu1 %vm1545_vm2, %v8588_v17  ;;  %v8630_v16 = vsub.s32 0, %v8627_v15  ;;  %v8635_v28 = vsub.s32 1, %v8627_v15 }
 0x395   : > { %6127 = vmatprep.mubr.msk.f32.mxu1 %vm7639_vm0, %v7640_v1  ;;  %6237 = vmatpush3.bf16.msra.mxu1 %v6236_v22 }
 0x396   : > { %6238 = vmatprep.subr.bf16.mxu1 %v7638_v0 }
 0x399   : > { %6240 = vmatpush3.bf16.msra.mxu1 %v6239_v24 }
 0x39a   : > { %6241 = vmatprep.subr.bf16.mxu1 %v7638_v0 }
 0x39d   : > { %6243 = vmatpush3.bf16.msra.mxu1 %v6242_v27 }
 0x39e   : > { %6244 = vmatprep.subr.bf16.mxu1 %v7638_v0 }
 0x3a1   : > { %6246 = vmatpush3.bf16.msra.mxu1 %v6245_v30 }
 0x3a2   : > { %6259 = vmatprep.subr.bf16.mxu1 %v7638_v0 }
 0x467   : > { %v8600_v32 = vpop.f32.mrb[0].mxu1 }
 0x468   : > { %v6110_v33 = vpop.f32.mrb[1].mxu1  ;;  %v1624_v34 = vmul.f32 %v8598_v31, %v8600_v32 }
 0x469   : > { %v5659_v33 = vld [vmem:[%s1165_s3] ss:$0 sm:$0xff]  ;;  %s9440_s3 = scalar_lea.vmem [#allocation26], %s8465_s10  ;;  %s7642_s10 = smov [#allocation35]  }
 0x46a   : > { %v1626_v35 = vsel %vm1625_vm3, %v1624_v34, 0.0  ;;  %v1633_v36 = vmul.f32 %v1624_v34, %v8600_v32  ;;  %s7501_s4 = sshll.u32 %s7642_s10, 4  ;;  %s7502_s4 = int_to_ptr.vmem [resolvable:$false] %s7501_s4 }
 0x46b   : > { %v1627_v37 = vrot.slane %v1626_v35, 4 }
 0x46c   : > { %v1634_v38 = vsel %vm1625_vm3, %v1633_v36, 0.0 }
 0x46d   : > { %v1628_v39 = vadd.f32 %v1627_v37, %v1626_v35  ;;  %v1635_v40 = vrot.slane %v1634_v38, 4  ;;  %v5660_v35 = vld [vmem:[%s9432_s20] ss:$0 sm:$0xff]  ;;  %s9436_s20 = scalar_lea.vmem [#allocation14], %s8462_s14 }
 0x46f   : > { %v1629_v41 = vrot.slane %v1628_v39, 2  ;;  %v1636_v42 = vadd.f32 %v1635_v40, %v1634_v38 }
 0x471   : > { %v1630_v43 = vadd.f32 %v1629_v41, %v1628_v39  ;;  %v1637_v44 = vrot.slane %v1636_v42, 2  ;;  %v1865_v39 = vld [vmem:[#allocation20 + $0x48] sm:$0xff]  ;;  %v1866_v41 = vld [vmem:[#allocation20 + $0x50] sm:$0xff] }
 0x473   : > { %v1631_v45 = vrot.slane %v1630_v43, 1  ;;  %v1638_v46 = vadd.f32 %v1637_v44, %v1636_v42  ;;  %v1867_v42 = vld [vmem:[#allocation20 + $0x58] sm:$0xff]  ;;  %v1868_v44 = vld [vmem:[#allocation20 + $0x60] sm:$0xff] }
 0x475   : > { %v1639_v47 = vrot.slane %v1638_v46, 1  ;;  %v1632_v48 = vadd.f32 %v1631_v45, %v1630_v43  ;;  %v6275_v43 = vpack.c.bf16 %v1867_v42, %v1866_v41  ;;  %v1869_v45 = vld [vmem:[#allocation20 + $0x68] sm:$0xff] }
 0x477   : > { %v1640_v49 = vadd.f32 %v1639_v47, %v1638_v46  ;;  %v6278_v46 = vpack.c.bf16 %v1869_v45, %v1868_v44  ;;  %v1870_v47 = vld [vmem:[#allocation20 + $0x70] sm:$0xff] }
 0x479   : > { %v1642_v50 = vsel %vm1641_vm4, %v1632_v48, %v1640_v49  ;;  %v1871_v48 = vld [vmem:[#allocation20 + $0x78] sm:$0xff] }
 0x47a   : > { %6128 = vmatmul.mubr.msk.f32.vlgmr.msra.gmra.mrb[2].mxu1 %vm1625_vm3, %v1642_v50  ;;  %v6281_v49 = vpack.c.bf16 %v1871_v48, %v1870_v47  ;;  %v5663_v47 = vld [vmem:[%s9436_s20] ss:$0 sm:$0xff]  ;;  %s7503_s20 = scalar_lea.vmem %s7502_s4, 256 }
 0x47b   : > { %6181 = vmatprep.mubr.msk.f32.mxu1 %vm7639_vm0, %v7640_v1  ;;  %6261 = vmatpush3.bf16.msra.mxu1 %v6260_v4 }
 0x47c   : > { %6262 = vmatprep.subr.bf16.mxu1 %v7638_v0 }
 0x47f   : > { %6264 = vmatpush3.bf16.msra.mxu1 %v6263_v6 }
 0x480   : > { %6265 = vmatprep.subr.bf16.mxu1 %v7638_v0 }
 0x483   : > { %6267 = vmatpush3.bf16.msra.mxu1 %v6266_v9  ;;  %v6287_v9 = vpack.c.bf16 %v1981_v8, %v1980_v7 }
 0x484   : > { %6268 = vmatprep.subr.bf16.mxu1 %v7638_v0 }
 0x487   : > { %6270 = vmatpush3.bf16.msra.mxu1 %v6269_v12  ;;  %v6290_v12 = vpack.c.bf16 %v1983_v11, %v1982_v10  ;;  %v2193_v10 = vld [vmem:[%s8523_s29] sm:$0xff] }
 0x488   : > { %6271 = vmatprep.subr.bf16.mxu1 %v7638_v0  ;;  %v2197_v11 = vld [vmem:[%s8523_s29 + $0x20] sm:$0xff] }
 0x54d   : > { %v1720_v18 = vpop.f32.mrb[2].mxu1 }
 0x54e   : > { %v1724_v19 = vmul.f32 0.25, %v1720_v18  ;;  %v6129_v20 = vpop.f32.mrb[3].mxu1  ;;  %v1985_v18 = vld [vmem:[%s8665_s13 + $0x38] sm:$0xff] }
 0x54f   : > { %v1986_v20 = vld [vmem:[%s8665_s13 + $0x40] sm:$0xff] }
 0x550   : > { %v1725_v21 = vmul.f32 %v1724_v19, %v1724_v19  ;;  %v1734_v22 = vrot.slane %v1724_v19, %v8630_v16 }
 0x552   : > { %v1727_v23 = vrot.slane %v1725_v21, 7  ;;  %v1735_v24 = vsub.f32 %v8600_v32, %v1734_v22  ;;  %v1864_v32 = vld [vmem:[#allocation20 + $0x40] sm:$0xff] }
 0x553   : > { %v6272_v40 = vpack.c.bf16 %v1865_v39, %v1864_v32  ;;  %v1987_v21 = vld [vmem:[%s8665_s13 + $0x48] sm:$0xff] }
 0x554   : > { %v1729_v25 = vsub.f32 %v1724_v19, %v1727_v23  ;;  %v6293_v19 = vpack.c.bf16 %v1985_v18, %v1984_v14  ;;  %v6296_v22 = vpack.c.bf16 %v1987_v21, %v1986_v20  ;;  %v1988_v23 = vld [vmem:[%s8665_s13 + $0x50] sm:$0xff]  ;;  %v5667_v14 = vcombine.low %v2193_v10, %v2197_v11 }
 0x555   : > { %6273 = vmatpush3.bf16.msra.mxu1 %v6272_v40  ;;  %v5668_v18 = vcombine.high %v2193_v10, %v2197_v11  ;;  %v6494_v10 = vld [vmem:[%s8538_s15 + $0xcc] ss:$16 sps:$4 sm:$0xff]   ;;  %v6489_v11 = vld [vmem:[%s8538_s15 + $0xc0] ss:$16 sps:$4 sm:$0xff]  }
 0x556   : > { %v1730_v26 = vmax.f32 %v1729_v25, 0.0  ;;  %6274 = vmatprep.subr.bf16.mxu1 %v7638_v0 }
 0x558   : > { %v1736_v27 = vadd.f32 1e-05, %v1730_v26  ;;  %v1990_v26 = vld [vmem:[%s8665_s13 + $0x60] sm:$0xff] }
 0x559   : > { %6276 = vmatpush3.bf16.msra.mxu1 %v6275_v43 }
 0x55a   : > { %6869 = vrsqrt.f32 %v1736_v27  ;;  %6277 = vmatprep.subr.bf16.mxu1 %v7638_v0  ;;  %v1991_v27 = vld [vmem:[%s8665_s13 + $0x68] sm:$0xff] }
 0x55d   : > { %6279 = vmatpush3.bf16.msra.mxu1 %v6278_v46 }
 0x55e   : > { %6280 = vmatprep.subr.bf16.mxu1 %v7638_v0 }
 0x561   : > { %6282 = vmatpush3.bf16.msra.mxu1 %v6281_v49 }
 0x562   : > { %6307 = vmatprep.subr.bf16.mxu1 %v7638_v0 }
 0x564   : > { %v6870_v29 = vpop.eup %6869 }
 0x565   : > { %v1741_v30 = vrot.slane %v6870_v29, %v8635_v28  ;;  %v6302_v29 = vpack.c.bf16 %v1991_v27, %v1990_v26  ;;  %v2200_v27 = vld [vmem:[%s8523_s29 + $0x38] sm:$0xff] }
 0x567   : > { %v1742_v34 = vmul.f32 %v1741_v30, %v1735_v24  ;;  %v1989_v24 = vld [vmem:[%s8665_s13 + $0x58] sm:$0xff]  ;;  %v1992_v30 = vld [vmem:[%s8665_s13 + $0x70] sm:$0xff] }
 0x568   : > { %v6299_v25 = vpack.c.bf16 %v1989_v24, %v1988_v23  ;;  %v2199_v23 = vld [vmem:[%s8523_s29 + $0x30] sm:$0xff]  ;;  %v2196_v24 = vld [vmem:[%s8523_s29 + $0x18] sm:$0xff] }
 0x569   : > { %v1750_v36 = vmul.f32 %v5659_v33, %v1742_v34  ;;  %v1993_v33 = vld [vmem:[%s8665_s13 + $0x78] sm:$0xff] }
 0x56a   : > { %v6305_v34 = vpack.c.bf16 %v1993_v33, %v1992_v30  ;;  %v5674_v30 = vcombine.high %v2196_v24, %v2200_v27 }
 0x56b   : > { %v1758_v37 = vadd.f32 %v5660_v35, %v1750_v36 }
 0x56d   : > { %v1759_v38 = vmax.f32 %v1758_v37, 0.0 }
 0x56f   : > { %6147 = vmatmul.mubr.msk.f32.vlgmr.msra.gmra.mrb[2].mxu0 %vm1625_vm3, %v1759_v38 }
 0x570   : > { %6216 = vmatprep.mubr.msk.f32.mxu0 %vm7639_vm0, %v7640_v1 }
 0x642   : > { %v8649_v50 = vpop.f32.mrb[2].mxu0 }
 0x643   : > { %v1841_v51 = vmul.f32 %v8649_v50, %v8598_v31  ;;  %v6148_v52 = vpop.f32.mrb[3].mxu0 }
 0x644   : > { %v2081_v52 = vld [vmem:[#allocation22] sm:$0xff] }
 0x645   : > { %v1842_v53 = vrot.slane %v1841_v51, 4  ;;  %v1848_v54 = vmul.f32 %v1841_v51, %v8649_v50 }
 0x647   : > { %v1843_v55 = vadd.f32 %v1842_v53, %v1841_v51  ;;  %v1849_v56 = vrot.slane %v1848_v54, 4 }
 0x649   : > { %v1844_v57 = vrot.slane %v1843_v55, 2  ;;  %v1850_v58 = vadd.f32 %v1849_v56, %v1848_v54 }
 0x64b   : > { %v1851_v59 = vrot.slane %v1850_v58, 2  ;;  %v1845_v60 = vadd.f32 %v1844_v57, %v1843_v55 }
 0x64d   : > { %v1852_v61 = vadd.f32 %v1851_v59, %v1850_v58  ;;  %v1846_v62 = vrot.slane %v1845_v60, 1 }
 0x64f   : > { %v1853_v63 = vrot.slane %v1852_v61, 1  ;;  %v1847_v2 = vadd.f32 %v1846_v62, %v1845_v60 }
 0x651   : > { %v1854_v3 = vadd.f32 %v1853_v63, %v1852_v61 }
 0x653   : > { %v1855_v4 = vsel %vm1641_vm4, %v1847_v2, %v1854_v3 }
 0x654   : > { %6182 = vmatmul.mubr.f32.vlgmr.msra.gmra.mrb[4].mxu1 %v1855_v4 }
 0x655   : > { %6223 = vmatprep.mubr.msk.f32.mxu1 %vm7639_vm0, %v7640_v1  ;;  %v1979_v1 = vld [vmem:[%s8665_s13 + $0x8] sm:$0xff]  ;;  %s5130_s13 = sshll.u32 %s1449_s28, 4  ;;  %s9235_s13 = int_to_ptr.vmem [resolvable:$true] %s5130_s13 }
 0x656   : > { %v6284_v6 = vpack.c.bf16 %v1979_v1, %v1978_v5  ;;  %p7504_p9 = scmp.lt.s32.totalorder %s9235_s13, %s7502_s4 }
 0x658   : > { %6285 = vmatpush3.bf16.msra.mxu0 %v6284_v6 }
 0x659   : > { %6286 = vmatprep.subr.bf16.mxu0 %v7638_v0 }
 0x65c   : > { %6288 = vmatpush3.bf16.msra.mxu0 %v6287_v9 }
 0x65d   : > { %6289 = vmatprep.subr.bf16.mxu0 %v7638_v0 }
 0x660   : > { %6291 = vmatpush3.bf16.msra.mxu0 %v6290_v12  ;;  %v2194_v12 = vld [vmem:[%s8523_s29 + $0x8] sm:$0xff] }
 0x661   : > { %6292 = vmatprep.subr.bf16.mxu0 %v7638_v0 }
 0x664   : > { %6294 = vmatpush3.bf16.msra.mxu0 %v6293_v19  ;;  %v2198_v19 = vld [vmem:[%s8523_s29 + $0x28] sm:$0xff] }
 0x665   : > { %6295 = vmatprep.subr.bf16.mxu0 %v7638_v0  ;;  %v5669_v20 = vcombine.low %v2194_v12, %v2198_v19  ;;  %v5670_v21 = vcombine.high %v2194_v12, %v2198_v19  ;;  %v6492_v12 = vld [vmem:[%s8538_s15 + $0xc8] ss:$16 sps:$4 sm:$0xff]   ;;  %v6495_v19 = vld [vmem:[%s8538_s15 + $0xe0] ss:$16 sps:$4 sm:$0xff]  }
 0x668   : > { %6297 = vmatpush3.bf16.msra.mxu0 %v6296_v22  ;;  %v2195_v22 = vld [vmem:[%s8523_s29 + $0x10] sm:$0xff]  ;;  %s9437_s29 = scalar_lea.vmem [#allocation16], %s8462_s14 }
 0x669   : > { %6298 = vmatprep.subr.bf16.mxu0 %v7638_v0  ;;  %v5672_v26 = vcombine.high %v2195_v22, %v2199_v23 }
 0x66c   : > { %6300 = vmatpush3.bf16.msra.mxu0 %v6299_v25  ;;  %v5671_v25 = vcombine.low %v2195_v22, %v2199_v23  ;;  %v6506_v22 = vld [vmem:[%s8538_s15 + $0x10c] ss:$16 sps:$4 sm:$0xff]   ;;  %v6501_v23 = vld [vmem:[%s8538_s15 + $0x100] ss:$16 sps:$4 sm:$0xff]  }
 0x66d   : > { %6301 = vmatprep.subr.bf16.mxu0 %v7638_v0 }
 0x670   : > { %6303 = vmatpush3.bf16.msra.mxu0 %v6302_v29  ;;  %v5673_v29 = vcombine.low %v2196_v24, %v2200_v27  ;;  %v6504_v24 = vld [vmem:[%s8538_s15 + $0x108] ss:$16 sps:$4 sm:$0xff]   ;;  %v6507_v27 = vld [vmem:[%s8538_s15 + $0x120] ss:$16 sps:$4 sm:$0xff]  }
 0x671   : > { %6304 = vmatprep.subr.bf16.mxu0 %v7638_v0  ;;  %v5662_v0 = vld [vmem:[%s9435_s26] ss:$0 sm:$0xff]  ;;  %s7497_s26 = scalar_lea.vmem %s9235_s13, 128 }
 0x672   : > { %p7498_p1 = scmp.ne.s32.totalorder %s9235_s13, %s7497_s26  ;;  %p7505_p10 = scmp.lt.s32.totalorder %s7503_s20, %s7497_s26 }
 0x674   : > { %6306 = vmatpush3.bf16.msra.mxu0 %v6305_v34  ;;  %p7506_p0 = por %p7505_p10, %p7504_p9 }
 0x675   : > { %2244 = vmatprep.subr.bf16.mxu0 %v5668_v18  ;;  %v6500_v18 = vld [vmem:[%s8538_s15 + $0xec] ss:$16 sps:$4 sm:$0xff]  }
 0x727   : > { %v1938_v35 = vpop.f32.mrb[4].mxu1 }
 0x728   : > { %v1942_v36 = vmul.f32 0.25, %v1938_v35  ;;  %v6183_v37 = vpop.f32.mrb[5].mxu1 }
 0x72a   : > { %v1943_v38 = vmul.f32 %v1942_v36, %v1942_v36  ;;  %v1952_v32 = vrot.slane %v1942_v36, %v8630_v16 }
 0x72c   : > { %v1945_v39 = vrot.slane %v1943_v38, 7  ;;  %v1953_v40 = vsub.f32 %v8649_v50, %v1952_v32  ;;  %v2082_v50 = vld [vmem:[#allocation22 + $0x8] sm:$0xff] }
 0x72d   : > { %v6308_v53 = vpack.c.bf16 %v2082_v50, %v2081_v52  ;;  %v6458_v52 = vld [vmem:[%s8538_s15 + $0xc] ss:$16 sps:$4 sm:$0xff]   ;;  %v6456_v50 = vld [vmem:[%s8538_s15 + $0x8] ss:$16 sps:$4 sm:$0xff]  }
 0x72e   : > { %v1947_v41 = vsub.f32 %v1942_v36, %v1945_v39 }
 0x72f   : > { %6309 = vmatpush3.bf16.msra.mxu1 %v6308_v53  ;;  %v6461_v53 = vld [vmem:[%s8538_s15 + $0x24] ss:$16 sps:$4 sm:$0xff]  }
 0x730   : > { %v1948_v42 = vmax.f32 %v1947_v41, 0.0  ;;  %2285 = vmatprep.subr.bf16.mxu1 %v5670_v21  ;;  %v6503_v21 = vld [vmem:[%s8538_s15 + $0x104] ss:$16 sps:$4 sm:$0xff]  }
 0x732   : > { %v1954_v43 = vadd.f32 1e-05, %v1948_v42 }
 0x734   : > { %6871 = vrsqrt.f32 %v1954_v43 }
 0x73e   : > { %v6872_v44 = vpop.eup %6871 }
 0x73f   : > { %v1959_v45 = vrot.slane %v6872_v44, %v8635_v28  ;;  %v5665_v44 = vld [vmem:[%s9437_s29] ss:$0 sm:$0xff] }
 0x741   : > { %v1960_v46 = vmul.f32 %v1959_v45, %v1953_v40 }
 0x743   : > { %v1968_v48 = vmul.f32 %v5662_v0, %v1960_v46  ;;  %v5666_v0 = vld [vmem:[%s9438_s7] ss:$0 sm:$0xff] }
 0x745   : > { %v1976_v49 = vadd.f32 %v5663_v47, %v1968_v48 }
 0x747   : > { %v1977_v51 = vmax.f32 %v1976_v49, 0.0 }
 0x749   : > { %6217 = vmatmul.mubr.f32.vlgmr.msra.gmra.mrb[4].mxu0 %v1977_v51  ;;  %v6455_v51 = vld [vmem:[%s8538_s15 + $0x4] ss:$16 sps:$4 sm:$0xff]  }
 0x74a   : > { %2276 = vmatprep.mubr.bf16.mxu0 %v7641_v13  ;;  %2245 = vmatpush1.bf16.msra.mxu0 %v5667_v14  ;;  %v6497_v14 = vld [vmem:[%s8538_s15 + $0xe4] ss:$16 sps:$4 sm:$0xff]  }
 0x74b   : > { %2326 = vmatprep.subr.bf16.mxu0 %v5672_v26  ;;  %v6512_v26 = vld [vmem:[%s8538_s15 + $0x12c] ss:$16 sps:$4 sm:$0xff]  }
 0x81c   : > { %v2060_v54 = vpop.f32.mrb[4].mxu0 }
 0x81d   : > { %v2064_v55 = vmul.f32 %v2060_v54, %v8598_v31  ;;  %v6218_v56 = vpop.f32.mrb[5].mxu0 }
 0x81e   : > { %v6467_v56 = vld [vmem:[%s8538_s15 + $0x44] ss:$16 sps:$4 sm:$0xff]  }
 0x81f   : > { %v2065_v57 = vsel %vm1545_vm2, %v2064_v55, 0.0  ;;  %v2072_v58 = vmul.f32 %v2064_v55, %v2060_v54  ;;  %v6459_v55 = vld [vmem:[%s8538_s15 + $0x20] ss:$16 sps:$4 sm:$0xff]  }
 0x820   : > { %v2066_v59 = vrot.slane %v2065_v57, 4 }
 0x821   : > { %v2073_v60 = vsel %vm1545_vm2, %v2072_v58, 0.0  ;;  %v6465_v58 = vld [vmem:[%s8538_s15 + $0x40] ss:$16 sps:$4 sm:$0xff]  }
 0x822   : > { %v2067_v61 = vadd.f32 %v2066_v59, %v2065_v57  ;;  %v2074_v62 = vrot.slane %v2073_v60, 4  ;;  %v6470_v57 = vld [vmem:[%s8538_s15 + $0x4c] ss:$16 sps:$4 sm:$0xff]   ;;  %v6468_v59 = vld [vmem:[%s8538_s15 + $0x48] ss:$16 sps:$4 sm:$0xff]  }
 0x824   : > { %v2068_v63 = vrot.slane %v2067_v61, 2  ;;  %v2075_v2 = vadd.f32 %v2074_v62, %v2073_v60  ;;  %v6473_v60 = vld [vmem:[%s8538_s15 + $0x64] ss:$16 sps:$4 sm:$0xff]   ;;  %v6471_v62 = vld [vmem:[%s8538_s15 + $0x60] ss:$16 sps:$4 sm:$0xff]  }
 0x826   : > { %v2069_v3 = vadd.f32 %v2068_v63, %v2067_v61  ;;  %v2076_v4 = vrot.slane %v2075_v2, 2  ;;  %v6476_v61 = vld [vmem:[%s8538_s15 + $0x6c] ss:$16 sps:$4 sm:$0xff]   ;;  %v6474_v63 = vld [vmem:[%s8538_s15 + $0x68] ss:$16 sps:$4 sm:$0xff]  }
 0x828   : > { %v2070_v5 = vrot.slane %v2069_v3, 1  ;;  %v2077_v1 = vadd.f32 %v2076_v4, %v2075_v2  ;;  %v6479_v2 = vld [vmem:[%s8538_s15 + $0x84] ss:$16 sps:$4 sm:$0xff]   ;;  %v6477_v4 = vld [vmem:[%s8538_s15 + $0x80] ss:$16 sps:$4 sm:$0xff]  }
 0x82a   : > { %v2078_v6 = vrot.slane %v2077_v1, 1  ;;  %v2071_v7 = vadd.f32 %v2070_v5, %v2069_v3  ;;  %v6482_v3 = vld [vmem:[%s8538_s15 + $0x8c] ss:$16 sps:$4 sm:$0xff]   ;;  %v6480_v5 = vld [vmem:[%s8538_s15 + $0x88] ss:$16 sps:$4 sm:$0xff]  }
 0x82c   : > { %v2079_v8 = vadd.f32 %v2078_v6, %v2077_v1  ;;  %v6485_v1 = vld [vmem:[%s8538_s15 + $0xa4] ss:$16 sps:$4 sm:$0xff]   ;;  %v6488_v6 = vld [vmem:[%s8538_s15 + $0xac] ss:$16 sps:$4 sm:$0xff]  }
 0x82e   : > { %v2080_v9 = vsel %vm1641_vm4, %v2071_v7, %v2079_v8  ;;  %v6483_v7 = vld [vmem:[%s8538_s15 + $0xa0] ss:$16 sps:$4 sm:$0xff]   ;;  %v6486_v8 = vld [vmem:[%s8538_s15 + $0xa8] ss:$16 sps:$4 sm:$0xff]  }
 0x82f   : > { %6224 = vmatmul.mubr.msk.f32.vlgmr.msra.gmra.mrb[6].mxu1 %vm1545_vm2, %v2080_v9  ;;  %v6491_v9 = vld [vmem:[%s8538_s15 + $0xc4] ss:$16 sps:$4 sm:$0xff]  }
 0x830   : > { %2317 = vmatprep.mubr.bf16.mxu1 %v7641_v13  ;;  %2286 = vmatpush1.bf16.msra.mxu1 %v5669_v20  ;;  %v6498_v20 = vld [vmem:[%s8538_s15 + $0xe8] ss:$16 sps:$4 sm:$0xff]  }
 0x831   : > { %2367 = vmatprep.subr.bf16.mxu1 %v5674_v30  ;;  %v6515_v30 = vld [vmem:[%s8538_s15 + $0x144] ss:$16 sps:$4 sm:$0xff]  }
 0x902   : > { %v2152_v33 = vpop.f32.mrb[6].mxu1 }
 0x903   : > { %v2156_v34 = vmul.f32 0.25, %v2152_v33  ;;  %v6225_v35 = vpop.f32.mrb[7].mxu1  ;;  %v6518_v33 = vld [vmem:[%s8538_s15 + $0x14c] ss:$16 sps:$4 sm:$0xff]  }
 0x904   : > { %v6516_v35 = vld [vmem:[%s8538_s15 + $0x148] ss:$16 sps:$4 sm:$0xff]  }
 0x905   : > { %v2157_v36 = vmul.f32 %v2156_v34, %v2156_v34  ;;  %v2166_v37 = vrot.slane %v2156_v34, %v8630_v16 }
 0x907   : > { %v2159_v38 = vrot.slane %v2157_v36, 7  ;;  %v2167_v32 = vsub.f32 %v2060_v54, %v2166_v37  ;;  %v6464_v54 = vld [vmem:[%s8538_s15 + $0x2c] ss:$16 sps:$4 sm:$0xff]   ;;  %v6521_v36 = vld [vmem:[%s8538_s15 + $0x164] ss:$16 sps:$4 sm:$0xff]  }
 0x908   : > { %v6524_v37 = vld [vmem:[%s8538_s15 + $0x16c] ss:$16 sps:$4 sm:$0xff]  }
 0x909   : > { %v2161_v39 = vsub.f32 %v2156_v34, %v2159_v38  ;;  %v6513_v34 = vld [vmem:[%s8538_s15 + $0x140] ss:$16 sps:$4 sm:$0xff]  }
 0x90a   : > { %v6519_v38 = vld [vmem:[%s8538_s15 + $0x160] ss:$16 sps:$4 sm:$0xff]  }
 0x90b   : > { %v2162_v40 = vmax.f32 %v2161_v39, 0.0  ;;  %v6527_v39 = vld [vmem:[%s8538_s15 + $0x184] ss:$16 sps:$4 sm:$0xff]  }
 0x90d   : > { %v2168_v41 = vadd.f32 1e-05, %v2162_v40  ;;  %v6530_v40 = vld [vmem:[%s8538_s15 + $0x18c] ss:$16 sps:$4 sm:$0xff]  }
 0x90f   : > { %6873 = vrsqrt.f32 %v2168_v41  ;;  %v6525_v41 = vld [vmem:[%s8538_s15 + $0x180] ss:$16 sps:$4 sm:$0xff]  }
 0x919   : > { %v6874_v42 = vpop.eup %6873 }
 0x91a   : > { %v2173_v43 = vrot.slane %v6874_v42, %v8635_v28  ;;  %v6528_v42 = vld [vmem:[%s8538_s15 + $0x188] ss:$16 sps:$4 sm:$0xff]  }
 0x91c   : > { %v2174_v45 = vmul.f32 %v2173_v43, %v2167_v32  ;;  %v6522_v32 = vld [vmem:[%s8538_s15 + $0x168] ss:$16 sps:$4 sm:$0xff]   ;;  %v6533_v43 = vld [vmem:[%s8538_s15 + $0x1a4] ss:$16 sps:$4 sm:$0xff]  }
 0x91e   : > { %v2182_v46 = vmul.f32 %v5665_v44, %v2174_v45  ;;  %v6536_v44 = vld [vmem:[%s8538_s15 + $0x1ac] ss:$16 sps:$4 sm:$0xff]   ;;  %v6531_v45 = vld [vmem:[%s8538_s15 + $0x1a0] ss:$16 sps:$4 sm:$0xff]  }
 0x920   : > { %v2190_v47 = vadd.f32 %v5666_v0, %v2182_v46  ;;  %v6534_v0 = vld [vmem:[%s8538_s15 + $0x1a8] ss:$16 sps:$4 sm:$0xff]   ;;  %v6539_v46 = vld [vmem:[%s8538_s15 + $0x1c4] ss:$16 sps:$4 sm:$0xff]  }
 0x922   : > { %v2191_v48 = vadd.f32 %v2190_v47, %v8588_v17  ;;  %v6453_v17 = vld [vmem:[%s8538_s15] ss:$16 sps:$4 sm:$0xff]   ;;  %v6542_v47 = vld [vmem:[%s8538_s15 + $0x1cc] ss:$16 sps:$4 sm:$0xff]  }
 0x924   : > { %v2192_v49 = vpack.c.bf16 %v2191_v48, %v2191_v48  ;;  %v6537_v48 = vld [vmem:[%s8538_s15 + $0x1c0] ss:$16 sps:$4 sm:$0xff]  }
 0x926   : > { %5675 = vmatmul.mubr.msk.bf16.vlgmr.msra.gmra.mrb[8].mxu0 %vm1545_vm2, %v2192_v49  ;;  %5676 = vmatmul.mubr.msk.bf16.vlgmr.msra.gmra.mrb[8].mxu1 %vm1545_vm2, %v2192_v49 }
 0x927   : > { %2327 = vmatpush1.bf16.msra.mxu0 %v5671_v25  ;;  %2368 = vmatpush1.bf16.msra.mxu1 %v5673_v29  ;;  %v6509_v25 = vld [vmem:[%s8538_s15 + $0x124] ss:$16 sps:$4 sm:$0xff]   ;;  %v6510_v29 = vld [vmem:[%s8538_s15 + $0x128] ss:$16 sps:$4 sm:$0xff]  }
 0x928   : > { %2358 = vmatprep.mubr.bf16.mxu0 %v7641_v13  ;;  %2399 = vmatprep.mubr.bf16.mxu1 %v7641_v13  ;;  %v6462_v13 = vld [vmem:[%s8538_s15 + $0x28] ss:$16 sps:$4 sm:$0xff]  }
 0x929   : > { %4244 = vmatprep.subr.bf16.mxu0 %v6455_v51  ;;  %4408 = vmatprep.subr.bf16.mxu1 %v6458_v52  ;;  %v6545_v51 = vld [vmem:[%s8538_s15 + $0x1e4] ss:$16 sps:$4 sm:$0xff]   ;;  %v6548_v52 = vld [vmem:[%s8538_s15 + $0x1ec] ss:$16 sps:$4 sm:$0xff]  }
 0x92e   : > { %5677 = vmatmul.mubr.msk.bf16.vlgmr.msra.gmra.mrb[12].mxu0 %vm1545_vm2, %v2192_v49  ;;  %5678 = vmatmul.mubr.msk.bf16.vlgmr.msra.gmra.mrb[12].mxu1 %vm1545_vm2, %v2192_v49  ;;  %v6540_v49 = vld [vmem:[%s8538_s15 + $0x1c8] ss:$16 sps:$4 sm:$0xff]  }
 0x92f   : > { %4245 = vmatpush1.bf16.msra.mxu0 %v6453_v17  ;;  %4409 = vmatpush1.bf16.msra.mxu1 %v6456_v50  ;;  %v6543_v17 = vld [vmem:[%s8538_s15 + $0x1e0] ss:$16 sps:$4 sm:$0xff]   ;;  %v6546_v50 = vld [vmem:[%s8538_s15 + $0x1e8] ss:$16 sps:$4 sm:$0xff]  }
 0x930   : > { %4246 = vmatprep.subr.bf16.mxu0 %v6461_v53  ;;  %4410 = vmatprep.subr.bf16.mxu1 %v6464_v54  ;;  %v6551_v53 = vld [vmem:[%s8538_s15 + $0x204] ss:$16 sps:$4 sm:$0xff]   ;;  %v6554_v54 = vld [vmem:[%s8538_s15 + $0x20c] ss:$16 sps:$4 sm:$0xff]  }
 0x933   : > { %4247 = vmatpush1.bf16.msra.mxu0 %v6459_v55  ;;  %4411 = vmatpush1.bf16.msra.mxu1 %v6462_v13  ;;  %v8798_v55 = vsub.s32 2, %v8627_v15  ;;  %v8802_v13 = vld [vmem:[%s9439_s0] sm:$0xff] }
 0x934   : > { %4248 = vmatprep.subr.bf16.mxu0 %v6467_v56  ;;  %4412 = vmatprep.subr.bf16.mxu1 %v6470_v57  ;;  %v8805_v56 = vsub.s32 3, %v8627_v15 }
 0x937   : > { %4249 = vmatpush1.bf16.msra.mxu0 %v6465_v58  ;;  %4413 = vmatpush1.bf16.msra.mxu1 %v6468_v59 }
 0x938   : > { %4250 = vmatprep.subr.bf16.mxu0 %v6473_v60  ;;  %4414 = vmatprep.subr.bf16.mxu1 %v6476_v61  ;;  %v2597_v60 = vrot.slane %v8802_v13, %v8630_v16 }
 0x93b   : > { %4251 = vmatpush1.bf16.msra.mxu0 %v6471_v62  ;;  %4415 = vmatpush1.bf16.msra.mxu1 %v6474_v63  ;;  %v2605_v62 = vrot.slane %v8802_v13, %v8798_v55 }
 0x93c   : > { %4252 = vmatprep.subr.bf16.mxu0 %v6479_v2  ;;  %4416 = vmatprep.subr.bf16.mxu1 %v6482_v3 }
 0x93f   : > { %4253 = vmatpush1.bf16.msra.mxu0 %v6477_v4  ;;  %4417 = vmatpush1.bf16.msra.mxu1 %v6480_v5 }
 0x940   : > { %4254 = vmatprep.subr.bf16.mxu0 %v6485_v1  ;;  %4418 = vmatprep.subr.bf16.mxu1 %v6488_v6  ;;  %v2601_v6 = vrot.slane %v8802_v13, %v8635_v28 }
 0x943   : > { %4255 = vmatpush1.bf16.msra.mxu0 %v6483_v7  ;;  %4419 = vmatpush1.bf16.msra.mxu1 %v6486_v8  ;;  %v2609_v7 = vrot.slane %v8802_v13, %v8805_v56 }
 0x944   : > { %4256 = vmatprep.subr.bf16.mxu0 %v6491_v9  ;;  %4420 = vmatprep.subr.bf16.mxu1 %v6494_v10 }
 0x947   : > { %4257 = vmatpush1.bf16.msra.mxu0 %v6489_v11  ;;  %4421 = vmatpush1.bf16.msra.mxu1 %v6492_v12 }
 0x948   : > { %4258 = vmatprep.subr.bf16.mxu0 %v6497_v14  ;;  %4422 = vmatprep.subr.bf16.mxu1 %v6500_v18 }
 0x94b   : > { %4259 = vmatpush1.bf16.msra.mxu0 %v6495_v19  ;;  %4423 = vmatpush1.bf16.msra.mxu1 %v6498_v20 }
 0x94c   : > { %4260 = vmatprep.subr.bf16.mxu0 %v6503_v21  ;;  %4424 = vmatprep.subr.bf16.mxu1 %v6506_v22 }
 0x94f   : > { %4261 = vmatpush1.bf16.msra.mxu0 %v6501_v23  ;;  %4425 = vmatpush1.bf16.msra.mxu1 %v6504_v24 }
 0x950   : > { %4262 = vmatprep.subr.bf16.mxu0 %v6509_v25  ;;  %4426 = vmatprep.subr.bf16.mxu1 %v6512_v26 }
 0x953   : > { %4263 = vmatpush1.bf16.msra.mxu0 %v6507_v27  ;;  %4427 = vmatpush1.bf16.msra.mxu1 %v6510_v29 }
 0x954   : > { %4264 = vmatprep.subr.bf16.mxu0 %v6515_v30  ;;  %4428 = vmatprep.subr.bf16.mxu1 %v6518_v33 }
 0x957   : > { %4265 = vmatpush1.bf16.msra.mxu0 %v6513_v34  ;;  %4429 = vmatpush1.bf16.msra.mxu1 %v6516_v35 }
 0x958   : > { %4266 = vmatprep.subr.bf16.mxu0 %v6521_v36  ;;  %4430 = vmatprep.subr.bf16.mxu1 %v6524_v37 }
 0x95b   : > { %4267 = vmatpush1.bf16.msra.mxu0 %v6519_v38  ;;  %4431 = vmatpush1.bf16.msra.mxu1 %v6522_v32 }
 0x95c   : > { %4268 = vmatprep.subr.bf16.mxu0 %v6527_v39  ;;  %4432 = vmatprep.subr.bf16.mxu1 %v6530_v40 }
 0x95f   : > { %4269 = vmatpush1.bf16.msra.mxu0 %v6525_v41  ;;  %4433 = vmatpush1.bf16.msra.mxu1 %v6528_v42 }
 0x960   : > { %4270 = vmatprep.subr.bf16.mxu0 %v6533_v43  ;;  %4434 = vmatprep.subr.bf16.mxu1 %v6536_v44 }
 0x963   : > { %4271 = vmatpush1.bf16.msra.mxu0 %v6531_v45  ;;  %4435 = vmatpush1.bf16.msra.mxu1 %v6534_v0 }
 0x964   : > { %4272 = vmatprep.subr.bf16.mxu0 %v6539_v46  ;;  %4436 = vmatprep.subr.bf16.mxu1 %v6542_v47 }
 0x967   : > { %4273 = vmatpush1.bf16.msra.mxu0 %v6537_v48  ;;  %4437 = vmatpush1.bf16.msra.mxu1 %v6540_v49 }
 0x968   : > { %4274 = vmatprep.subr.bf16.mxu0 %v6545_v51  ;;  %4438 = vmatprep.subr.bf16.mxu1 %v6548_v52 }
 0x96b   : > { %4275 = vmatpush1.bf16.msra.mxu0 %v6543_v17  ;;  %4439 = vmatpush1.bf16.msra.mxu1 %v6546_v50 }
 0x96c   : > { %4285 = vmatprep.subr.bf16.mxu0 %v6551_v53  ;;  %4449 = vmatprep.subr.bf16.mxu1 %v6554_v54 }
 0x9f9   : > { %v8807_v57 = vpop.f32.mrb[8].mxu0  ;;  %v8809_v58 = vpop.f32.mrb[8].mxu1 }
 0x9fa   : > { %v2408_v59 = vmul.f32 %v8807_v57, %v8598_v31  ;;  %v2410_v61 = vmul.f32 %v8809_v58, %v8598_v31  ;;  %v8819_v63 = vpop.f32.mrb[9].mxu0  ;;  %v8821_v2 = vpop.f32.mrb[9].mxu1 }
 0x9fb   : > { %v2409_v3 = vmul.f32 %v8819_v63, %v8598_v31  ;;  %v2411_v4 = vmul.f32 %v8821_v2, %v8598_v31  ;;  %v2282_v5 = vpop.f32.mrb[10].mxu0  ;;  %v2323_v1 = vpop.f32.mrb[10].mxu1 }
 0x9fc   : > { %v2416_v8 = vrot.slane %v2408_v59, 4  ;;  %v2472_v9 = vmul.f32 %v2408_v59, %v8807_v57  ;;  %v2428_v10 = vrot.slane %v2410_v61, 4  ;;  %v2474_v11 = vmul.f32 %v2410_v61, %v8809_v58  ;;  %v2283_v12 = vpop.f32.mrb[11].mxu0  ;;  %v2324_v14 = vpop.f32.mrb[11].mxu1 }
 0x9fd   : > { %v2422_v18 = vrot.slane %v2409_v3, 4  ;;  %v2473_v19 = vmul.f32 %v2409_v3, %v8819_v63  ;;  %v2434_v20 = vrot.slane %v2411_v4, 4  ;;  %v2475_v21 = vmul.f32 %v2411_v4, %v8821_v2 }
 0x9fe   : > { %v2417_v22 = vadd.f32 %v2416_v8, %v2408_v59  ;;  %v2480_v23 = vrot.slane %v2472_v9, 4  ;;  %v2429_v24 = vadd.f32 %v2428_v10, %v2410_v61  ;;  %v2492_v25 = vrot.slane %v2474_v11, 4 }
 0x9ff   : > { %v2423_v26 = vadd.f32 %v2422_v18, %v2409_v3  ;;  %v2486_v27 = vrot.slane %v2473_v19, 4  ;;  %v2435_v29 = vadd.f32 %v2434_v20, %v2411_v4  ;;  %v2498_v30 = vrot.slane %v2475_v21, 4 }
 0xa00   : > { %v2418_v33 = vrot.slane %v2417_v22, 2  ;;  %v2481_v34 = vadd.f32 %v2480_v23, %v2472_v9  ;;  %v2430_v35 = vrot.slane %v2429_v24, 2  ;;  %v2493_v36 = vadd.f32 %v2492_v25, %v2474_v11 }
 0xa01   : > { %v2424_v37 = vrot.slane %v2423_v26, 2  ;;  %v2487_v38 = vadd.f32 %v2486_v27, %v2473_v19  ;;  %v2436_v32 = vrot.slane %v2435_v29, 2  ;;  %v2499_v39 = vadd.f32 %v2498_v30, %v2475_v21  ;;  %v8835_v40 = vpop.f32.mrb[12].mxu0  ;;  %v8837_v41 = vpop.f32.mrb[12].mxu1  ;;  %v8845_v21 = vld [vmem:[%s9440_s3] sm:$0xff] }
 0xa02   : > { %v2419_v42 = vadd.f32 %v2418_v33, %v2417_v22  ;;  %v2482_v43 = vrot.slane %v2481_v34, 2  ;;  %v2431_v44 = vadd.f32 %v2430_v35, %v2429_v24  ;;  %v2494_v45 = vrot.slane %v2493_v36, 2  ;;  %v8839_v0 = vpop.f32.mrb[13].mxu0  ;;  %v8841_v46 = vpop.f32.mrb[13].mxu1 }
 0xa03   : > { %v2425_v47 = vadd.f32 %v2424_v37, %v2423_v26  ;;  %v2488_v48 = vrot.slane %v2487_v38, 2  ;;  %v2437_v49 = vadd.f32 %v2436_v32, %v2435_v29  ;;  %v2500_v51 = vrot.slane %v2499_v39, 2  ;;  %v2364_v52 = vpop.f32.mrb[14].mxu0  ;;  %v2405_v17 = vpop.f32.mrb[14].mxu1 }
 0xa04   : > { %v2420_v50 = vrot.slane %v2419_v42, 1  ;;  %v2483_v53 = vadd.f32 %v2482_v43, %v2481_v34  ;;  %v2432_v54 = vrot.slane %v2431_v44, 1  ;;  %v2495_v59 = vadd.f32 %v2494_v45, %v2493_v36  ;;  %v2365_v61 = vpop.f32.mrb[15].mxu0  ;;  %v2406_v3 = vpop.f32.mrb[15].mxu1 }
 0xa05   : > { %v2426_v4 = vrot.slane %v2425_v47, 1  ;;  %v2489_v5 = vadd.f32 %v2488_v48, %v2487_v38  ;;  %v2438_v1 = vrot.slane %v2437_v49, 1  ;;  %v2501_v8 = vadd.f32 %v2500_v51, %v2499_v39 }
 0xa06   : > { %v2421_v9 = vadd.f32 %v2420_v50, %v2419_v42  ;;  %v2484_v10 = vrot.slane %v2483_v53, 1  ;;  %v2433_v11 = vadd.f32 %v2432_v54, %v2431_v44  ;;  %v2496_v12 = vrot.slane %v2495_v59, 1 }
 0xa07   : > { %v2427_v14 = vadd.f32 %v2426_v4, %v2425_v47  ;;  %v2490_v18 = vrot.slane %v2489_v5, 1  ;;  %v2439_v19 = vadd.f32 %v2438_v1, %v2437_v49  ;;  %v2502_v20 = vrot.slane %v2501_v8, 1 }
 0xa08   : > { %v8847_v22 = vmul.f32 0.25, %v2421_v9  ;;  %v2485_v23 = vadd.f32 %v2484_v10, %v2483_v53  ;;  %v8849_v24 = vmul.f32 0.25, %v2433_v11  ;;  %v2497_v25 = vadd.f32 %v2496_v12, %v2495_v59 }
 0xa09   : > { %v8851_v26 = vmul.f32 0.25, %v2427_v14  ;;  %v2491_v27 = vadd.f32 %v2490_v18, %v2489_v5  ;;  %v8853_v29 = vmul.f32 0.25, %v2439_v19  ;;  %v2503_v30 = vadd.f32 %v2502_v20, %v2501_v8 }
 0xa0a   : > { %v2528_v33 = vmul.f32 0.25, %v2485_v23  ;;  %v2536_v34 = vmul.f32 %v8847_v22, %v8847_v22  ;;  %v2530_v35 = vmul.f32 0.25, %v2497_v25  ;;  %v2647_v36 = vrot.slane %v8845_v21, %v8630_v16 }
 0xa0b   : > { %v2538_v37 = vmul.f32 %v8849_v24, %v8849_v24  ;;  %v2529_v38 = vmul.f32 0.25, %v2491_v27  ;;  %v2537_v32 = vmul.f32 %v8851_v26, %v8851_v26  ;;  %v2655_v39 = vrot.slane %v8845_v21, %v8798_v55 }
 0xa0c   : > { %v2544_v42 = vsub.f32 %v2528_v33, %v2536_v34  ;;  %v2531_v43 = vmul.f32 0.25, %v2503_v30  ;;  %v2539_v44 = vmul.f32 %v8853_v29, %v8853_v29  ;;  %v2651_v45 = vrot.slane %v8845_v21, %v8635_v28 }
 0xa0d   : > { %v2560_v47 = vsub.f32 %v8807_v57, %v8847_v22  ;;  %v2546_v48 = vsub.f32 %v2530_v35, %v2538_v37  ;;  %v2545_v49 = vsub.f32 %v2529_v38, %v2537_v32  ;;  %v2412_v51 = vmul.f32 %v8835_v40, %v8598_v31 }
 0xa0e   : > { %v2552_v52 = vmax.f32 %v2544_v42, 0.0  ;;  %v2547_v17 = vsub.f32 %v2531_v43, %v2539_v44  ;;  %v2414_v50 = vmul.f32 %v8837_v41, %v8598_v31  ;;  %v2413_v53 = vmul.f32 %v8839_v0, %v8598_v31 }
 0xa0f   : > { %v2554_v54 = vmax.f32 %v2546_v48, 0.0  ;;  %v2553_v59 = vmax.f32 %v2545_v49, 0.0  ;;  %v2440_v61 = vrot.slane %v2412_v51, 4  ;;  %v2476_v3 = vmul.f32 %v2412_v51, %v8835_v40 }
 0xa10   : > { %v2568_v4 = vadd.f32 1e-05, %v2552_v52  ;;  %v2555_v5 = vmax.f32 %v2547_v17, 0.0  ;;  %v2452_v1 = vrot.slane %v2414_v50, 4  ;;  %v2478_v8 = vmul.f32 %v2414_v50, %v8837_v41 }
 0xa11   : > { %v2570_v9 = vadd.f32 1e-05, %v2554_v54  ;;  %v2569_v10 = vadd.f32 1e-05, %v2553_v59  ;;  %v2441_v11 = vadd.f32 %v2440_v61, %v2412_v51  ;;  %v2504_v12 = vrot.slane %v2476_v3, 4 }
 0xa12   : > { %6875 = vrsqrt.f32 %v2568_v4  ;;  %v2571_v14 = vadd.f32 1e-05, %v2555_v5  ;;  %v2453_v18 = vadd.f32 %v2452_v1, %v2414_v50  ;;  %v2516_v19 = vrot.slane %v2478_v8, 4 }
 0xa13   : > { %6877 = vrsqrt.f32 %v2570_v9  ;;  %v2442_v20 = vrot.slane %v2441_v11, 2  ;;  %v2505_v23 = vadd.f32 %v2504_v12, %v2476_v3  ;;  %v2446_v25 = vrot.slane %v2413_v53, 4 }
 0xa14   : > { %6879 = vrsqrt.f32 %v2569_v10  ;;  %v2454_v27 = vrot.slane %v2453_v18, 2  ;;  %v2517_v30 = vadd.f32 %v2516_v19, %v2478_v8  ;;  %v2477_v33 = vmul.f32 %v2413_v53, %v8839_v0 }
 0xa15   : > { %6881 = vrsqrt.f32 %v2571_v14  ;;  %v2443_v34 = vadd.f32 %v2442_v20, %v2441_v11  ;;  %v2506_v35 = vrot.slane %v2505_v23, 2  ;;  %v2447_v37 = vadd.f32 %v2446_v25, %v2413_v53 }
 0xa16   : > { %v2455_v38 = vadd.f32 %v2454_v27, %v2453_v18  ;;  %v2518_v32 = vrot.slane %v2517_v30, 2  ;;  %v2510_v42 = vrot.slane %v2477_v33, 4  ;;  %v2415_v43 = vmul.f32 %v8841_v46, %v8598_v31 }
 0xa17   : > { %v2562_v44 = vsub.f32 %v8809_v58, %v8849_v24  ;;  %v2444_v48 = vrot.slane %v2443_v34, 1  ;;  %v2507_v49 = vadd.f32 %v2506_v35, %v2505_v23  ;;  %v2448_v51 = vrot.slane %v2447_v37, 2 }
 0xa18   : > { %v2456_v52 = vrot.slane %v2455_v38, 1  ;;  %v2519_v17 = vadd.f32 %v2518_v32, %v2517_v30  ;;  %v2511_v50 = vadd.f32 %v2510_v42, %v2477_v33  ;;  %v2458_v54 = vrot.slane %v2415_v43, 4 }
 0xa19   : > { %v2445_v59 = vadd.f32 %v2444_v48, %v2443_v34  ;;  %v2508_v61 = vrot.slane %v2507_v49, 1  ;;  %v2449_v3 = vadd.f32 %v2448_v51, %v2447_v37  ;;  %v2479_v53 = vmul.f32 %v2415_v43, %v8841_v46 }
 0xa1a   : > { %v2457_v4 = vadd.f32 %v2456_v52, %v2455_v38  ;;  %v2520_v5 = vrot.slane %v2519_v17, 1  ;;  %v2512_v1 = vrot.slane %v2511_v50, 2  ;;  %v2459_v8 = vadd.f32 %v2458_v54, %v2415_v43 }
 0xa1b   : > { %v2561_v9 = vsub.f32 %v8819_v63, %v8851_v26  ;;  %v8887_v58 = vmul.f32 0.25, %v2445_v59  ;;  %v2509_v24 = vadd.f32 %v2508_v61, %v2507_v49  ;;  %v2450_v10 = vrot.slane %v2449_v3, 1 }
 0xa1c   : > { %v6876_v11 = vpop.eup %6875  ;;  %v8889_v12 = vmul.f32 0.25, %v2457_v4  ;;  %v2521_v14 = vadd.f32 %v2520_v5, %v2519_v17  ;;  %v2513_v18 = vadd.f32 %v2512_v1, %v2511_v50  ;;  %v2522_v19 = vrot.slane %v2479_v53, 4 }
 0xa1d   : > { %v6878_v20 = vpop.eup %6877  ;;  %v2584_v23 = vmul.f32 %v6876_v11, %v2560_v47  ;;  %v2532_v25 = vmul.f32 0.25, %v2509_v24  ;;  %v2540_v27 = vmul.f32 %v8887_v58, %v8887_v58  ;;  %v2460_v63 = vrot.slane %v2459_v8, 2 }
 0xa1e   : > { %v6880_v26 = vpop.eup %6879  ;;  %v2586_v30 = vmul.f32 %v6878_v20, %v2562_v44  ;;  %v2563_v33 = vsub.f32 %v8821_v2, %v8853_v29  ;;  %v2534_v34 = vmul.f32 0.25, %v2521_v14  ;;  %v2542_v35 = vmul.f32 %v8889_v12, %v8889_v12  ;;  %v6552_v20 = vld [vmem:[%s8538_s15 + $0x208] ss:$16 sps:$4 sm:$0xff]  }
 0xa1f   : > { %v6882_v37 = vpop.eup %6881  ;;  %v2634_v57 = vmul.f32 %v2597_v60, %v2584_v23  ;;  %v2585_v22 = vmul.f32 %v6880_v26, %v2561_v9  ;;  %v2548_v47 = vsub.f32 %v2532_v25, %v2540_v27  ;;  %v2451_v38 = vadd.f32 %v2450_v10, %v2449_v3 }
 0xa20   : > { %v2636_v32 = vmul.f32 %v2605_v62, %v2586_v30  ;;  %v2587_v42 = vmul.f32 %v6882_v37, %v2563_v33  ;;  %v2550_v43 = vsub.f32 %v2534_v34, %v2542_v35  ;;  %v2514_v44 = vrot.slane %v2513_v18, 1  ;;  %v6560_v30 = vld [vmem:[%s8538_s15 + $0x22c] ss:$16 sps:$4 sm:$0xff]   ;;  %v6555_v37 = vld [vmem:[%s8538_s15 + $0x220] ss:$16 sps:$4 sm:$0xff]  }
 0xa21   : > { %v2556_v2 = vmax.f32 %v2548_v47, 0.0  ;;  %v8906_v29 = vmul.f32 0.25, %v2451_v38  ;;  %v2461_v48 = vadd.f32 %v2460_v63, %v2459_v8  ;;  %v2523_v49 = vadd.f32 %v2522_v19, %v2479_v53  ;;  %v6549_v19 = vld [vmem:[%s8538_s15 + $0x200] ss:$16 sps:$4 sm:$0xff]   ;;  %v6566_v47 = vld [vmem:[%s8538_s15 + $0x24c] ss:$16 sps:$4 sm:$0xff]  }
 0xa22   : > { %v2558_v51 = vmax.f32 %v2550_v43, 0.0  ;;  %v2515_v52 = vadd.f32 %v2514_v44, %v2513_v18  ;;  %v2635_v60 = vmul.f32 %v2601_v6, %v2585_v22  ;;  %v2684_v17 = vadd.f32 %v2647_v36, %v2634_v57  ;;  %v6558_v57 = vld [vmem:[%s8538_s15 + $0x228] ss:$16 sps:$4 sm:$0xff]   ;;  %v6563_v22 = vld [vmem:[%s8538_s15 + $0x244] ss:$16 sps:$4 sm:$0xff]  }
 0xa23   : > { %v2572_v50 = vadd.f32 1e-05, %v2556_v2  ;;  %v2541_v62 = vmul.f32 %v8906_v29, %v8906_v29  ;;  %v2462_v54 = vrot.slane %v2461_v48, 1  ;;  %v2659_v59 = vrot.slane %v8845_v21, %v8805_v56 }
 0xa24   : > { %v2574_v61 = vadd.f32 1e-05, %v2558_v51  ;;  %v2533_v3 = vmul.f32 0.25, %v2515_v52  ;;  %v2524_v53 = vrot.slane %v2523_v49, 2  ;;  %v2685_v6 = vadd.f32 %v2651_v45, %v2635_v60  ;;  %v6561_v52 = vld [vmem:[%s8538_s15 + $0x240] ss:$16 sps:$4 sm:$0xff]  }
 0xa25   : > { %6883 = vrsqrt.f32 %v2572_v50  ;;  %v2463_v4 = vadd.f32 %v2462_v54, %v2461_v48  ;;  %v2692_v36 = vmax.f32 %v2684_v17, 0.0  ;;  %v2637_v5 = vmul.f32 %v2609_v7, %v2587_v42  ;;  %v6569_v17 = vld [vmem:[%s8538_s15 + $0x264] ss:$16 sps:$4 sm:$0xff]   ;;  %v6572_v50 = vld [vmem:[%s8538_s15 + $0x26c] ss:$16 sps:$4 sm:$0xff]  }
 0xa26   : > { %6885 = vrsqrt.f32 %v2574_v61  ;;  %v2549_v1 = vsub.f32 %v2533_v3, %v2541_v62  ;;  %v2525_v8 = vadd.f32 %v2524_v53, %v2523_v49  ;;  %v2693_v9 = vmax.f32 %v2685_v6, 0.0  ;;  %v6567_v61 = vld [vmem:[%s8538_s15 + $0x260] ss:$16 sps:$4 sm:$0xff]   ;;  %v6570_v3 = vld [vmem:[%s8538_s15 + $0x268] ss:$16 sps:$4 sm:$0xff]  }
 0xa27   : > { %v8924_v24 = vmul.f32 0.25, %v2463_v4  ;;  %v2687_v10 = vadd.f32 %v2659_v59, %v2637_v5  ;;  %v8929_v45 = vadd.f32 %v2655_v39, %v2636_v32  ;;  %v2612_v7 = vsub.s32 4, %v8627_v15  ;;  %v6557_v39 = vld [vmem:[%s8538_s15 + $0x224] ss:$16 sps:$4 sm:$0xff]  }
 0xa28   : > { %v2557_v11 = vmax.f32 %v2549_v1, 0.0  ;;  %v2526_v14 = vrot.slane %v2525_v8, 1  ;;  %v2701_v18 = vpack.c.bf16 %v2693_v9, %v2693_v9  ;;  %v2700_v23 = vpack.c.bf16 %v2692_v36, %v2692_v36  ;;  %v6575_v4 = vld [vmem:[%s8538_s15 + $0x284] ss:$16 sps:$4 sm:$0xff]   ;;  %v6578_v36 = vld [vmem:[%s8538_s15 + $0x28c] ss:$16 sps:$4 sm:$0xff]  }
 0xa29   : > { %v2695_v25 = vmax.f32 %v2687_v10, 0.0  ;;  %v2543_v26 = vmul.f32 %v8924_v24, %v8924_v24  ;;  %v2620_v33 = vsub.s32 6, %v8627_v15  ;;  %v2564_v38 = vsub.f32 %v8835_v40, %v8887_v58  ;;  %v6564_v40 = vld [vmem:[%s8538_s15 + $0x248] ss:$16 sps:$4 sm:$0xff]  }
 0xa2a   : > { %v2573_v27 = vadd.f32 1e-05, %v2557_v11  ;;  %v2527_v63 = vadd.f32 %v2526_v14, %v2525_v8  ;;  %4276 = vmatprep.mubr.bf16.mxu0 %v2701_v18  ;;  %4440 = vmatprep.mubr.bf16.mxu1 %v2701_v18  ;;  %v2613_v32 = vrot.slane %v8802_v13, %v2612_v7  ;;  %v2566_v44 = vsub.f32 %v8837_v41, %v8889_v12  ;;  %v6573_v11 = vld [vmem:[%s8538_s15 + $0x280] ss:$16 sps:$4 sm:$0xff]   ;;  %v6584_v14 = vld [vmem:[%s8538_s15 + $0x2ac] ss:$16 sps:$4 sm:$0xff]  }
 0xa2b   : > { %4277 = vmatmul.mubr.bf16.vlgmr.msra.gmra.mrb[16].mxu0 %v2700_v23  ;;  %4441 = vmatmul.mubr.bf16.vlgmr.msra.gmra.mrb[16].mxu1 %v2700_v23  ;;  %v2703_v34 = vpack.c.bf16 %v2695_v25, %v2695_v25  ;;  %v2621_v2 = vrot.slane %v8802_v13, %v2620_v33  ;;  %v2663_v58 = vrot.slane %v8845_v21, %v2612_v7  ;;  %v2616_v41 = vsub.s32 5, %v8627_v15  ;;  %v6579_v7 = vld [vmem:[%s8538_s15 + $0x2a0] ss:$16 sps:$4 sm:$0xff]   ;;  %v6582_v23 = vld [vmem:[%s8538_s15 + $0x2a8] ss:$16 sps:$4 sm:$0xff]  }
 0xa2c   : > { %6887 = vrsqrt.f32 %v2573_v27  ;;  %v2535_v35 = vmul.f32 0.25, %v2527_v63  ;;  %4286 = vmatpush1.bf16.msra.mxu0 %v6549_v19  ;;  %4450 = vmatpush1.bf16.msra.mxu1 %v6552_v20  ;;  %v2671_v12 = vrot.slane %v8845_v21, %v2620_v33  ;;  %v2565_v6 = vsub.f32 %v8839_v0, %v8906_v29  ;;  %v6576_v0 = vld [vmem:[%s8538_s15 + $0x288] ss:$16 sps:$4 sm:$0xff]   ;;  %v6581_v29 = vld [vmem:[%s8538_s15 + $0x2a4] ss:$16 sps:$4 sm:$0xff]  }
 0xa2d   : > { %4317 = vmatprep.mubr.bf16.mxu0 %v2703_v34  ;;  %4481 = vmatprep.mubr.bf16.mxu1 %v2703_v34  ;;  %v2617_v5 = vrot.slane %v8802_v13, %v2616_v41  ;;  %v2667_v10 = vrot.slane %v8845_v21, %v2616_v41  ;;  %v2624_v19 = vsub.s32 7, %v8627_v15  ;;  %v2567_v25 = vsub.f32 %v8841_v46, %v8924_v24  ;;  %v6587_v27 = vld [vmem:[%s8538_s15 + $0x2c4] ss:$16 sps:$4 sm:$0xff]   ;;  %v6590_v63 = vld [vmem:[%s8538_s15 + $0x2cc] ss:$16 sps:$4 sm:$0xff]  }
 0xa2e   : > { %v2551_v42 = vsub.f32 %v2535_v35, %v2543_v26  ;;  %4287 = vmatprep.subr.bf16.mxu0 %v6557_v39  ;;  %4451 = vmatprep.subr.bf16.mxu1 %v6560_v30  ;;  %v6585_v33 = vld [vmem:[%s8538_s15 + $0x2c0] ss:$16 sps:$4 sm:$0xff]   ;;  %v6588_v34 = vld [vmem:[%s8538_s15 + $0x2c8] ss:$16 sps:$4 sm:$0xff]   ;;  %v6593_v46 = vld [vmem:[%s8538_s15 + $0x2e4] ss:$16 sps:$4 sm:$0xff]  }
 0xa2f   : > { %v6884_v43 = vpop.eup %6883  ;;  %v2625_v26 = vrot.slane %v8802_v13, %v2624_v19  ;;  %v2675_v30 = vrot.slane %v8845_v21, %v2624_v19  ;;  %v6596_v24 = vld [vmem:[%s8538_s15 + $0x2ec] ss:$16 sps:$4 sm:$0xff]   ;;  %v6591_v21 = vld [vmem:[%s8538_s15 + $0x2e0] ss:$16 sps:$4 sm:$0xff]  }
 0xa30   : > { %v6886_v48 = vpop.eup %6885  ;;  %v2588_v49 = vmul.f32 %v6884_v43, %v2564_v38  ;;  %v2559_v51 = vmax.f32 %v2551_v42, 0.0  ;;  %4288 = vmatpush1.bf16.msra.mxu0 %v6555_v37  ;;  %4452 = vmatpush1.bf16.msra.mxu1 %v6558_v57  ;;  %v6594_v37 = vld [vmem:[%s8538_s15 + $0x2e8] ss:$16 sps:$4 sm:$0xff]   ;;  %v6599_v57 = vld [vmem:[%s8538_s15 + $0x304] ss:$16 sps:$4 sm:$0xff]  }
 0xa31   : > { %v2590_v60 = vmul.f32 %v6886_v48, %v2566_v44  ;;  %4289 = vmatprep.subr.bf16.mxu0 %v6563_v22  ;;  %4453 = vmatprep.subr.bf16.mxu1 %v6566_v47  ;;  %v6602_v22 = vld [vmem:[%s8538_s15 + $0x30c] ss:$16 sps:$4 sm:$0xff]   ;;  %v6597_v47 = vld [vmem:[%s8538_s15 + $0x300] ss:$16 sps:$4 sm:$0xff]   ;;  %v6600_v38 = vld [vmem:[%s8538_s15 + $0x308] ss:$16 sps:$4 sm:$0xff]  }
 0xa32   : > { %v2638_v62 = vmul.f32 %v2613_v32, %v2588_v49  ;;  %v2575_v54 = vadd.f32 1e-05, %v2559_v51  ;;  %v6605_v32 = vld [vmem:[%s8538_s15 + $0x324] ss:$16 sps:$4 sm:$0xff]   ;;  %v6608_v42 = vld [vmem:[%s8538_s15 + $0x32c] ss:$16 sps:$4 sm:$0xff]  }
 0xa33   : > { %v2640_v59 = vmul.f32 %v2621_v2, %v2590_v60  ;;  %v6603_v43 = vld [vmem:[%s8538_s15 + $0x320] ss:$16 sps:$4 sm:$0xff]   ;;  %v6606_v44 = vld [vmem:[%s8538_s15 + $0x328] ss:$16 sps:$4 sm:$0xff]   ;;  %v6611_v2 = vld [vmem:[%s8538_s15 + $0x344] ss:$16 sps:$4 sm:$0xff]  }
 0xa34   : > { %6889 = vrsqrt.f32 %v2575_v54  ;;  %4290 = vmatpush1.bf16.msra.mxu0 %v6561_v52  ;;  %4454 = vmatpush1.bf16.msra.mxu1 %v6564_v40  ;;  %v8958_v53 = vadd.f32 %v2663_v58, %v2638_v62  ;;  %v6614_v48 = vld [vmem:[%s8538_s15 + $0x34c] ss:$16 sps:$4 sm:$0xff]   ;;  %v6609_v49 = vld [vmem:[%s8538_s15 + $0x340] ss:$16 sps:$4 sm:$0xff]   ;;  %v6612_v51 = vld [vmem:[%s8538_s15 + $0x348] ss:$16 sps:$4 sm:$0xff]  }
 0xa35   : > { %4291 = vmatprep.subr.bf16.mxu0 %v6569_v17  ;;  %4455 = vmatprep.subr.bf16.mxu1 %v6572_v50  ;;  %v8965_v1 = vadd.f32 %v2671_v12, %v2640_v59  ;;  %v6617_v52 = vld [vmem:[%s8538_s15 + $0x364] ss:$16 sps:$4 sm:$0xff]   ;;  %v6620_v40 = vld [vmem:[%s8538_s15 + $0x36c] ss:$16 sps:$4 sm:$0xff]   ;;  %v6615_v58 = vld [vmem:[%s8538_s15 + $0x360] ss:$16 sps:$4 sm:$0xff]  }
 0xa36   : > { %v6888_v8 = vpop.eup %6887  ;;  %v6618_v60 = vld [vmem:[%s8538_s15 + $0x368] ss:$16 sps:$4 sm:$0xff]   ;;  %v6623_v17 = vld [vmem:[%s8538_s15 + $0x384] ss:$16 sps:$4 sm:$0xff]   ;;  %v6626_v50 = vld [vmem:[%s8538_s15 + $0x38c] ss:$16 sps:$4 sm:$0xff]  }
 0xa37   : > { %v2589_v9 = vmul.f32 %v6888_v8, %v2565_v6  ;;  %v6621_v41 = vld [vmem:[%s8538_s15 + $0x380] ss:$16 sps:$4 sm:$0xff]   ;;  %v6624_v12 = vld [vmem:[%s8538_s15 + $0x388] ss:$16 sps:$4 sm:$0xff]   ;;  %v6629_v62 = vld [vmem:[%s8538_s15 + $0x3a4] ss:$16 sps:$4 sm:$0xff]  }
 0xa38   : > { %4292 = vmatpush1.bf16.msra.mxu0 %v6567_v61  ;;  %4456 = vmatpush1.bf16.msra.mxu1 %v6570_v3  ;;  %v6632_v54 = vld [vmem:[%s8538_s15 + $0x3ac] ss:$16 sps:$4 sm:$0xff]   ;;  %v6627_v59 = vld [vmem:[%s8538_s15 + $0x3a0] ss:$16 sps:$4 sm:$0xff]   ;;  %v6630_v61 = vld [vmem:[%s8538_s15 + $0x3a8] ss:$16 sps:$4 sm:$0xff]  }
 0xa39   : > { %4293 = vmatprep.subr.bf16.mxu0 %v6575_v4  ;;  %4457 = vmatprep.subr.bf16.mxu1 %v6578_v36  ;;  %v2639_v18 = vmul.f32 %v2617_v5, %v2589_v9  ;;  %v6635_v3 = vld [vmem:[%s8538_s15 + $0x3c4] ss:$16 sps:$4 sm:$0xff]   ;;  %v6638_v6 = vld [vmem:[%s8538_s15 + $0x3cc] ss:$16 sps:$4 sm:$0xff]   ;;  %v6633_v4 = vld [vmem:[%s8538_s15 + $0x3c0] ss:$16 sps:$4 sm:$0xff]  }
 0xa3a   : > { %v6636_v36 = vld [vmem:[%s8538_s15 + $0x3c8] ss:$16 sps:$4 sm:$0xff]   ;;  %v6641_v5 = vld [vmem:[%s8538_s15 + $0x3e4] ss:$16 sps:$4 sm:$0xff]   ;;  %v6644_v8 = vld [vmem:[%s8538_s15 + $0x3ec] ss:$16 sps:$4 sm:$0xff]  }
 0xa3b   : > { %v8973_v20 = vadd.f32 %v2667_v10, %v2639_v18  ;;  %v6639_v9 = vld [vmem:[%s8538_s15 + $0x3e0] ss:$16 sps:$4 sm:$0xff]   ;;  %v6642_v10 = vld [vmem:[%s8538_s15 + $0x3e8] ss:$16 sps:$4 sm:$0xff]  }
 0xa3c   : > { %4294 = vmatpush1.bf16.msra.mxu0 %v6573_v11  ;;  %4458 = vmatpush1.bf16.msra.mxu1 %v6576_v0  ;;  %v2694_v11 = vmax.f32 %v8929_v45, 0.0  ;;  %v6647_v0 = vld [vmem:[%s8538_s15 + $0x404] ss:$16 sps:$4 sm:$0xff]   ;;  %v6645_v18 = vld [vmem:[%s8538_s15 + $0x400] ss:$16 sps:$4 sm:$0xff]  }
 0xa3d   : > { %4295 = vmatprep.subr.bf16.mxu0 %v6581_v29  ;;  %4459 = vmatprep.subr.bf16.mxu1 %v6584_v14  ;;  %v6650_v29 = vld [vmem:[%s8538_s15 + $0x40c] ss:$16 sps:$4 sm:$0xff]   ;;  %v2697_v14 = vmax.f32 %v8973_v20, 0.0  ;;  %v6651_v45 = vld [vmem:[%s8538_s15 + $0x420] ss:$16 sps:$4 sm:$0xff]  }
 0xa3e   : > { %v6890_v15 = vpop.eup %6889  ;;  %v2702_v19 = vpack.c.bf16 %v2694_v11, %v2694_v11  ;;  %v6654_v20 = vld [vmem:[%s8538_s15 + $0x428] ss:$16 sps:$4 sm:$0xff]   ;;  %v6725_v11 = vld [vmem:[%s8538_s15 + $0x5a4] ss:$16 sps:$4 sm:$0xff]  }
 0xa3f   : > { %v2591_v39 = vmul.f32 %v6890_v15, %v2567_v25  ;;  %v6653_v25 = vld [vmem:[%s8538_s15 + $0x424] ss:$16 sps:$4 sm:$0xff]   ;;  %v6657_v15 = vld [vmem:[%s8538_s15 + $0x440] ss:$16 sps:$4 sm:$0xff]  }
 0xa40   : > { %4296 = vmatpush1.bf16.msra.mxu0 %v6579_v7  ;;  %4460 = vmatpush1.bf16.msra.mxu1 %v6582_v23  ;;  %v6648_v7 = vld [vmem:[%s8538_s15 + $0x408] ss:$16 sps:$4 sm:$0xff]   ;;  %v2705_v23 = vpack.c.bf16 %v2697_v14, %v2697_v14 }
 0xa41   : > { %4297 = vmatprep.subr.bf16.mxu0 %v6587_v27  ;;  %4461 = vmatprep.subr.bf16.mxu1 %v6590_v63  ;;  %v2641_v35 = vmul.f32 %v2625_v26, %v2591_v39  ;;  %v6656_v27 = vld [vmem:[%s8538_s15 + $0x42c] ss:$16 sps:$4 sm:$0xff]   ;;  %v6659_v63 = vld [vmem:[%s8538_s15 + $0x444] ss:$16 sps:$4 sm:$0xff]   ;;  %v6660_v39 = vld [vmem:[%s8538_s15 + $0x448] ss:$16 sps:$4 sm:$0xff]  }
 0xa42   : > { %v6662_v26 = vld [vmem:[%s8538_s15 + $0x44c] ss:$16 sps:$4 sm:$0xff]   ;;  %v6726_v14 = vld [vmem:[%s8538_s15 + $0x5a8] ss:$16 sps:$4 sm:$0xff]  }
 0xa43   : > { %v8987_v13 = vadd.f32 %v2675_v30, %v2641_v35  ;;  %v6665_v30 = vld [vmem:[%s8538_s15 + $0x464] ss:$16 sps:$4 sm:$0xff]   ;;  %v6674_v35 = vld [vmem:[%s8538_s15 + $0x48c] ss:$16 sps:$4 sm:$0xff]  }
 0xa44   : > { %4298 = vmatpush1.bf16.msra.mxu0 %v6585_v33  ;;  %4462 = vmatpush1.bf16.msra.mxu1 %v6588_v34  ;;  %v6668_v33 = vld [vmem:[%s8538_s15 + $0x46c] ss:$16 sps:$4 sm:$0xff]   ;;  %v6663_v34 = vld [vmem:[%s8538_s15 + $0x460] ss:$16 sps:$4 sm:$0xff]  }
 0xa45   : > { %4299 = vmatprep.subr.bf16.mxu0 %v6593_v46  ;;  %4463 = vmatprep.subr.bf16.mxu1 %v6596_v24  ;;  %v6666_v46 = vld [vmem:[%s8538_s15 + $0x468] ss:$16 sps:$4 sm:$0xff]   ;;  %v6671_v24 = vld [vmem:[%s8538_s15 + $0x484] ss:$16 sps:$4 sm:$0xff]  }
 0xa48   : > { %4300 = vmatpush1.bf16.msra.mxu0 %v6591_v21  ;;  %4464 = vmatpush1.bf16.msra.mxu1 %v6594_v37  ;;  %v6669_v21 = vld [vmem:[%s8538_s15 + $0x480] ss:$16 sps:$4 sm:$0xff]   ;;  %v6672_v37 = vld [vmem:[%s8538_s15 + $0x488] ss:$16 sps:$4 sm:$0xff]  }
 0xa49   : > { %4301 = vmatprep.subr.bf16.mxu0 %v6599_v57  ;;  %4465 = vmatprep.subr.bf16.mxu1 %v6602_v22  ;;  %v6677_v57 = vld [vmem:[%s8538_s15 + $0x4a4] ss:$16 sps:$4 sm:$0xff]   ;;  %v6680_v22 = vld [vmem:[%s8538_s15 + $0x4ac] ss:$16 sps:$4 sm:$0xff]  }
 0xa4c   : > { %4302 = vmatpush1.bf16.msra.mxu0 %v6597_v47  ;;  %4466 = vmatpush1.bf16.msra.mxu1 %v6600_v38  ;;  %v6675_v47 = vld [vmem:[%s8538_s15 + $0x4a0] ss:$16 sps:$4 sm:$0xff]   ;;  %v6678_v38 = vld [vmem:[%s8538_s15 + $0x4a8] ss:$16 sps:$4 sm:$0xff]  }
 0xa4d   : > { %4303 = vmatprep.subr.bf16.mxu0 %v6605_v32  ;;  %4467 = vmatprep.subr.bf16.mxu1 %v6608_v42  ;;  %v6683_v32 = vld [vmem:[%s8538_s15 + $0x4c4] ss:$16 sps:$4 sm:$0xff]   ;;  %v6686_v42 = vld [vmem:[%s8538_s15 + $0x4cc] ss:$16 sps:$4 sm:$0xff]  }
 0xa50   : > { %4304 = vmatpush1.bf16.msra.mxu0 %v6603_v43  ;;  %4468 = vmatpush1.bf16.msra.mxu1 %v6606_v44  ;;  %v6681_v43 = vld [vmem:[%s8538_s15 + $0x4c0] ss:$16 sps:$4 sm:$0xff]   ;;  %v6684_v44 = vld [vmem:[%s8538_s15 + $0x4c8] ss:$16 sps:$4 sm:$0xff]  }
 0xa51   : > { %4305 = vmatprep.subr.bf16.mxu0 %v6611_v2  ;;  %4469 = vmatprep.subr.bf16.mxu1 %v6614_v48  ;;  %v6689_v2 = vld [vmem:[%s8538_s15 + $0x4e4] ss:$16 sps:$4 sm:$0xff]   ;;  %v6692_v48 = vld [vmem:[%s8538_s15 + $0x4ec] ss:$16 sps:$4 sm:$0xff]  }
 0xa54   : > { %4306 = vmatpush1.bf16.msra.mxu0 %v6609_v49  ;;  %4470 = vmatpush1.bf16.msra.mxu1 %v6612_v51  ;;  %v6687_v49 = vld [vmem:[%s8538_s15 + $0x4e0] ss:$16 sps:$4 sm:$0xff]   ;;  %v6690_v51 = vld [vmem:[%s8538_s15 + $0x4e8] ss:$16 sps:$4 sm:$0xff]  }
 0xa55   : > { %4307 = vmatprep.subr.bf16.mxu0 %v6617_v52  ;;  %4471 = vmatprep.subr.bf16.mxu1 %v6620_v40  ;;  %v6695_v52 = vld [vmem:[%s8538_s15 + $0x504] ss:$16 sps:$4 sm:$0xff]   ;;  %v6698_v40 = vld [vmem:[%s8538_s15 + $0x50c] ss:$16 sps:$4 sm:$0xff]  }
 0xa58   : > { %4308 = vmatpush1.bf16.msra.mxu0 %v6615_v58  ;;  %4472 = vmatpush1.bf16.msra.mxu1 %v6618_v60  ;;  %v6693_v58 = vld [vmem:[%s8538_s15 + $0x500] ss:$16 sps:$4 sm:$0xff]   ;;  %v6696_v60 = vld [vmem:[%s8538_s15 + $0x508] ss:$16 sps:$4 sm:$0xff]  }
 0xa59   : > { %4309 = vmatprep.subr.bf16.mxu0 %v6623_v17  ;;  %4473 = vmatprep.subr.bf16.mxu1 %v6626_v50  ;;  %v6701_v17 = vld [vmem:[%s8538_s15 + $0x524] ss:$16 sps:$4 sm:$0xff]   ;;  %v6704_v50 = vld [vmem:[%s8538_s15 + $0x52c] ss:$16 sps:$4 sm:$0xff]  }
 0xa5c   : > { %4310 = vmatpush1.bf16.msra.mxu0 %v6621_v41  ;;  %4474 = vmatpush1.bf16.msra.mxu1 %v6624_v12  ;;  %v6699_v41 = vld [vmem:[%s8538_s15 + $0x520] ss:$16 sps:$4 sm:$0xff]   ;;  %v6702_v12 = vld [vmem:[%s8538_s15 + $0x528] ss:$16 sps:$4 sm:$0xff]  }
 0xa5d   : > { %4311 = vmatprep.subr.bf16.mxu0 %v6629_v62  ;;  %4475 = vmatprep.subr.bf16.mxu1 %v6632_v54  ;;  %v6707_v62 = vld [vmem:[%s8538_s15 + $0x544] ss:$16 sps:$4 sm:$0xff]   ;;  %v6710_v54 = vld [vmem:[%s8538_s15 + $0x54c] ss:$16 sps:$4 sm:$0xff]  }
 0xa60   : > { %4312 = vmatpush1.bf16.msra.mxu0 %v6627_v59  ;;  %4476 = vmatpush1.bf16.msra.mxu1 %v6630_v61  ;;  %v6705_v59 = vld [vmem:[%s8538_s15 + $0x540] ss:$16 sps:$4 sm:$0xff]   ;;  %v6708_v61 = vld [vmem:[%s8538_s15 + $0x548] ss:$16 sps:$4 sm:$0xff]  }
 0xa61   : > { %4313 = vmatprep.subr.bf16.mxu0 %v6635_v3  ;;  %4477 = vmatprep.subr.bf16.mxu1 %v6638_v6  ;;  %v6713_v3 = vld [vmem:[%s8538_s15 + $0x564] ss:$16 sps:$4 sm:$0xff]   ;;  %v6716_v6 = vld [vmem:[%s8538_s15 + $0x56c] ss:$16 sps:$4 sm:$0xff]  }
 0xa64   : > { %4314 = vmatpush1.bf16.msra.mxu0 %v6633_v4  ;;  %4478 = vmatpush1.bf16.msra.mxu1 %v6636_v36  ;;  %v6711_v4 = vld [vmem:[%s8538_s15 + $0x560] ss:$16 sps:$4 sm:$0xff]   ;;  %v6714_v36 = vld [vmem:[%s8538_s15 + $0x568] ss:$16 sps:$4 sm:$0xff]  }
 0xa65   : > { %4315 = vmatprep.subr.bf16.mxu0 %v6641_v5  ;;  %4479 = vmatprep.subr.bf16.mxu1 %v6644_v8  ;;  %v6719_v5 = vld [vmem:[%s8538_s15 + $0x584] ss:$16 sps:$4 sm:$0xff]   ;;  %v6722_v8 = vld [vmem:[%s8538_s15 + $0x58c] ss:$16 sps:$4 sm:$0xff]  }
 0xa68   : > { %4316 = vmatpush1.bf16.msra.mxu0 %v6639_v9  ;;  %4480 = vmatpush1.bf16.msra.mxu1 %v6642_v10  ;;  %v6717_v9 = vld [vmem:[%s8538_s15 + $0x580] ss:$16 sps:$4 sm:$0xff]   ;;  %v6720_v10 = vld [vmem:[%s8538_s15 + $0x588] ss:$16 sps:$4 sm:$0xff]  }
 0xa69   : > { %4326 = vmatprep.subr.bf16.mxu0 %v6647_v0  ;;  %4490 = vmatprep.subr.bf16.mxu1 %v6650_v29  ;;  %v6728_v0 = vld [vmem:[%s8538_s15 + $0x5ac] ss:$16 sps:$4 sm:$0xff]   ;;  %v6723_v29 = vld [vmem:[%s8538_s15 + $0x5a0] ss:$16 sps:$4 sm:$0xff]  }
 0xa6b   : > { %4318 = vmatmul.mubr.bf16.vlgmr.msra.gmra.mrb[16].mxu0 %v2702_v19  ;;  %4482 = vmatmul.mubr.bf16.vlgmr.msra.gmra.mrb[16].mxu1 %v2702_v19  ;;  %v6734_v19 = vld [vmem:[%s8538_s15 + $0x5cc] ss:$16 sps:$4 sm:$0xff]  }
 0xa6c   : > { %4327 = vmatpush1.bf16.msra.mxu0 %v6645_v18  ;;  %4358 = vmatprep.mubr.bf16.mxu0 %v2705_v23  ;;  %v6731_v18 = vld [vmem:[%s8538_s15 + $0x5c4] ss:$16 sps:$4 sm:$0xff]  }
 0xa6d   : > { %4491 = vmatpush1.bf16.msra.mxu1 %v6648_v7  ;;  %4522 = vmatprep.mubr.bf16.mxu1 %v2705_v23  ;;  %v6729_v7 = vld [vmem:[%s8538_s15 + $0x5c0] ss:$16 sps:$4 sm:$0xff]   ;;  %v6732_v23 = vld [vmem:[%s8538_s15 + $0x5c8] ss:$16 sps:$4 sm:$0xff]  }
 0xa6e   : > { %4328 = vmatprep.subr.bf16.mxu0 %v6653_v25  ;;  %4492 = vmatprep.subr.bf16.mxu1 %v6656_v27  ;;  %v6737_v25 = vld [vmem:[%s8538_s15 + $0x5e4] ss:$16 sps:$4 sm:$0xff]   ;;  %v6740_v27 = vld [vmem:[%s8538_s15 + $0x5ec] ss:$16 sps:$4 sm:$0xff]  }
 0xa70   : > { %4329 = vmatpush1.bf16.msra.mxu0 %v6651_v45  ;;  %v6735_v45 = vld [vmem:[%s8538_s15 + $0x5e0] ss:$16 sps:$4 sm:$0xff]  }
 0xa71   : > { %4493 = vmatpush1.bf16.msra.mxu1 %v6654_v20  ;;  %4330 = vmatprep.subr.bf16.mxu0 %v6659_v63  ;;  %v6738_v20 = vld [vmem:[%s8538_s15 + $0x5e8] ss:$16 sps:$4 sm:$0xff]   ;;  %v2696_v63 = vmax.f32 %v8958_v53, 0.0 }
 0xa72   : > { %4494 = vmatprep.subr.bf16.mxu1 %v6662_v26  ;;  %v6743_v26 = vld [vmem:[%s8538_s15 + $0x604] ss:$16 sps:$4 sm:$0xff]  }
 0xa74   : > { %4331 = vmatpush1.bf16.msra.mxu0 %v6657_v15  ;;  %v6746_v15 = vld [vmem:[%s8538_s15 + $0x60c] ss:$16 sps:$4 sm:$0xff]  }
 0xa75   : > { %4495 = vmatpush1.bf16.msra.mxu1 %v6660_v39  ;;  %4332 = vmatprep.subr.bf16.mxu0 %v6665_v30  ;;  %v2699_v39 = vmax.f32 %v8987_v13, 0.0  ;;  %v6741_v30 = vld [vmem:[%s8538_s15 + $0x600] ss:$16 sps:$4 sm:$0xff]  }
 0xa76   : > { %4496 = vmatprep.subr.bf16.mxu1 %v6668_v33  ;;  %v2704_v33 = vpack.c.bf16 %v2696_v63, %v2696_v63  ;;  %v6747_v13 = vld [vmem:[%s8538_s15 + $0x620] ss:$16 sps:$4 sm:$0xff]  }
 0xa77   : > { %v2707_v53 = vpack.c.bf16 %v2699_v39, %v2699_v39  ;;  %v6819_v63 = vld [vmem:[%s8538_s15 + $0x7a0] ss:$16 sps:$4 sm:$0xff]   ;;  %v6830_v39 = vld [vmem:[%s8538_s15 + $0x7cc] ss:$16 sps:$4 sm:$0xff]  }
 0xa78   : > { %4333 = vmatpush1.bf16.msra.mxu0 %v6663_v34  ;;  %v6744_v34 = vld [vmem:[%s8538_s15 + $0x608] ss:$16 sps:$4 sm:$0xff]  }
 0xa79   : > { %4497 = vmatpush1.bf16.msra.mxu1 %v6666_v46  ;;  %4334 = vmatprep.subr.bf16.mxu0 %v6671_v24  ;;  %v6749_v46 = vld [vmem:[%s8538_s15 + $0x624] ss:$16 sps:$4 sm:$0xff]   ;;  %v6752_v24 = vld [vmem:[%s8538_s15 + $0x62c] ss:$16 sps:$4 sm:$0xff]  }
 0xa7a   : > { %4498 = vmatprep.subr.bf16.mxu1 %v6674_v35  ;;  %v6750_v35 = vld [vmem:[%s8538_s15 + $0x628] ss:$16 sps:$4 sm:$0xff]  }
 0xa7c   : > { %4335 = vmatpush1.bf16.msra.mxu0 %v6669_v21  ;;  %v6755_v21 = vld [vmem:[%s8538_s15 + $0x644] ss:$16 sps:$4 sm:$0xff]  }
 0xa7d   : > { %4499 = vmatpush1.bf16.msra.mxu1 %v6672_v37  ;;  %4336 = vmatprep.subr.bf16.mxu0 %v6677_v57  ;;  %v6758_v37 = vld [vmem:[%s8538_s15 + $0x64c] ss:$16 sps:$4 sm:$0xff]   ;;  %v6753_v57 = vld [vmem:[%s8538_s15 + $0x640] ss:$16 sps:$4 sm:$0xff]  }
 0xa7e   : > { %4500 = vmatprep.subr.bf16.mxu1 %v6680_v22  ;;  %v6756_v22 = vld [vmem:[%s8538_s15 + $0x648] ss:$16 sps:$4 sm:$0xff]  }
 0xa80   : > { %4337 = vmatpush1.bf16.msra.mxu0 %v6675_v47  ;;  %v6761_v47 = vld [vmem:[%s8538_s15 + $0x664] ss:$16 sps:$4 sm:$0xff]  }
 0xa81   : > { %4501 = vmatpush1.bf16.msra.mxu1 %v6678_v38  ;;  %4338 = vmatprep.subr.bf16.mxu0 %v6683_v32  ;;  %v6764_v38 = vld [vmem:[%s8538_s15 + $0x66c] ss:$16 sps:$4 sm:$0xff]   ;;  %v6759_v32 = vld [vmem:[%s8538_s15 + $0x660] ss:$16 sps:$4 sm:$0xff]  }
 0xa82   : > { %4502 = vmatprep.subr.bf16.mxu1 %v6686_v42  ;;  %v6762_v42 = vld [vmem:[%s8538_s15 + $0x668] ss:$16 sps:$4 sm:$0xff]  }
 0xa84   : > { %4339 = vmatpush1.bf16.msra.mxu0 %v6681_v43  ;;  %v6767_v43 = vld [vmem:[%s8538_s15 + $0x684] ss:$16 sps:$4 sm:$0xff]  }
 0xa85   : > { %4503 = vmatpush1.bf16.msra.mxu1 %v6684_v44  ;;  %4340 = vmatprep.subr.bf16.mxu0 %v6689_v2  ;;  %v6770_v44 = vld [vmem:[%s8538_s15 + $0x68c] ss:$16 sps:$4 sm:$0xff]   ;;  %v6765_v2 = vld [vmem:[%s8538_s15 + $0x680] ss:$16 sps:$4 sm:$0xff]  }
 0xa86   : > { %4504 = vmatprep.subr.bf16.mxu1 %v6692_v48  ;;  %v6768_v48 = vld [vmem:[%s8538_s15 + $0x688] ss:$16 sps:$4 sm:$0xff]  }
 0xa88   : > { %4341 = vmatpush1.bf16.msra.mxu0 %v6687_v49  ;;  %v6773_v49 = vld [vmem:[%s8538_s15 + $0x6a4] ss:$16 sps:$4 sm:$0xff]  }
 0xa89   : > { %4505 = vmatpush1.bf16.msra.mxu1 %v6690_v51  ;;  %4342 = vmatprep.subr.bf16.mxu0 %v6695_v52  ;;  %v6776_v51 = vld [vmem:[%s8538_s15 + $0x6ac] ss:$16 sps:$4 sm:$0xff]   ;;  %v6771_v52 = vld [vmem:[%s8538_s15 + $0x6a0] ss:$16 sps:$4 sm:$0xff]  }
 0xa8a   : > { %4506 = vmatprep.subr.bf16.mxu1 %v6698_v40  ;;  %v6774_v40 = vld [vmem:[%s8538_s15 + $0x6a8] ss:$16 sps:$4 sm:$0xff]  }
 0xa8c   : > { %4343 = vmatpush1.bf16.msra.mxu0 %v6693_v58  ;;  %v6779_v58 = vld [vmem:[%s8538_s15 + $0x6c4] ss:$16 sps:$4 sm:$0xff]  }
 0xa8d   : > { %4507 = vmatpush1.bf16.msra.mxu1 %v6696_v60  ;;  %4344 = vmatprep.subr.bf16.mxu0 %v6701_v17  ;;  %v6782_v60 = vld [vmem:[%s8538_s15 + $0x6cc] ss:$16 sps:$4 sm:$0xff]   ;;  %v6777_v17 = vld [vmem:[%s8538_s15 + $0x6c0] ss:$16 sps:$4 sm:$0xff]  }
 0xa8e   : > { %4508 = vmatprep.subr.bf16.mxu1 %v6704_v50  ;;  %v6780_v50 = vld [vmem:[%s8538_s15 + $0x6c8] ss:$16 sps:$4 sm:$0xff]  }
 0xa90   : > { %4345 = vmatpush1.bf16.msra.mxu0 %v6699_v41  ;;  %v6785_v41 = vld [vmem:[%s8538_s15 + $0x6e4] ss:$16 sps:$4 sm:$0xff]  }
 0xa91   : > { %4509 = vmatpush1.bf16.msra.mxu1 %v6702_v12  ;;  %4346 = vmatprep.subr.bf16.mxu0 %v6707_v62  ;;  %v6788_v12 = vld [vmem:[%s8538_s15 + $0x6ec] ss:$16 sps:$4 sm:$0xff]   ;;  %v6783_v62 = vld [vmem:[%s8538_s15 + $0x6e0] ss:$16 sps:$4 sm:$0xff]  }
 0xa92   : > { %4510 = vmatprep.subr.bf16.mxu1 %v6710_v54  ;;  %v6786_v54 = vld [vmem:[%s8538_s15 + $0x6e8] ss:$16 sps:$4 sm:$0xff]  }
 0xa94   : > { %4347 = vmatpush1.bf16.msra.mxu0 %v6705_v59  ;;  %v6791_v59 = vld [vmem:[%s8538_s15 + $0x704] ss:$16 sps:$4 sm:$0xff]  }
 0xa95   : > { %4511 = vmatpush1.bf16.msra.mxu1 %v6708_v61  ;;  %4348 = vmatprep.subr.bf16.mxu0 %v6713_v3  ;;  %v6794_v61 = vld [vmem:[%s8538_s15 + $0x70c] ss:$16 sps:$4 sm:$0xff]   ;;  %v6789_v3 = vld [vmem:[%s8538_s15 + $0x700] ss:$16 sps:$4 sm:$0xff]  }
 0xa96   : > { %4512 = vmatprep.subr.bf16.mxu1 %v6716_v6  ;;  %v6792_v6 = vld [vmem:[%s8538_s15 + $0x708] ss:$16 sps:$4 sm:$0xff]  }
 0xa98   : > { %4349 = vmatpush1.bf16.msra.mxu0 %v6711_v4  ;;  %v6797_v4 = vld [vmem:[%s8538_s15 + $0x724] ss:$16 sps:$4 sm:$0xff]  }
 0xa99   : > { %4513 = vmatpush1.bf16.msra.mxu1 %v6714_v36  ;;  %4350 = vmatprep.subr.bf16.mxu0 %v6719_v5  ;;  %v6800_v36 = vld [vmem:[%s8538_s15 + $0x72c] ss:$16 sps:$4 sm:$0xff]   ;;  %v6795_v5 = vld [vmem:[%s8538_s15 + $0x720] ss:$16 sps:$4 sm:$0xff]  }
 0xa9a   : > { %4514 = vmatprep.subr.bf16.mxu1 %v6722_v8  ;;  %v6798_v8 = vld [vmem:[%s8538_s15 + $0x728] ss:$16 sps:$4 sm:$0xff]  }
 0xa9c   : > { %4351 = vmatpush1.bf16.msra.mxu0 %v6717_v9  ;;  %v6803_v9 = vld [vmem:[%s8538_s15 + $0x744] ss:$16 sps:$4 sm:$0xff]  }
 0xa9d   : > { %4515 = vmatpush1.bf16.msra.mxu1 %v6720_v10  ;;  %4352 = vmatprep.subr.bf16.mxu0 %v6725_v11  ;;  %v6806_v10 = vld [vmem:[%s8538_s15 + $0x74c] ss:$16 sps:$4 sm:$0xff]   ;;  %v6801_v11 = vld [vmem:[%s8538_s15 + $0x740] ss:$16 sps:$4 sm:$0xff]  }
 0xa9e   : > { %4516 = vmatprep.subr.bf16.mxu1 %v6728_v0  ;;  %v6804_v0 = vld [vmem:[%s8538_s15 + $0x748] ss:$16 sps:$4 sm:$0xff]  }
 0xaa0   : > { %4353 = vmatpush1.bf16.msra.mxu0 %v6723_v29  ;;  %v6809_v29 = vld [vmem:[%s8538_s15 + $0x764] ss:$16 sps:$4 sm:$0xff]  }
 0xaa1   : > { %4517 = vmatpush1.bf16.msra.mxu1 %v6726_v14  ;;  %4354 = vmatprep.subr.bf16.mxu0 %v6731_v18  ;;  %v6812_v14 = vld [vmem:[%s8538_s15 + $0x76c] ss:$16 sps:$4 sm:$0xff]   ;;  %v6807_v18 = vld [vmem:[%s8538_s15 + $0x760] ss:$16 sps:$4 sm:$0xff]  }
 0xaa2   : > { %4518 = vmatprep.subr.bf16.mxu1 %v6734_v19  ;;  %v6810_v19 = vld [vmem:[%s8538_s15 + $0x768] ss:$16 sps:$4 sm:$0xff]  }
 0xaa4   : > { %4355 = vmatpush1.bf16.msra.mxu0 %v6729_v7  ;;  %v6815_v7 = vld [vmem:[%s8538_s15 + $0x784] ss:$16 sps:$4 sm:$0xff]  }
 0xaa5   : > { %4519 = vmatpush1.bf16.msra.mxu1 %v6732_v23  ;;  %4356 = vmatprep.subr.bf16.mxu0 %v6737_v25  ;;  %v6818_v23 = vld [vmem:[%s8538_s15 + $0x78c] ss:$16 sps:$4 sm:$0xff]   ;;  %v6813_v25 = vld [vmem:[%s8538_s15 + $0x780] ss:$16 sps:$4 sm:$0xff]  }
 0xaa6   : > { %4520 = vmatprep.subr.bf16.mxu1 %v6740_v27  ;;  %v6816_v27 = vld [vmem:[%s8538_s15 + $0x788] ss:$16 sps:$4 sm:$0xff]  }
 0xaa8   : > { %4357 = vmatpush1.bf16.msra.mxu0 %v6735_v45  ;;  %v6821_v45 = vld [vmem:[%s8538_s15 + $0x7a4] ss:$16 sps:$4 sm:$0xff]  }
 0xaa9   : > { %4521 = vmatpush1.bf16.msra.mxu1 %v6738_v20  ;;  %4367 = vmatprep.subr.bf16.mxu0 %v6743_v26  ;;  %v6824_v20 = vld [vmem:[%s8538_s15 + $0x7ac] ss:$16 sps:$4 sm:$0xff]   ;;  %v6822_v26 = vld [vmem:[%s8538_s15 + $0x7a8] ss:$16 sps:$4 sm:$0xff]  }
 0xaaa   : > { %4531 = vmatprep.subr.bf16.mxu1 %v6746_v15  ;;  %v6827_v15 = vld [vmem:[%s8538_s15 + $0x7c4] ss:$16 sps:$4 sm:$0xff]  }
 0xaab   : > { %4359 = vmatmul.mubr.bf16.vlgmr.msra.gmra.mrb[16].mxu0 %v2704_v33 }
 0xaac   : > { %4523 = vmatmul.mubr.bf16.vlgmr.msra.gmra.mrb[16].mxu1 %v2704_v33  ;;  %4368 = vmatpush1.bf16.msra.mxu0 %v6741_v30  ;;  %v6825_v30 = vld [vmem:[%s8538_s15 + $0x7c0] ss:$16 sps:$4 sm:$0xff]   ;;  %v6828_v33 = vld [vmem:[%s8538_s15 + $0x7c8] ss:$16 sps:$4 sm:$0xff]  }
 0xaad   : > { %4399 = vmatprep.mubr.bf16.mxu0 %v2707_v53  ;;  %4532 = vmatpush1.bf16.msra.mxu1 %v6744_v34  ;;  %v6833_v34 = vld [vmem:[%s8538_s15 + $0x7e4] ss:$16 sps:$4 sm:$0xff]  }
 0xaae   : > { %4563 = vmatprep.mubr.bf16.mxu1 %v2707_v53  ;;  %4369 = vmatprep.subr.bf16.mxu0 %v6749_v46  ;;  %v6836_v46 = vld [vmem:[%s8538_s15 + $0x7ec] ss:$16 sps:$4 sm:$0xff]   ;;  %v6831_v53 = vld [vmem:[%s8538_s15 + $0x7e0] ss:$16 sps:$4 sm:$0xff]  }
 0xaaf   : > { %4533 = vmatprep.subr.bf16.mxu1 %v6752_v24  ;;  %v6834_v24 = vld [vmem:[%s8538_s15 + $0x7e8] ss:$16 sps:$4 sm:$0xff]   ;;  %s1296_s15 = scalar_lea.vmem [#allocation34], %s8462_s14 }
 0xab0   : > { %4370 = vmatpush1.bf16.msra.mxu0 %v6747_v13  ;;  %v2698_v13 = vmax.f32 %v8965_v1, 0.0  ;;  %v6841_v1 = vld [vmem:[%s8693_s2 + $0x48] sm:$0xff]  }
 0xab1   : > { %4534 = vmatpush1.bf16.msra.mxu1 %v6750_v35  ;;  %4371 = vmatprep.subr.bf16.mxu0 %v6755_v21  ;;  %v6837_v21 = vld [vmem:[%s8693_s2 + $0x40] sm:$0xff]  }
 0xab2   : > { %4535 = vmatprep.subr.bf16.mxu1 %v6758_v37  ;;  %v2706_v35 = vpack.c.bf16 %v2698_v13, %v2698_v13  ;;  %v6838_v37 = vld [vmem:[%s8693_s2 + $0xc0] sm:$0xff]  }
 0xab4   : > { %4372 = vmatpush1.bf16.msra.mxu0 %v6753_v57  ;;  %v6839_v57 = vld [vmem:[%s8693_s2] sm:$0xff]  }
 0xab5   : > { %4536 = vmatpush1.bf16.msra.mxu1 %v6756_v22  ;;  %4373 = vmatprep.subr.bf16.mxu0 %v6761_v47  ;;  %v6840_v22 = vld [vmem:[%s8693_s2 + $0x80] sm:$0xff]   ;;  %v6842_v47 = vld [vmem:[%s8693_s2 + $0xc8] sm:$0xff]  }
 0xab6   : > { %4537 = vmatprep.subr.bf16.mxu1 %v6764_v38  ;;  %v6843_v38 = vld [vmem:[%s8693_s2 + $0x8] sm:$0xff]  }
 0xab8   : > { %4374 = vmatpush1.bf16.msra.mxu0 %v6759_v32  ;;  %v6844_v32 = vld [vmem:[%s8693_s2 + $0x88] sm:$0xff]  }
 0xab9   : > { %4538 = vmatpush1.bf16.msra.mxu1 %v6762_v42  ;;  %4375 = vmatprep.subr.bf16.mxu0 %v6767_v43  ;;  %v6845_v42 = vld [vmem:[%s8693_s2 + $0x50] sm:$0xff]  }
 0xaba   : > { %4539 = vmatprep.subr.bf16.mxu1 %v6770_v44  ;;  %v6846_v43 = vld [vmem:[%s8693_s2 + $0xd0] sm:$0xff]  }
 0xabb   : > { %v6847_v44 = vld [vmem:[%s8693_s2 + $0x10] sm:$0xff]  }
 0xabc   : > { %4376 = vmatpush1.bf16.msra.mxu0 %v6765_v2  ;;  %v6848_v2 = vld [vmem:[%s8693_s2 + $0x90] sm:$0xff]  }
 0xabd   : > { %4540 = vmatpush1.bf16.msra.mxu1 %v6768_v48  ;;  %4377 = vmatprep.subr.bf16.mxu0 %v6773_v49  ;;  %v6849_v48 = vld [vmem:[%s8693_s2 + $0x58] sm:$0xff]  }
 0xabe   : > { %4541 = vmatprep.subr.bf16.mxu1 %v6776_v51  ;;  %v6850_v49 = vld [vmem:[%s8693_s2 + $0xd8] sm:$0xff]  }
 0xabf   : > { %v6851_v51 = vld [vmem:[%s8693_s2 + $0x18] sm:$0xff]  }
 0xac0   : > { %4378 = vmatpush1.bf16.msra.mxu0 %v6771_v52  ;;  %v6852_v52 = vld [vmem:[%s8693_s2 + $0x98] sm:$0xff]  }
 0xac1   : > { %4542 = vmatpush1.bf16.msra.mxu1 %v6774_v40  ;;  %4379 = vmatprep.subr.bf16.mxu0 %v6779_v58  ;;  %v6853_v40 = vld [vmem:[%s8693_s2 + $0x60] sm:$0xff]  }
 0xac2   : > { %4543 = vmatprep.subr.bf16.mxu1 %v6782_v60  ;;  %v6854_v58 = vld [vmem:[%s8693_s2 + $0xe0] sm:$0xff]  }
 0xac3   : > { %v6855_v60 = vld [vmem:[%s8693_s2 + $0x20] sm:$0xff]  }
 0xac4   : > { %4380 = vmatpush1.bf16.msra.mxu0 %v6777_v17  ;;  %v6856_v17 = vld [vmem:[%s8693_s2 + $0xa0] sm:$0xff]  }
 0xac5   : > { %4544 = vmatpush1.bf16.msra.mxu1 %v6780_v50  ;;  %4381 = vmatprep.subr.bf16.mxu0 %v6785_v41  ;;  %v6857_v50 = vld [vmem:[%s8693_s2 + $0x68] sm:$0xff]  }
 0xac6   : > { %4545 = vmatprep.subr.bf16.mxu1 %v6788_v12  ;;  %v6858_v41 = vld [vmem:[%s8693_s2 + $0xe8] sm:$0xff]  }
 0xac7   : > { %v6859_v12 = vld [vmem:[%s8693_s2 + $0x28] sm:$0xff]  }
 0xac8   : > { %4382 = vmatpush1.bf16.msra.mxu0 %v6783_v62  ;;  %v6860_v62 = vld [vmem:[%s8693_s2 + $0xa8] sm:$0xff]  }
 0xac9   : > { %4546 = vmatpush1.bf16.msra.mxu1 %v6786_v54  ;;  %4383 = vmatprep.subr.bf16.mxu0 %v6791_v59  ;;  %v6861_v54 = vld [vmem:[%s8693_s2 + $0x70] sm:$0xff]  }
 0xaca   : > { %4547 = vmatprep.subr.bf16.mxu1 %v6794_v61  ;;  %v6862_v59 = vld [vmem:[%s8693_s2 + $0xf0] sm:$0xff]  }
 0xacb   : > { %v6863_v61 = vld [vmem:[%s8693_s2 + $0x30] sm:$0xff]  }
 0xacc   : > { %4384 = vmatpush1.bf16.msra.mxu0 %v6789_v3  ;;  %v6864_v3 = vld [vmem:[%s8693_s2 + $0xb0] sm:$0xff]  }
 0xacd   : > { %4548 = vmatpush1.bf16.msra.mxu1 %v6792_v6  ;;  %4385 = vmatprep.subr.bf16.mxu0 %v6797_v4  ;;  %v6865_v6 = vld [vmem:[%s8693_s2 + $0x78] sm:$0xff]  }
 0xace   : > { %4549 = vmatprep.subr.bf16.mxu1 %v6800_v36  ;;  %v6866_v4 = vld [vmem:[%s8693_s2 + $0xf8] sm:$0xff]  }
 0xacf   : > { %v6867_v36 = vld [vmem:[%s8693_s2 + $0x38] sm:$0xff]  }
 0xad0   : > { %4386 = vmatpush1.bf16.msra.mxu0 %v6795_v5  ;;  %v6868_v5 = vld [vmem:[%s8693_s2 + $0xb8] sm:$0xff]   ;;  %s5117_s2 = scalar_lea.sflag [#allocation4], %s8462_s14 }
 0xad1   : > { %4550 = vmatpush1.bf16.msra.mxu1 %v6798_v8  ;;  %4387 = vmatprep.subr.bf16.mxu0 %v6803_v9 }
 0xad2   : > { %4551 = vmatprep.subr.bf16.mxu1 %v6806_v10 }
 0xad4   : > { %4388 = vmatpush1.bf16.msra.mxu0 %v6801_v11 }
 0xad5   : > { %4552 = vmatpush1.bf16.msra.mxu1 %v6804_v0  ;;  %4389 = vmatprep.subr.bf16.mxu0 %v6809_v29 }
 0xad6   : > { %4553 = vmatprep.subr.bf16.mxu1 %v6812_v14 }
 0xad8   : > { %4390 = vmatpush1.bf16.msra.mxu0 %v6807_v18 }
 0xad9   : > { %4554 = vmatpush1.bf16.msra.mxu1 %v6810_v19  ;;  %4391 = vmatprep.subr.bf16.mxu0 %v6815_v7 }
 0xada   : > { %4555 = vmatprep.subr.bf16.mxu1 %v6818_v23 }
 0xadc   : > { %4392 = vmatpush1.bf16.msra.mxu0 %v6813_v25 }
 0xadd   : > { %4556 = vmatpush1.bf16.msra.mxu1 %v6816_v27  ;;  %4393 = vmatprep.subr.bf16.mxu0 %v6821_v45 }
 0xade   : > { %4557 = vmatprep.subr.bf16.mxu1 %v6824_v20 }
 0xae0   : > { %4394 = vmatpush1.bf16.msra.mxu0 %v6819_v63 }
 0xae1   : > { %4558 = vmatpush1.bf16.msra.mxu1 %v6822_v26  ;;  %4395 = vmatprep.subr.bf16.mxu0 %v6827_v15 }
 0xae2   : > { %4559 = vmatprep.subr.bf16.mxu1 %v6830_v39 }
 0xae4   : > { %4396 = vmatpush1.bf16.msra.mxu0 %v6825_v30 }
 0xae5   : > { %4560 = vmatpush1.bf16.msra.mxu1 %v6828_v33  ;;  %4397 = vmatprep.subr.bf16.mxu0 %v6833_v34 }
 0xae6   : > { %4561 = vmatprep.subr.bf16.mxu1 %v6836_v46 }
 0xae8   : > { %4398 = vmatpush1.bf16.msra.mxu0 %v6831_v53 }
 0xae9   : > { %4562 = vmatpush1.bf16.msra.mxu1 %v6834_v24  ;;  %6049 = vmatprep.subr.bf16.mxu0 %v6837_v21 }
 0xaea   : > { %6071 = vmatprep.subr.bf16.mxu1 %v6838_v37 }
 0xaeb   : > { %4400 = vmatmul.mubr.bf16.vlgmr.msra.gmra.mrb[16].mxu0 %v2706_v35 }
 0xaec   : > { %4564 = vmatmul.mubr.bf16.vlgmr.msra.gmra.mrb[16].mxu1 %v2706_v35  ;;  %6050 = vmatpush3.bf16.msra.mxu0 %v6839_v57 }
 0xaed   : > { %6072 = vmatpush3.bf16.msra.mxu1 %v6840_v22  ;;  %6051 = vmatprep.subr.bf16.mxu0 %v6841_v1 }
 0xaee   : > { %6073 = vmatprep.subr.bf16.mxu1 %v6842_v47 }
 0xaf0   : > { %6052 = vmatpush3.bf16.msra.mxu0 %v6843_v38 }
 0xaf1   : > { %6074 = vmatpush3.bf16.msra.mxu1 %v6844_v32  ;;  %6053 = vmatprep.subr.bf16.mxu0 %v6845_v42 }
 0xaf2   : > { %6075 = vmatprep.subr.bf16.mxu1 %v6846_v43 }
 0xaf4   : > { %6054 = vmatpush3.bf16.msra.mxu0 %v6847_v44 }
 0xaf5   : > { %6076 = vmatpush3.bf16.msra.mxu1 %v6848_v2  ;;  %6055 = vmatprep.subr.bf16.mxu0 %v6849_v48 }
 0xaf6   : > { %6077 = vmatprep.subr.bf16.mxu1 %v6850_v49 }
 0xaf8   : > { %6056 = vmatpush3.bf16.msra.mxu0 %v6851_v51 }
 0xaf9   : > { %6078 = vmatpush3.bf16.msra.mxu1 %v6852_v52  ;;  %6057 = vmatprep.subr.bf16.mxu0 %v6853_v40 }
 0xafa   : > { %6079 = vmatprep.subr.bf16.mxu1 %v6854_v58 }
 0xafc   : > { %6058 = vmatpush3.bf16.msra.mxu0 %v6855_v60 }
 0xafd   : > { %6080 = vmatpush3.bf16.msra.mxu1 %v6856_v17  ;;  %6059 = vmatprep.subr.bf16.mxu0 %v6857_v50 }
 0xafe   : > { %6081 = vmatprep.subr.bf16.mxu1 %v6858_v41 }
 0xb00   : > { %6060 = vmatpush3.bf16.msra.mxu0 %v6859_v12 }
 0xb01   : > { %6082 = vmatpush3.bf16.msra.mxu1 %v6860_v62  ;;  %6061 = vmatprep.subr.bf16.mxu0 %v6861_v54 }
 0xb02   : > { %6083 = vmatprep.subr.bf16.mxu1 %v6862_v59 }
 0xb04   : > { %6062 = vmatpush3.bf16.msra.mxu0 %v6863_v61 }
 0xb05   : > { %6084 = vmatpush3.bf16.msra.mxu1 %v6864_v3  ;;  %6063 = vmatprep.subr.bf16.mxu0 %v6865_v6 }
 0xb06   : > { %6085 = vmatprep.subr.bf16.mxu1 %v6866_v4 }
 0xb08   : > { %6064 = vmatpush3.bf16.msra.mxu0 %v6867_v36 }
 0xb09   : > { %6086 = vmatpush3.bf16.msra.mxu1 %v6868_v5 }
 0xbbe   : > { %v9188_v8 = vpop.f32.mrb[16].mxu0 }
 0xbbf   : > { %v4572_v9 = vmul.f32 %v9188_v8, %v8598_v31  ;;  %v9192_v10 = vpop.f32.mrb[16].mxu1  ;;  %v9194_v11 = vpop.f32.mrb[17].mxu0 }
 0xbc0   : > { %v4574_v0 = vmul.f32 %v9192_v10, %v8598_v31  ;;  %v4573_v29 = vmul.f32 %v9194_v11, %v8598_v31  ;;  %v9200_v14 = vpop.f32.mrb[17].mxu1  ;;  %v4405_v18 = vpop.f32.mrb[18].mxu0 }
 0xbc1   : > { %v4576_v19 = vrot.slane %v4572_v9, 4  ;;  %v4604_v7 = vmul.f32 %v4572_v9, %v9188_v8  ;;  %v4575_v23 = vmul.f32 %v9200_v14, %v8598_v31  ;;  %v4569_v25 = vpop.f32.mrb[18].mxu1  ;;  %v4406_v27 = vpop.f32.mrb[19].mxu0 }
 0xbc2   : > { %v4588_v45 = vrot.slane %v4574_v0, 4  ;;  %v4606_v20 = vmul.f32 %v4574_v0, %v9192_v10  ;;  %v4582_v63 = vrot.slane %v4573_v29, 4  ;;  %v4605_v26 = vmul.f32 %v4573_v29, %v9194_v11  ;;  %v4570_v15 = vpop.f32.mrb[19].mxu1 }
 0xbc3   : > { %v4577_v39 = vadd.f32 %v4576_v19, %v4572_v9  ;;  %v4608_v30 = vrot.slane %v4604_v7, 4  ;;  %v4594_v33 = vrot.slane %v4575_v23, 4  ;;  %v4607_v34 = vmul.f32 %v4575_v23, %v9200_v14 }
 0xbc4   : > { %v4589_v46 = vadd.f32 %v4588_v45, %v4574_v0  ;;  %v4620_v53 = vrot.slane %v4606_v20, 4  ;;  %v4583_v24 = vadd.f32 %v4582_v63, %v4573_v29  ;;  %v4614_v13 = vrot.slane %v4605_v26, 4 }
 0xbc5   : > { %v4578_v35 = vrot.slane %v4577_v39, 2  ;;  %v4609_v21 = vadd.f32 %v4608_v30, %v4604_v7  ;;  %v4595_v37 = vadd.f32 %v4594_v33, %v4575_v23  ;;  %v4626_v57 = vrot.slane %v4607_v34, 4 }
 0xbc6   : > { %v4590_v22 = vrot.slane %v4589_v46, 2  ;;  %v4621_v1 = vadd.f32 %v4620_v53, %v4606_v20  ;;  %v4584_v47 = vrot.slane %v4583_v24, 2  ;;  %v4615_v38 = vadd.f32 %v4614_v13, %v4605_v26 }
 0xbc7   : > { %v4579_v32 = vadd.f32 %v4578_v35, %v4577_v39  ;;  %v4610_v42 = vrot.slane %v4609_v21, 2  ;;  %v4596_v43 = vrot.slane %v4595_v37, 2  ;;  %v4627_v44 = vadd.f32 %v4626_v57, %v4607_v34 }
 0xbc8   : > { %v4591_v2 = vadd.f32 %v4590_v22, %v4589_v46  ;;  %v4622_v48 = vrot.slane %v4621_v1, 2  ;;  %v4585_v49 = vadd.f32 %v4584_v47, %v4583_v24  ;;  %v4616_v51 = vrot.slane %v4615_v38, 2 }
 0xbc9   : > { %v4580_v52 = vrot.slane %v4579_v32, 1  ;;  %v4611_v40 = vadd.f32 %v4610_v42, %v4609_v21  ;;  %v4597_v58 = vadd.f32 %v4596_v43, %v4595_v37  ;;  %v4628_v60 = vrot.slane %v4627_v44, 2 }
 0xbca   : > { %v4592_v17 = vrot.slane %v4591_v2, 1  ;;  %v4623_v50 = vadd.f32 %v4622_v48, %v4621_v1  ;;  %v4586_v41 = vrot.slane %v4585_v49, 1  ;;  %v4617_v12 = vadd.f32 %v4616_v51, %v4615_v38  ;;  %v4664_v38 = vld [vmem:[%s8541_s6] sm:$0xf]  ;;  %s9441_s6 = scalar_lea.vmem [#allocation32], %s8462_s14 }
 0xbcb   : > { %v4581_v62 = vadd.f32 %v4580_v52, %v4579_v32  ;;  %v4612_v54 = vrot.slane %v4611_v40, 1  ;;  %v4598_v59 = vrot.slane %v4597_v58, 1  ;;  %v4629_v61 = vadd.f32 %v4628_v60, %v4627_v44  ;;  %v4690_v32 = vld [vmem:[%s8547_s16] sm:$0xf]  ;;  %s9442_s16 = sld [smem:[#allocation56_spill]] }
 0xbcc   : > { %v4593_v3 = vadd.f32 %v4592_v17, %v4591_v2  ;;  %v4624_v6 = vrot.slane %v4623_v50, 1  ;;  %v4587_v4 = vadd.f32 %v4586_v41, %v4585_v49  ;;  %v4618_v36 = vrot.slane %v4617_v12, 1 }
 0xbcd   : > { %v4600_v5 = vmul.f32 0.25, %v4581_v62  ;;  %v4613_v9 = vadd.f32 %v4612_v54, %v4611_v40  ;;  %v4599_v0 = vadd.f32 %v4598_v59, %v4597_v58  ;;  %v4630_v29 = vrot.slane %v4629_v61, 1 }
 0xbce   : > { %v4602_v18 = vmul.f32 0.25, %v4593_v3  ;;  %v4625_v19 = vadd.f32 %v4624_v6, %v4623_v50  ;;  %v4601_v7 = vmul.f32 0.25, %v4587_v4  ;;  %v4619_v23 = vadd.f32 %v4618_v36, %v4617_v12 }
 0xbcf   : > { %v4632_v25 = vmul.f32 0.25, %v4613_v9  ;;  %v4636_v27 = vmul.f32 %v4600_v5, %v4600_v5  ;;  %v4603_v45 = vmul.f32 0.25, %v4599_v0  ;;  %v4631_v30 = vadd.f32 %v4630_v29, %v4629_v61 }
 0xbd0   : > { %v4634_v20 = vmul.f32 0.25, %v4625_v19  ;;  %v4638_v63 = vmul.f32 %v4602_v18, %v4602_v18  ;;  %v4633_v26 = vmul.f32 0.25, %v4619_v23  ;;  %v4637_v39 = vmul.f32 %v4601_v7, %v4601_v7 }
 0xbd1   : > { %v4640_v15 = vsub.f32 %v4632_v25, %v4636_v27  ;;  %v4639_v34 = vmul.f32 %v4603_v45, %v4603_v45  ;;  %v4635_v24 = vmul.f32 0.25, %v4631_v30  ;;  %v4648_v42 = vsub.f32 %v9188_v8, %v4600_v5  ;;  %p9444_p13 = scmp.ne.s32.totalorder %s9442_s16, 0 }
 0xbd2   : > { %v4642_v33 = vsub.f32 %v4634_v20, %v4638_v63  ;;  %v4641_v53 = vsub.f32 %v4633_v26, %v4637_v39  ;;  %v4669_v43 = vrot.slane %v4664_v38, %v8630_v16  ;;  %v4650_v2 = vsub.f32 %v9192_v10, %v4602_v18 }
 0xbd3   : > { %v4644_v46 = vmax.f32 %v4640_v15, 0.0  ;;  %v4643_v37 = vsub.f32 %v4635_v24, %v4639_v34  ;;  %v4677_v48 = vrot.slane %v4664_v38, %v8798_v55  ;;  %v4649_v52 = vsub.f32 %v9194_v11, %v4601_v7  ;;  %p7499_p8 = pnand %p7498_p1, %p9444_p13 }
 0xbd4   : > { %v4646_v13 = vmax.f32 %v4642_v33, 0.0  ;;  %v4645_v21 = vmax.f32 %v4641_v53, 0.0  ;;  %v4673_v40 = vrot.slane %v4664_v38, %v8635_v28  ;;  %v4695_v58 = vrot.slane %v4690_v32, %v8630_v16 }
 0xbd5   : > { %v4652_v35 = vadd.f32 1e-05, %v4644_v46  ;;  %v4647_v1 = vmax.f32 %v4643_v37, 0.0  ;;  %v4681_v50 = vrot.slane %v4664_v38, %v8805_v56  ;;  %v4703_v8 = vrot.slane %v4690_v32, %v8798_v55  ;;  %p7500_p2 = pneg %p7499_p8 }
 0xbd6   : > { %v4654_v57 = vadd.f32 1e-05, %v4646_v13  ;;  %v4653_v22 = vadd.f32 1e-05, %v4645_v21  ;;  %v4651_v10 = vsub.f32 %v9200_v14, %v4603_v45  ;;  %v4699_v62 = vrot.slane %v4690_v32, %v8635_v28 }
 0xbd7   : > { %6891 = vrsqrt.f32 %v4652_v35  ;;  %v4655_v47 = vadd.f32 1e-05, %v4647_v1  ;;  %v4707_v3 = vrot.slane %v4690_v32, %v8805_v56  ;;  %p7507_p5 = pnand %p7506_p0, %p7500_p2 }
 0xbd8   : > { %6893 = vrsqrt.f32 %v4654_v57 }
 0xbd9   : > { %6895 = vrsqrt.f32 %v4653_v22 }
 0xbda   : > { %6897 = vrsqrt.f32 %v4655_v47 }
 0xbe1   : > { %v6892_v44 = vpop.eup %6891 }
 0xbe2   : > { %v6894_v49 = vpop.eup %6893  ;;  %v4660_v51 = vmul.f32 %v6892_v44, %v4648_v42 }
 0xbe3   : > { %v6896_v60 = vpop.eup %6895  ;;  %v4662_v17 = vmul.f32 %v6894_v49, %v4650_v2 }
 0xbe4   : > { %v4686_v41 = vmul.f32 %v4669_v43, %v4660_v51  ;;  %v4661_v12 = vmul.f32 %v6896_v60, %v4649_v52  ;;  %v6898_v54 = vpop.eup %6897  ;;  %v5967_v52 = vld [vmem:[%s9441_s6] ss:$0 sm:$0xff] }
 0xbe5   : > { %v4688_v59 = vmul.f32 %v4677_v48, %v4662_v17  ;;  %v4663_v61 = vmul.f32 %v6898_v54, %v4651_v10 }
 0xbe6   : > { %v4687_v11 = vmul.f32 %v4673_v40, %v4661_v12  ;;  %v4712_v6 = vadd.f32 %v4695_v58, %v4686_v41  ;;  %v5968_v58 = vld [vmem:[%s1296_s15] ss:$0 sm:$0xff] }
 0xbe7   : > { %v4714_v16 = vadd.f32 %v4703_v8, %v4688_v59  ;;  %v4689_v36 = vmul.f32 %v4681_v50, %v4663_v61 }
 0xbe8   : > { %v4713_v4 = vadd.f32 %v4699_v62, %v4687_v11  ;;  %v4716_v5 = vmax.f32 %v4712_v6, 0.0 }
 0xbe9   : > { %v4715_v0 = vadd.f32 %v4707_v3, %v4689_v36  ;;  %v4718_v55 = vmax.f32 %v4714_v16, 0.0 }
 0xbea   : > { %v4717_v9 = vmax.f32 %v4713_v4, 0.0  ;;  %v4720_v19 = vpack.c.bf16 %v4716_v5, %v4716_v5 }
 0xbeb   : > { %v4719_v18 = vmax.f32 %v4715_v0, 0.0  ;;  %v4722_v28 = vpack.c.bf16 %v4718_v55, %v4718_v55 }
 0xbec   : > { %v4721_v29 = vpack.c.bf16 %v4717_v9, %v4717_v9 }
 0xbed   : > { %v4723_v14 = vpack.c.bf16 %v4719_v18, %v4719_v18 }
 0xbee   : > { %5012 = vmatprep.mubr.bf16.mxu0 %v4721_v29 }
 0xbef   : > { %5013 = vmatmul.mubr.bf16.vlgmr.msra.gmra.mrb[20].mxu0 %v4720_v19  ;;  %5052 = vmatprep.mubr.bf16.mxu1 %v4723_v14 }
 0xbf0   : > { %5053 = vmatmul.mubr.bf16.vlgmr.msra.gmra.mrb[20].mxu1 %v4722_v28 }
 0xcc2   : > { %v6065_v7 = vpop.f32.mrb[20].mxu0 }
 0xcc3   : > { %v6066_v23 = vpop.f32.mrb[21].mxu0  ;;  %v6087_v56 = vpop.f32.mrb[20].mxu1 }
 0xcc4   : > { %v6067_v25 = vadd.f32 %v6066_v23, %v6065_v7  ;;  %v6068_v27 = vpop.f32.mrb[22].mxu0  ;;  %v6088_v45 = vpop.f32.mrb[21].mxu1 }
 0xcc5   : > { %v6069_v20 = vpop.f32.mrb[23].mxu0  ;;  %v6089_v63 = vadd.f32 %v6088_v45, %v6087_v56  ;;  %v6090_v26 = vpop.f32.mrb[22].mxu1 }
 0xcc6   : > { %v6091_v15 = vpop.f32.mrb[23].mxu1 }
 0xcc7   : > { %v5055_v39 = vadd.f32 %v6089_v63, %v6067_v25 }
 0xcc9   : > { %v5060_v30 = vmul.f32 %v5055_v39, %v8598_v31 }
 0xccb   : > { %v5062_v33 = vsel %vm5061_vm5, %v5060_v30, 0.0  ;;  %v5070_v34 = vmul.f32 %v5060_v30, %v5055_v39 }
 0xccc   : > { %v5063_v46 = vrot.slane %v5062_v33, 4 }
 0xccd   : > { %v5071_v53 = vsel %vm5061_vm5, %v5070_v34, 0.0 }
 0xcce   : > { %v5064_v24 = vadd.f32 %v5063_v46, %v5062_v33  ;;  %v5072_v13 = vrot.slane %v5071_v53, 4 }
 0xcd0   : > { %v5065_v35 = vrot.slane %v5064_v24, 2  ;;  %v5073_v21 = vadd.f32 %v5072_v13, %v5071_v53 }
 0xcd2   : > { %v5066_v37 = vadd.f32 %v5065_v35, %v5064_v24  ;;  %v5074_v57 = vrot.slane %v5073_v21, 2 }
 0xcd4   : > { %v5067_v22 = vrot.slane %v5066_v37, 1  ;;  %v5075_v1 = vadd.f32 %v5074_v57, %v5073_v21 }
 0xcd6   : > { %v5068_v47 = vadd.f32 %v5067_v22, %v5066_v37  ;;  %v5076_v38 = vrot.slane %v5075_v1, 1 }
 0xcd8   : > { %v5069_v32 = vmul.f32 0.25, %v5068_v47  ;;  %v5077_v31 = vadd.f32 %v5076_v38, %v5075_v1 }
 0xcda   : > { %v5078_v42 = vmul.f32 0.25, %v5077_v31  ;;  %v5079_v43 = vmul.f32 %v5069_v32, %v5069_v32  ;;  %v5082_v49 = vsub.f32 %v5055_v39, %v5069_v32 }
 0xcdc   : > { %v5080_v44 = vsub.f32 %v5078_v42, %v5079_v43 }
 0xcde   : > { %v5081_v2 = vmax.f32 %v5080_v44, 0.0 }
 0xce0   : > { %v5083_v48 = vadd.f32 1e-05, %v5081_v2 }
 0xce2   : > { %6899 = vrsqrt.f32 %v5083_v48 }
 0xcec   : > { %v6900_v51 = vpop.eup %6899 }
 0xced   : > { %v5085_v40 = vmul.f32 %v6900_v51, %v5082_v49 }
 0xcef   : > { %v5093_v60 = vmul.f32 %v5967_v52, %v5085_v40 }
 0xcf1   : > { %v5101_v17 = vadd.f32 %v5968_v58, %v5093_v60 }
 0xcf3   : > { %v5969_v50 = vmul.f32 -1.442695, %v5101_v17 }
 0xcf5   : > { %6901 = vpow2.f32 %v5969_v50 }
 0xcff   : > { %v6902_v8 = vpop.eup %6901 }
 0xd00   : > { %v5105_v41 = vadd.f32 1.0, %v6902_v8 }
 0xd02   : > { %6903 = vrcp.f32 %v5105_v41 }
 0xd0c   : > { %v6904_v12 = vpop.eup %6903 }
 0xd0d   : > { %v5970_v10 = vadd.f32 -0.5, %v6904_v12 }
 0xd0f   : > { %v5971_v62 = vmul.f32 -1.442695, %v5970_v10 }
 0xd11   : > { %6905 = vpow2.f32 %v5971_v62 }
 0xd1b   : > { %v6906_v54 = vpop.eup %6905 }
 0xd1c   : > { %v5112_v59 = vadd.f32 1.0, %v6906_v54 }
 0xd1e   : > { %6907 = vrcp.f32 %v5112_v59 }
 0xd28   : > { %v6908_v61 = vpop.eup %6907 }
 0xd29   : > { %5115 = vst.msk [vmem:[%s1449_s28] sm:$0xff] %vm5061_vm5, %v6908_v61 }
 0xd2a   : > { %7510 = shalt.err (!%p7507_p5)
}
 0xd2b   : > { %s7511_s14 = scalar_lea.hbm %s9233_s1, 128  ;;  %s7515_s0 = scalar_lea.hbm %s9443_s27, 256 }
 0xd2c   : > { %p7512_p11 = scmp.ne.s32.totalorder %s9233_s1, %s7511_s14  ;;  %p7516_p7 = scmp.lt.u32.totalorder %s9233_s1, %s9443_s27 }
 0xd2d   : > { %p7517_p6 = scmp.lt.u32.totalorder %s7515_s0, %s7511_s14  ;;  %p7519_p1 = scmp.lt.u32.totalorder %s7511_s14, %s9233_s1 }
 0xd2e   : > { %p7513_p3 = pnand %p7512_p11, %p9444_p13 }
 0xd2f   : > { %p7518_p12 = por %p7517_p6, %p7516_p7 }
 0xd30   : > { %p7514_p4 = pneg %p7513_p3 }
 0xd31   : > { %p7520_p8 = por %p7519_p1, %p7518_p12 }
 0xd33   : > { %p7521_p2 = pnand %p7520_p8, %p7514_p4 }
 0xd35   : > { %7524 = shalt.err (!%p7521_p2)
}
 0xd36   : > { %6382 = dma.vmem_to_hbm [thread:$0]  (%p9444_p13), %s9235_s13, 128, %s9233_s1, %s5117_s2  }
 0xd37 PF: > { %s9445_s15 = sld [smem:[#allocation49_spill]]  ;;  %s9446_s22 = sld [smem:[#allocation57_spill]] }
 0xd38   : > { %p9448_p10 = scmp.ge.s32.totalorder %s7607_s30, 2 }
 0xd3d   : > { %s5142_s28 = sand.u32 1, %s9445_s15   ;;  %p9447_p9 = scmp.ne.s32.totalorder %s9446_s22, 0 }
 0xd3e   : > { %s5143_s9 = scalar_lea.sflag [#allocation4], %s5142_s28 }
 0xd3f   : > { %p6395_p0 = pnand %p9448_p10, %p9447_p9 }
 0xd41   : > { %7590 = dma.done.wait (!%p6395_p0), %s5143_s9, 128  }
 0xd42   : > { %7592 = vsyncadd (!%p6395_p0), %s5143_s9, 4294967168  ;;  %s9449_s30 = sld [smem:[#allocation53_spill]]  ;;  %s9450_s29 = sld [smem:[#allocation50_spill]] }
 0xd43   : > { %s9451_s2 = sld [smem:[#allocation51_spill]]  ;;  %s9452_s6 = sld [smem:[#allocation54_spill]] }
 0xd48   : > { %p66_p5 = scmp.ge.s32.totalorder %s9449_s30, 4  }
 0xd4a   :  { %68 = sbr.rel (!%p66_p5) target bundleno = 44 (0x2c), region = 388 }
 0xd51   :  { %5148 = vsyncpa [#allocation3], 1 }
 0xd52   :  { %5150 = vsyncpa [#allocation3 + $0x1], 1 }
 0xd53   :  { %5151 = vsyncpa [#allocation6], 1 }
 0xd54   :  { %5153 = vsyncpa [#allocation6 + $0x1], 1 }
 0xd55   :  { %5154 = vsyncpa [#allocation9], 1 }
 0xd56   :  { %5156 = vsyncpa [#allocation9 + $0x1], 1 }
 0xd57   :  { %5157 = vsyncpa [#allocation12], 1 }
 0xd58   :  { %5159 = vsyncpa [#allocation12 + $0x1], 1 }
 0xd59   :  { %5160 = vsyncpa [#allocation15], 1 }
 0xd5a   :  { %5162 = vsyncpa [#allocation15 + $0x1], 1 }
 0xd5b   :  { %5163 = vsyncpa [#allocation18], 1 }
 0xd5c   :  { %5165 = vsyncpa [#allocation18 + $0x1], 1 }
 0xd5d   :  { %5166 = vsyncpa [#allocation21], 1 }
 0xd5e   :  { %5167 = vsyncpa [#allocation24], 1 }
 0xd5f   :  { %5169 = vsyncpa [#allocation24 + $0x1], 1 }
 0xd60   :  { %5170 = vsyncpa [#allocation27], 1 }
 0xd61   :  { %5172 = vsyncpa [#allocation27 + $0x1], 1 }
 0xd62   :  { %5173 = vsyncpa [#allocation30], 1 }
 0xd63   :  { %5175 = vsyncpa [#allocation30 + $0x1], 1 }
 0xd64   :  { %5176 = vsyncpa [#allocation33], 1 }
 0xd65   :  { %5178 = vsyncpa [#allocation33 + $0x1], 1 }
 0xd66   :  { %5179 = vsyncpa [#allocation4], 1 }
 0xd67   :  { %5181 = vsyncpa [#allocation4 + $0x1], 1 }

</bundles_post_ra>
